<compile_context>
chip_gen: v5e
topology: v5e:2x2
jax: 0.10.0
libtpu: 0.0.40
codegen_flags: <defaults>
</compile_context>

<pallas_src>
import functools

import jax
import jax.numpy as jnp
from jax import lax
from jax.experimental import pallas as pl
from jax.experimental.pallas import tpu as pltpu

BN_EPS = 1e-5


# ----------------------------------------------------------------------------
# Fused GhostBottleneck kernel (channels-major, spatial flattened onto lanes)
# ----------------------------------------------------------------------------
def _ghost_bottleneck_kernel(x_ref, wmask_ref,
                             w1pw_ref, b1pw_ref, w1dw_ref, b1dw_ref,
                             w2pw_ref, b2pw_ref, w2dw_ref, b2dw_ref,
                             o_ref, *, H, W):
    HW = H * W
    PAD = 2 * W + 2          # zero halo so every 5x5 tap is a static slice
    x = x_ref[0]             # (C1, HW)  channels on sublanes, spatial on lanes

    def silu(v):
        return v * jax.nn.sigmoid(v)

    def pointwise(w_ref, b_ref, parts):
        # 1x1 conv + folded BN: out = W @ concat(parts, channel axis) + b,
        # without materialising the concat.  parts: list of (Ci, HW) arrays.
        cout, cin = w_ref.shape
        acc = jnp.zeros((cout, HW), jnp.float32)
        off = 0
        for part in parts:
            ci_n = part.shape[0]
            if cin <= 64:
                # tiny channel count: VPU broadcast-FMA, skip the MXU entirely
                for ci in range(ci_n):
                    acc = acc + (w_ref[:, off + ci:off + ci + 1]
                                 * part[ci:ci + 1, :])
            else:
                acc = acc + jnp.dot(w_ref[:, off:off + ci_n], part,
                                    preferred_element_type=jnp.float32)
            off += ci_n
        return acc + b_ref[...]

    def depthwise5(w_ref, b_ref, inp):
        # 5x5 depthwise conv (stride 1, pad 2) on the flat (C, HW) layout.
        # Row (h) halo comes from the zero pad of the flat buffer; column (w)
        # wrap-around is removed with the precomputed lane-validity masks.
        C = w_ref.shape[0]
        zpad = jnp.zeros((C, PAD), jnp.float32)
        xp = jnp.concatenate([zpad, inp, zpad], axis=1)   # (C, HW + 2*PAD)
        acc = jnp.zeros((C, HW), jnp.float32)
        for t in range(25):
            i, j = divmod(t, 5)
            start = PAD + (i - 2) * W + (j - 2)
            tap = xp[:, start:start + HW]                 # static lane shift
            if j != 2:                                    # center col needs no mask
                tap = tap * wmask_ref[j:j + 1, :]
            acc = acc + tap * w_ref[:, t:t + 1]
        return acc + b_ref[...]

    # GhostConv #1 (act = SiLU)
    y1 = silu(pointwise(w1pw_ref, b1pw_ref, [x]))
    y2 = silu(depthwise5(w1dw_ref, b1dw_ref, y1))
    # GhostConv #2 (act = Identity); its input is concat([y1, y2], channels)
    z1 = pointwise(w2pw_ref, b2pw_ref, [y1, y2])
    z2 = depthwise5(w2dw_ref, b2dw_ref, z1)
    # output = concat([z1, z2], channels) + x  (Identity shortcut, s == 1),
    # written channel-range by channel-range to avoid a sublane concat.
    cg2 = z1.shape[0]
    o_ref[0, :cg2, :] = z1 + x[:cg2, :]
    o_ref[0, cg2:, :] = z2 + x[cg2:, :]


# ----------------------------------------------------------------------------
# Wrapper: fold BN into weights, build masks, launch the fused kernel
# ----------------------------------------------------------------------------
def _fold_dw(w, s):
    # (5,5,C) * per-channel scale -> (C, 25) with column t = 5*i + j
    C = w.shape[-1]
    return jnp.transpose(w * s[None, None, :], (2, 0, 1)).reshape(C, 25)


def _prepare_kernel_params(p):
    return {
        "w1_pw": (p["g1_pw_w"] * p["g1_pw_s"][None, :]).T,   # (cg1, c1)
        "b1_pw": p["g1_pw_b"].reshape(-1, 1),
        "w1_dw": _fold_dw(p["g1_dw_w"], p["g1_dw_s"]),        # (cg1, 25)
        "b1_dw": p["g1_dw_b"].reshape(-1, 1),
        "w2_pw": (p["g2_pw_w"] * p["g2_pw_s"][None, :]).T,   # (cg2, c_)
        "b2_pw": p["g2_pw_b"].reshape(-1, 1),
        "w2_dw": _fold_dw(p["g2_dw_w"], p["g2_dw_s"]),        # (cg2, 25)
        "b2_dw": p["g2_dw_b"].reshape(-1, 1),
    }


def ghost_bottleneck(x_nchw, p):
    N, C1, H, W = x_nchw.shape
    HW = H * W
    kp = _prepare_kernel_params(p)
    cg1 = kp["w1_pw"].shape[0]
    cg2 = kp["w2_pw"].shape[0]
    c_ = 2 * cg1
    C2 = 2 * cg2
    assert C2 == C1, "Identity shortcut (s == 1) requires c2 == c1"
    assert kp["w1_pw"].shape[1] == C1 and kp["w2_pw"].shape[1] == c_

    # Column-validity masks for the 5 horizontal tap offsets (j - 2).
    ww = jnp.arange(HW, dtype=jnp.int32) % W
    wmask = jnp.stack(
        [((ww + (j - 2) >= 0) & (ww + (j - 2) < W)).astype(jnp.float32)
         for j in range(5)], axis=0)                          # (5, HW)

    # NCHW -> channels-major flat layout: just a contiguous reshape.
    xf = x_nchw.reshape(N, C1, HW).astype(jnp.float32)

    out = pl.pallas_call(
        functools.partial(_ghost_bottleneck_kernel, H=H, W=W),
        out_shape=jax.ShapeDtypeStruct((N, C2, HW), jnp.float32),
        grid=(N,),
        in_specs=[
            pl.BlockSpec((1, C1, HW), lambda n: (n, 0, 0)),
            pl.BlockSpec((5, HW), lambda n: (0, 0)),
            pl.BlockSpec((cg1, C1), lambda n: (0, 0)),
            pl.BlockSpec((cg1, 1), lambda n: (0, 0)),
            pl.BlockSpec((cg1, 25), lambda n: (0, 0)),
            pl.BlockSpec((cg1, 1), lambda n: (0, 0)),
            pl.BlockSpec((cg2, c_), lambda n: (0, 0)),
            pl.BlockSpec((cg2, 1), lambda n: (0, 0)),
            pl.BlockSpec((cg2, 25), lambda n: (0, 0)),
            pl.BlockSpec((cg2, 1), lambda n: (0, 0)),
        ],
        out_specs=pl.BlockSpec((1, C2, HW), lambda n: (n, 0, 0)),
        compiler_params=pltpu.CompilerParams(
            dimension_semantics=("parallel",)),
    )(xf, wmask,
      kp["w1_pw"], kp["b1_pw"], kp["w1_dw"], kp["b1_dw"],
      kp["w2_pw"], kp["b2_pw"], kp["w2_dw"], kp["b2_dw"])
    return out.reshape(N, C2, H, W)


# ----------------------------------------------------------------------------
# Deterministic parameter init (conv weights + folded eval-mode BatchNorm)
# ----------------------------------------------------------------------------
def _folded_bn(key, c):
    k1, k2, k3, k4 = jax.random.split(key, 4)
    gamma = jax.random.uniform(k1, (c,), jnp.float32, 0.5, 1.5)
    beta = jax.random.normal(k2, (c,), jnp.float32) * 0.1
    mean = jax.random.normal(k3, (c,), jnp.float32) * 0.1
    var = jax.random.uniform(k4, (c,), jnp.float32, 0.5, 1.5)
    scale = gamma / jnp.sqrt(var + BN_EPS)
    bias = beta - mean * scale
    return scale, bias


def init_params(key, c1, c2):
    c_ = c2 // 2       # GhostBottleneck hidden width
    cg1 = c_ // 2      # GhostConv#1 internal width (output = 2*cg1 = c_)
    cg2 = c2 // 2      # GhostConv#2 internal width (output = 2*cg2 = c2)
    ks = jax.random.split(key, 8)
    p = {}
    p["g1_pw_w"] = jax.random.normal(ks[0], (c1, cg1), jnp.float32) * 0.1
    p["g1_pw_s"], p["g1_pw_b"] = _folded_bn(ks[1], cg1)
    p["g1_dw_w"] = jax.random.normal(ks[2], (5, 5, cg1), jnp.float32) * 0.1
    p["g1_dw_s"], p["g1_dw_b"] = _folded_bn(ks[3], cg1)
    p["g2_pw_w"] = jax.random.normal(ks[4], (c_, cg2), jnp.float32) * 0.1
    p["g2_pw_s"], p["g2_pw_b"] = _folded_bn(ks[5], cg2)
    p["g2_dw_w"] = jax.random.normal(ks[6], (5, 5, cg2), jnp.float32) * 0.1
    p["g2_dw_s"], p["g2_dw_b"] = _folded_bn(ks[7], cg2)
    return p


# ----------------------------------------------------------------------------
# Pure-JAX reference (unfused params; validates BN folding + fused kernel)
# ----------------------------------------------------------------------------
def _pw_ref(x, w, s, b, act):
    y = jnp.einsum("nhwc,co->nhwo", x, w) * s + b
    return y * jax.nn.sigmoid(y) if act else y


def _dw_ref(x, w, s, b, act):
    C = x.shape[-1]
    rhs = w.reshape(5, 5, 1, C)
    dn = lax.conv_dimension_numbers(x.shape, rhs.shape, ("NHWC", "HWIO", "NHWC"))
    y = lax.conv_general_dilated(x, rhs, (1, 1), [(2, 2), (2, 2)],
                                 dimension_numbers=dn, feature_group_count=C)
    y = y * s + b
    return y * jax.nn.sigmoid(y) if act else y


def ghost_bottleneck_ref(x_nchw, p):
    x = jnp.transpose(x_nchw, (0, 2, 3, 1)).astype(jnp.float32)
    y1 = _pw_ref(x, p["g1_pw_w"], p["g1_pw_s"], p["g1_pw_b"], True)
    y2 = _dw_ref(y1, p["g1_dw_w"], p["g1_dw_s"], p["g1_dw_b"], True)
    g1 = jnp.concatenate([y1, y2], axis=-1)
    z1 = _pw_ref(g1, p["g2_pw_w"], p["g2_pw_s"], p["g2_pw_b"], False)
    z2 = _dw_ref(z1, p["g2_dw_w"], p["g2_dw_s"], p["g2_dw_b"], False)
    g2 = jnp.concatenate([z1, z2], axis=-1)
    return jnp.transpose(g2 + x, (0, 3, 1, 2))


if __name__ == "__main__":
    key = jax.random.PRNGKey(0)
    kx, kparam = jax.random.split(key)
    N, C1, H, W = 2, 8, 16, 16
    C2 = 8  # Identity shortcut (s == 1) requires c2 == c1

    x = jax.random.normal(kx, (N, C1, H, W), jnp.float32)
    params = init_params(kparam, C1, C2)

    out = jax.block_until_ready(ghost_bottleneck(x, params))
    ref = ghost_bottleneck_ref(x, params)

    assert out.shape == (N, C2, H, W), out.shape
    assert bool(jnp.all(jnp.isfinite(out)))
    assert bool(jnp.allclose(out, ref, rtol=1e-4, atol=1e-4)), "mismatch vs reference"
    print("KERNEL_OK")
</pallas_src>

<mosaic_0001>
module attributes {stable_mosaic.version = 11 : i64} {
  func.func @_ghost_bottleneck_kernel(%arg0: i32, %arg1: memref<1x8x256xf32, #tpu.memory_space<vmem>>, %arg2: memref<5x256xf32, #tpu.memory_space<vmem>>, %arg3: memref<2x8xf32, #tpu.memory_space<vmem>>, %arg4: memref<2x1xf32, #tpu.memory_space<vmem>>, %arg5: memref<2x25xf32, #tpu.memory_space<vmem>>, %arg6: memref<2x1xf32, #tpu.memory_space<vmem>>, %arg7: memref<4x4xf32, #tpu.memory_space<vmem>>, %arg8: memref<4x1xf32, #tpu.memory_space<vmem>>, %arg9: memref<4x25xf32, #tpu.memory_space<vmem>>, %arg10: memref<4x1xf32, #tpu.memory_space<vmem>>, %arg11: memref<1x8x256xf32, #tpu.memory_space<vmem>>) attributes {dimension_semantics = [#tpu.dimension_semantics<parallel>], iteration_bounds = array<i64: 2>, scalar_prefetch = 0 : i64, scratch_operands = 0 : i64, tpu.core_type = #tpu.core_type<tc>, window_params = [{transform_indices = @transform_0, window_bounds = array<i64: 1, 8, 256>}, {pipeline_mode = #tpu.pipeline_mode<synchronous>, transform_indices = @transform_1, window_bounds = array<i64: 5, 256>}, {pipeline_mode = #tpu.pipeline_mode<synchronous>, transform_indices = @transform_2, window_bounds = array<i64: 2, 8>}, {pipeline_mode = #tpu.pipeline_mode<synchronous>, transform_indices = @transform_3, window_bounds = array<i64: 2, 1>}, {pipeline_mode = #tpu.pipeline_mode<synchronous>, transform_indices = @transform_4, window_bounds = array<i64: 2, 25>}, {pipeline_mode = #tpu.pipeline_mode<synchronous>, transform_indices = @transform_5, window_bounds = array<i64: 2, 1>}, {pipeline_mode = #tpu.pipeline_mode<synchronous>, transform_indices = @transform_6, window_bounds = array<i64: 4, 4>}, {pipeline_mode = #tpu.pipeline_mode<synchronous>, transform_indices = @transform_7, window_bounds = array<i64: 4, 1>}, {pipeline_mode = #tpu.pipeline_mode<synchronous>, transform_indices = @transform_8, window_bounds = array<i64: 4, 25>}, {pipeline_mode = #tpu.pipeline_mode<synchronous>, transform_indices = @transform_9, window_bounds = array<i64: 4, 1>}, {transform_indices = @transform_10, window_bounds = array<i64: 1, 8, 256>}]} {
    %c0 = arith.constant 0 : index
    %c0_0 = arith.constant 0 : index
    %c0_1 = arith.constant 0 : index
    %0 = vector.load %arg1[%c0, %c0_0, %c0_1] : memref<1x8x256xf32, #tpu.memory_space<vmem>>, vector<1x8x256xf32>
    %1 = vector.shape_cast %0 : vector<1x8x256xf32> to vector<8x256xf32>
    %cst = arith.constant 0.000000e+00 : f32
    %2 = vector.broadcast %cst : f32 to vector<2x256xf32>
    %c0_2 = arith.constant 0 : index
    %c0_3 = arith.constant 0 : index
    %3 = vector.load %arg3[%c0_2, %c0_3] : memref<2x8xf32, #tpu.memory_space<vmem>>, vector<2x1xf32>
    %4 = vector.extract_strided_slice %1 {offsets = [0, 0], sizes = [1, 256], strides = [1, 1]} : vector<8x256xf32> to vector<1x256xf32>
    %5 = vector.broadcast %3 : vector<2x1xf32> to vector<2x256xf32>
    %6 = vector.broadcast %4 : vector<1x256xf32> to vector<2x256xf32>
    %7 = arith.mulf %5, %6 : vector<2x256xf32>
    %8 = arith.addf %2, %7 : vector<2x256xf32>
    %c0_4 = arith.constant 0 : index
    %c1 = arith.constant 1 : index
    %9 = vector.load %arg3[%c0_4, %c1] : memref<2x8xf32, #tpu.memory_space<vmem>>, vector<2x1xf32>
    %10 = vector.extract_strided_slice %1 {offsets = [1, 0], sizes = [1, 256], strides = [1, 1]} : vector<8x256xf32> to vector<1x256xf32>
    %11 = vector.broadcast %9 : vector<2x1xf32> to vector<2x256xf32>
    %12 = vector.broadcast %10 : vector<1x256xf32> to vector<2x256xf32>
    %13 = arith.mulf %11, %12 : vector<2x256xf32>
    %14 = arith.addf %8, %13 : vector<2x256xf32>
    %c0_5 = arith.constant 0 : index
    %c2 = arith.constant 2 : index
    %15 = vector.load %arg3[%c0_5, %c2] : memref<2x8xf32, #tpu.memory_space<vmem>>, vector<2x1xf32>
    %16 = vector.extract_strided_slice %1 {offsets = [2, 0], sizes = [1, 256], strides = [1, 1]} : vector<8x256xf32> to vector<1x256xf32>
    %17 = vector.broadcast %15 : vector<2x1xf32> to vector<2x256xf32>
    %18 = vector.broadcast %16 : vector<1x256xf32> to vector<2x256xf32>
    %19 = arith.mulf %17, %18 : vector<2x256xf32>
    %20 = arith.addf %14, %19 : vector<2x256xf32>
    %c0_6 = arith.constant 0 : index
    %c3 = arith.constant 3 : index
    %21 = vector.load %arg3[%c0_6, %c3] : memref<2x8xf32, #tpu.memory_space<vmem>>, vector<2x1xf32>
    %22 = vector.extract_strided_slice %1 {offsets = [3, 0], sizes = [1, 256], strides = [1, 1]} : vector<8x256xf32> to vector<1x256xf32>
    %23 = vector.broadcast %21 : vector<2x1xf32> to vector<2x256xf32>
    %24 = vector.broadcast %22 : vector<1x256xf32> to vector<2x256xf32>
    %25 = arith.mulf %23, %24 : vector<2x256xf32>
    %26 = arith.addf %20, %25 : vector<2x256xf32>
    %c0_7 = arith.constant 0 : index
    %c4 = arith.constant 4 : index
    %27 = vector.load %arg3[%c0_7, %c4] : memref<2x8xf32, #tpu.memory_space<vmem>>, vector<2x1xf32>
    %28 = vector.extract_strided_slice %1 {offsets = [4, 0], sizes = [1, 256], strides = [1, 1]} : vector<8x256xf32> to vector<1x256xf32>
    %29 = vector.broadcast %27 : vector<2x1xf32> to vector<2x256xf32>
    %30 = vector.broadcast %28 : vector<1x256xf32> to vector<2x256xf32>
    %31 = arith.mulf %29, %30 : vector<2x256xf32>
    %32 = arith.addf %26, %31 : vector<2x256xf32>
    %c0_8 = arith.constant 0 : index
    %c5 = arith.constant 5 : index
    %33 = vector.load %arg3[%c0_8, %c5] : memref<2x8xf32, #tpu.memory_space<vmem>>, vector<2x1xf32>
    %34 = vector.extract_strided_slice %1 {offsets = [5, 0], sizes = [1, 256], strides = [1, 1]} : vector<8x256xf32> to vector<1x256xf32>
    %35 = vector.broadcast %33 : vector<2x1xf32> to vector<2x256xf32>
    %36 = vector.broadcast %34 : vector<1x256xf32> to vector<2x256xf32>
    %37 = arith.mulf %35, %36 : vector<2x256xf32>
    %38 = arith.addf %32, %37 : vector<2x256xf32>
    %c0_9 = arith.constant 0 : index
    %c6 = arith.constant 6 : index
    %39 = vector.load %arg3[%c0_9, %c6] : memref<2x8xf32, #tpu.memory_space<vmem>>, vector<2x1xf32>
    %40 = vector.extract_strided_slice %1 {offsets = [6, 0], sizes = [1, 256], strides = [1, 1]} : vector<8x256xf32> to vector<1x256xf32>
    %41 = vector.broadcast %39 : vector<2x1xf32> to vector<2x256xf32>
    %42 = vector.broadcast %40 : vector<1x256xf32> to vector<2x256xf32>
    %43 = arith.mulf %41, %42 : vector<2x256xf32>
    %44 = arith.addf %38, %43 : vector<2x256xf32>
    %c0_10 = arith.constant 0 : index
    %c7 = arith.constant 7 : index
    %45 = vector.load %arg3[%c0_10, %c7] : memref<2x8xf32, #tpu.memory_space<vmem>>, vector<2x1xf32>
    %46 = vector.extract_strided_slice %1 {offsets = [7, 0], sizes = [1, 256], strides = [1, 1]} : vector<8x256xf32> to vector<1x256xf32>
    %47 = vector.broadcast %45 : vector<2x1xf32> to vector<2x256xf32>
    %48 = vector.broadcast %46 : vector<1x256xf32> to vector<2x256xf32>
    %49 = arith.mulf %47, %48 : vector<2x256xf32>
    %50 = arith.addf %44, %49 : vector<2x256xf32>
    %c0_11 = arith.constant 0 : index
    %c0_12 = arith.constant 0 : index
    %51 = vector.load %arg4[%c0_11, %c0_12] : memref<2x1xf32, #tpu.memory_space<vmem>>, vector<2x1xf32>
    %52 = vector.broadcast %51 : vector<2x1xf32> to vector<2x256xf32>
    %53 = arith.addf %50, %52 : vector<2x256xf32>
    %54 = arith.negf %53 : vector<2x256xf32>
    %55 = math.exp %54 : vector<2x256xf32>
    %cst_13 = arith.constant 1.000000e+00 : f32
    %56 = vector.broadcast %cst_13 : f32 to vector<2x256xf32>
    %57 = arith.addf %56, %55 : vector<2x256xf32>
    %58 = arith.divf %56, %57 : vector<2x256xf32>
    %59 = arith.mulf %53, %58 : vector<2x256xf32>
    %cst_14 = arith.constant 0.000000e+00 : f32
    %60 = vector.broadcast %cst_14 : f32 to vector<2x34xf32>
    %61 = tpu.concatenate %60, %59, %60 in 1 : vector<2x34xf32>, vector<2x256xf32>, vector<2x34xf32> -> vector<2x324xf32>
    %cst_15 = arith.constant 0.000000e+00 : f32
    %62 = vector.broadcast %cst_15 : f32 to vector<2x256xf32>
    %63 = vector.extract_strided_slice %61 {offsets = [0, 0], sizes = [2, 256], strides = [1, 1]} : vector<2x324xf32> to vector<2x256xf32>
    %c0_16 = arith.constant 0 : index
    %c0_17 = arith.constant 0 : index
    %64 = vector.load %arg2[%c0_16, %c0_17] : memref<5x256xf32, #tpu.memory_space<vmem>>, vector<1x256xf32>
    %65 = vector.broadcast %64 : vector<1x256xf32> to vector<2x256xf32>
    %66 = arith.mulf %63, %65 : vector<2x256xf32>
    %c0_18 = arith.constant 0 : index
    %c0_19 = arith.constant 0 : index
    %67 = vector.load %arg5[%c0_18, %c0_19] : memref<2x25xf32, #tpu.memory_space<vmem>>, vector<2x1xf32>
    %68 = vector.broadcast %67 : vector<2x1xf32> to vector<2x256xf32>
    %69 = arith.mulf %66, %68 : vector<2x256xf32>
    %70 = arith.addf %62, %69 : vector<2x256xf32>
    %71 = vector.extract_strided_slice %61 {offsets = [0, 1], sizes = [2, 256], strides = [1, 1]} : vector<2x324xf32> to vector<2x256xf32>
    %c1_20 = arith.constant 1 : index
    %c0_21 = arith.constant 0 : index
    %72 = vector.load %arg2[%c1_20, %c0_21] : memref<5x256xf32, #tpu.memory_space<vmem>>, vector<1x256xf32>
    %73 = vector.broadcast %72 : vector<1x256xf32> to vector<2x256xf32>
    %74 = arith.mulf %71, %73 : vector<2x256xf32>
    %c0_22 = arith.constant 0 : index
    %c1_23 = arith.constant 1 : index
    %75 = vector.load %arg5[%c0_22, %c1_23] : memref<2x25xf32, #tpu.memory_space<vmem>>, vector<2x1xf32>
    %76 = vector.broadcast %75 : vector<2x1xf32> to vector<2x256xf32>
    %77 = arith.mulf %74, %76 : vector<2x256xf32>
    %78 = arith.addf %70, %77 : vector<2x256xf32>
    %79 = vector.extract_strided_slice %61 {offsets = [0, 2], sizes = [2, 256], strides = [1, 1]} : vector<2x324xf32> to vector<2x256xf32>
    %c0_24 = arith.constant 0 : index
    %c2_25 = arith.constant 2 : index
    %80 = vector.load %arg5[%c0_24, %c2_25] : memref<2x25xf32, #tpu.memory_space<vmem>>, vector<2x1xf32>
    %81 = vector.broadcast %80 : vector<2x1xf32> to vector<2x256xf32>
    %82 = arith.mulf %79, %81 : vector<2x256xf32>
    %83 = arith.addf %78, %82 : vector<2x256xf32>
    %84 = vector.extract_strided_slice %61 {offsets = [0, 3], sizes = [2, 256], strides = [1, 1]} : vector<2x324xf32> to vector<2x256xf32>
    %c3_26 = arith.constant 3 : index
    %c0_27 = arith.constant 0 : index
    %85 = vector.load %arg2[%c3_26, %c0_27] : memref<5x256xf32, #tpu.memory_space<vmem>>, vector<1x256xf32>
    %86 = vector.broadcast %85 : vector<1x256xf32> to vector<2x256xf32>
    %87 = arith.mulf %84, %86 : vector<2x256xf32>
    %c0_28 = arith.constant 0 : index
    %c3_29 = arith.constant 3 : index
    %88 = vector.load %arg5[%c0_28, %c3_29] : memref<2x25xf32, #tpu.memory_space<vmem>>, vector<2x1xf32>
    %89 = vector.broadcast %88 : vector<2x1xf32> to vector<2x256xf32>
    %90 = arith.mulf %87, %89 : vector<2x256xf32>
    %91 = arith.addf %83, %90 : vector<2x256xf32>
    %92 = vector.extract_strided_slice %61 {offsets = [0, 4], sizes = [2, 256], strides = [1, 1]} : vector<2x324xf32> to vector<2x256xf32>
    %c4_30 = arith.constant 4 : index
    %c0_31 = arith.constant 0 : index
    %93 = vector.load %arg2[%c4_30, %c0_31] : memref<5x256xf32, #tpu.memory_space<vmem>>, vector<1x256xf32>
    %94 = vector.broadcast %93 : vector<1x256xf32> to vector<2x256xf32>
    %95 = arith.mulf %92, %94 : vector<2x256xf32>
    %c0_32 = arith.constant 0 : index
    %c4_33 = arith.constant 4 : index
    %96 = vector.load %arg5[%c0_32, %c4_33] : memref<2x25xf32, #tpu.memory_space<vmem>>, vector<2x1xf32>
    %97 = vector.broadcast %96 : vector<2x1xf32> to vector<2x256xf32>
    %98 = arith.mulf %95, %97 : vector<2x256xf32>
    %99 = arith.addf %91, %98 : vector<2x256xf32>
    %100 = vector.extract_strided_slice %61 {offsets = [0, 16], sizes = [2, 256], strides = [1, 1]} : vector<2x324xf32> to vector<2x256xf32>
    %c0_34 = arith.constant 0 : index
    %c0_35 = arith.constant 0 : index
    %101 = vector.load %arg2[%c0_34, %c0_35] : memref<5x256xf32, #tpu.memory_space<vmem>>, vector<1x256xf32>
    %102 = vector.broadcast %101 : vector<1x256xf32> to vector<2x256xf32>
    %103 = arith.mulf %100, %102 : vector<2x256xf32>
    %c0_36 = arith.constant 0 : index
    %c5_37 = arith.constant 5 : index
    %104 = vector.load %arg5[%c0_36, %c5_37] : memref<2x25xf32, #tpu.memory_space<vmem>>, vector<2x1xf32>
    %105 = vector.broadcast %104 : vector<2x1xf32> to vector<2x256xf32>
    %106 = arith.mulf %103, %105 : vector<2x256xf32>
    %107 = arith.addf %99, %106 : vector<2x256xf32>
    %108 = vector.extract_strided_slice %61 {offsets = [0, 17], sizes = [2, 256], strides = [1, 1]} : vector<2x324xf32> to vector<2x256xf32>
    %c1_38 = arith.constant 1 : index
    %c0_39 = arith.constant 0 : index
    %109 = vector.load %arg2[%c1_38, %c0_39] : memref<5x256xf32, #tpu.memory_space<vmem>>, vector<1x256xf32>
    %110 = vector.broadcast %109 : vector<1x256xf32> to vector<2x256xf32>
    %111 = arith.mulf %108, %110 : vector<2x256xf32>
    %c0_40 = arith.constant 0 : index
    %c6_41 = arith.constant 6 : index
    %112 = vector.load %arg5[%c0_40, %c6_41] : memref<2x25xf32, #tpu.memory_space<vmem>>, vector<2x1xf32>
    %113 = vector.broadcast %112 : vector<2x1xf32> to vector<2x256xf32>
    %114 = arith.mulf %111, %113 : vector<2x256xf32>
    %115 = arith.addf %107, %114 : vector<2x256xf32>
    %116 = vector.extract_strided_slice %61 {offsets = [0, 18], sizes = [2, 256], strides = [1, 1]} : vector<2x324xf32> to vector<2x256xf32>
    %c0_42 = arith.constant 0 : index
    %c7_43 = arith.constant 7 : index
    %117 = vector.load %arg5[%c0_42, %c7_43] : memref<2x25xf32, #tpu.memory_space<vmem>>, vector<2x1xf32>
    %118 = vector.broadcast %117 : vector<2x1xf32> to vector<2x256xf32>
    %119 = arith.mulf %116, %118 : vector<2x256xf32>
    %120 = arith.addf %115, %119 : vector<2x256xf32>
    %121 = vector.extract_strided_slice %61 {offsets = [0, 19], sizes = [2, 256], strides = [1, 1]} : vector<2x324xf32> to vector<2x256xf32>
    %c3_44 = arith.constant 3 : index
    %c0_45 = arith.constant 0 : index
    %122 = vector.load %arg2[%c3_44, %c0_45] : memref<5x256xf32, #tpu.memory_space<vmem>>, vector<1x256xf32>
    %123 = vector.broadcast %122 : vector<1x256xf32> to vector<2x256xf32>
    %124 = arith.mulf %121, %123 : vector<2x256xf32>
    %c0_46 = arith.constant 0 : index
    %c8 = arith.constant 8 : index
    %125 = vector.load %arg5[%c0_46, %c8] : memref<2x25xf32, #tpu.memory_space<vmem>>, vector<2x1xf32>
    %126 = vector.broadcast %125 : vector<2x1xf32> to vector<2x256xf32>
    %127 = arith.mulf %124, %126 : vector<2x256xf32>
    %128 = arith.addf %120, %127 : vector<2x256xf32>
    %129 = vector.extract_strided_slice %61 {offsets = [0, 20], sizes = [2, 256], strides = [1, 1]} : vector<2x324xf32> to vector<2x256xf32>
    %c4_47 = arith.constant 4 : index
    %c0_48 = arith.constant 0 : index
    %130 = vector.load %arg2[%c4_47, %c0_48] : memref<5x256xf32, #tpu.memory_space<vmem>>, vector<1x256xf32>
    %131 = vector.broadcast %130 : vector<1x256xf32> to vector<2x256xf32>
    %132 = arith.mulf %129, %131 : vector<2x256xf32>
    %c0_49 = arith.constant 0 : index
    %c9 = arith.constant 9 : index
    %133 = vector.load %arg5[%c0_49, %c9] : memref<2x25xf32, #tpu.memory_space<vmem>>, vector<2x1xf32>
    %134 = vector.broadcast %133 : vector<2x1xf32> to vector<2x256xf32>
    %135 = arith.mulf %132, %134 : vector<2x256xf32>
    %136 = arith.addf %128, %135 : vector<2x256xf32>
    %137 = vector.extract_strided_slice %61 {offsets = [0, 32], sizes = [2, 256], strides = [1, 1]} : vector<2x324xf32> to vector<2x256xf32>
    %c0_50 = arith.constant 0 : index
    %c0_51 = arith.constant 0 : index
    %138 = vector.load %arg2[%c0_50, %c0_51] : memref<5x256xf32, #tpu.memory_space<vmem>>, vector<1x256xf32>
    %139 = vector.broadcast %138 : vector<1x256xf32> to vector<2x256xf32>
    %140 = arith.mulf %137, %139 : vector<2x256xf32>
    %c0_52 = arith.constant 0 : index
    %c10 = arith.constant 10 : index
    %141 = vector.load %arg5[%c0_52, %c10] : memref<2x25xf32, #tpu.memory_space<vmem>>, vector<2x1xf32>
    %142 = vector.broadcast %141 : vector<2x1xf32> to vector<2x256xf32>
    %143 = arith.mulf %140, %142 : vector<2x256xf32>
    %144 = arith.addf %136, %143 : vector<2x256xf32>
    %145 = vector.extract_strided_slice %61 {offsets = [0, 33], sizes = [2, 256], strides = [1, 1]} : vector<2x324xf32> to vector<2x256xf32>
    %c1_53 = arith.constant 1 : index
    %c0_54 = arith.constant 0 : index
    %146 = vector.load %arg2[%c1_53, %c0_54] : memref<5x256xf32, #tpu.memory_space<vmem>>, vector<1x256xf32>
    %147 = vector.broadcast %146 : vector<1x256xf32> to vector<2x256xf32>
    %148 = arith.mulf %145, %147 : vector<2x256xf32>
    %c0_55 = arith.constant 0 : index
    %c11 = arith.constant 11 : index
    %149 = vector.load %arg5[%c0_55, %c11] : memref<2x25xf32, #tpu.memory_space<vmem>>, vector<2x1xf32>
    %150 = vector.broadcast %149 : vector<2x1xf32> to vector<2x256xf32>
    %151 = arith.mulf %148, %150 : vector<2x256xf32>
    %152 = arith.addf %144, %151 : vector<2x256xf32>
    %153 = vector.extract_strided_slice %61 {offsets = [0, 34], sizes = [2, 256], strides = [1, 1]} : vector<2x324xf32> to vector<2x256xf32>
    %c0_56 = arith.constant 0 : index
    %c12 = arith.constant 12 : index
    %154 = vector.load %arg5[%c0_56, %c12] : memref<2x25xf32, #tpu.memory_space<vmem>>, vector<2x1xf32>
    %155 = vector.broadcast %154 : vector<2x1xf32> to vector<2x256xf32>
    %156 = arith.mulf %153, %155 : vector<2x256xf32>
    %157 = arith.addf %152, %156 : vector<2x256xf32>
    %158 = vector.extract_strided_slice %61 {offsets = [0, 35], sizes = [2, 256], strides = [1, 1]} : vector<2x324xf32> to vector<2x256xf32>
    %c3_57 = arith.constant 3 : index
    %c0_58 = arith.constant 0 : index
    %159 = vector.load %arg2[%c3_57, %c0_58] : memref<5x256xf32, #tpu.memory_space<vmem>>, vector<1x256xf32>
    %160 = vector.broadcast %159 : vector<1x256xf32> to vector<2x256xf32>
    %161 = arith.mulf %158, %160 : vector<2x256xf32>
    %c0_59 = arith.constant 0 : index
    %c13 = arith.constant 13 : index
    %162 = vector.load %arg5[%c0_59, %c13] : memref<2x25xf32, #tpu.memory_space<vmem>>, vector<2x1xf32>
    %163 = vector.broadcast %162 : vector<2x1xf32> to vector<2x256xf32>
    %164 = arith.mulf %161, %163 : vector<2x256xf32>
    %165 = arith.addf %157, %164 : vector<2x256xf32>
    %166 = vector.extract_strided_slice %61 {offsets = [0, 36], sizes = [2, 256], strides = [1, 1]} : vector<2x324xf32> to vector<2x256xf32>
    %c4_60 = arith.constant 4 : index
    %c0_61 = arith.constant 0 : index
    %167 = vector.load %arg2[%c4_60, %c0_61] : memref<5x256xf32, #tpu.memory_space<vmem>>, vector<1x256xf32>
    %168 = vector.broadcast %167 : vector<1x256xf32> to vector<2x256xf32>
    %169 = arith.mulf %166, %168 : vector<2x256xf32>
    %c0_62 = arith.constant 0 : index
    %c14 = arith.constant 14 : index
    %170 = vector.load %arg5[%c0_62, %c14] : memref<2x25xf32, #tpu.memory_space<vmem>>, vector<2x1xf32>
    %171 = vector.broadcast %170 : vector<2x1xf32> to vector<2x256xf32>
    %172 = arith.mulf %169, %171 : vector<2x256xf32>
    %173 = arith.addf %165, %172 : vector<2x256xf32>
    %174 = vector.extract_strided_slice %61 {offsets = [0, 48], sizes = [2, 256], strides = [1, 1]} : vector<2x324xf32> to vector<2x256xf32>
    %c0_63 = arith.constant 0 : index
    %c0_64 = arith.constant 0 : index
    %175 = vector.load %arg2[%c0_63, %c0_64] : memref<5x256xf32, #tpu.memory_space<vmem>>, vector<1x256xf32>
    %176 = vector.broadcast %175 : vector<1x256xf32> to vector<2x256xf32>
    %177 = arith.mulf %174, %176 : vector<2x256xf32>
    %c0_65 = arith.constant 0 : index
    %c15 = arith.constant 15 : index
    %178 = vector.load %arg5[%c0_65, %c15] : memref<2x25xf32, #tpu.memory_space<vmem>>, vector<2x1xf32>
    %179 = vector.broadcast %178 : vector<2x1xf32> to vector<2x256xf32>
    %180 = arith.mulf %177, %179 : vector<2x256xf32>
    %181 = arith.addf %173, %180 : vector<2x256xf32>
    %182 = vector.extract_strided_slice %61 {offsets = [0, 49], sizes = [2, 256], strides = [1, 1]} : vector<2x324xf32> to vector<2x256xf32>
    %c1_66 = arith.constant 1 : index
    %c0_67 = arith.constant 0 : index
    %183 = vector.load %arg2[%c1_66, %c0_67] : memref<5x256xf32, #tpu.memory_space<vmem>>, vector<1x256xf32>
    %184 = vector.broadcast %183 : vector<1x256xf32> to vector<2x256xf32>
    %185 = arith.mulf %182, %184 : vector<2x256xf32>
    %c0_68 = arith.constant 0 : index
    %c16 = arith.constant 16 : index
    %186 = vector.load %arg5[%c0_68, %c16] : memref<2x25xf32, #tpu.memory_space<vmem>>, vector<2x1xf32>
    %187 = vector.broadcast %186 : vector<2x1xf32> to vector<2x256xf32>
    %188 = arith.mulf %185, %187 : vector<2x256xf32>
    %189 = arith.addf %181, %188 : vector<2x256xf32>
    %190 = vector.extract_strided_slice %61 {offsets = [0, 50], sizes = [2, 256], strides = [1, 1]} : vector<2x324xf32> to vector<2x256xf32>
    %c0_69 = arith.constant 0 : index
    %c17 = arith.constant 17 : index
    %191 = vector.load %arg5[%c0_69, %c17] : memref<2x25xf32, #tpu.memory_space<vmem>>, vector<2x1xf32>
    %192 = vector.broadcast %191 : vector<2x1xf32> to vector<2x256xf32>
    %193 = arith.mulf %190, %192 : vector<2x256xf32>
    %194 = arith.addf %189, %193 : vector<2x256xf32>
    %195 = vector.extract_strided_slice %61 {offsets = [0, 51], sizes = [2, 256], strides = [1, 1]} : vector<2x324xf32> to vector<2x256xf32>
    %c3_70 = arith.constant 3 : index
    %c0_71 = arith.constant 0 : index
    %196 = vector.load %arg2[%c3_70, %c0_71] : memref<5x256xf32, #tpu.memory_space<vmem>>, vector<1x256xf32>
    %197 = vector.broadcast %196 : vector<1x256xf32> to vector<2x256xf32>
    %198 = arith.mulf %195, %197 : vector<2x256xf32>
    %c0_72 = arith.constant 0 : index
    %c18 = arith.constant 18 : index
    %199 = vector.load %arg5[%c0_72, %c18] : memref<2x25xf32, #tpu.memory_space<vmem>>, vector<2x1xf32>
    %200 = vector.broadcast %199 : vector<2x1xf32> to vector<2x256xf32>
    %201 = arith.mulf %198, %200 : vector<2x256xf32>
    %202 = arith.addf %194, %201 : vector<2x256xf32>
    %203 = vector.extract_strided_slice %61 {offsets = [0, 52], sizes = [2, 256], strides = [1, 1]} : vector<2x324xf32> to vector<2x256xf32>
    %c4_73 = arith.constant 4 : index
    %c0_74 = arith.constant 0 : index
    %204 = vector.load %arg2[%c4_73, %c0_74] : memref<5x256xf32, #tpu.memory_space<vmem>>, vector<1x256xf32>
    %205 = vector.broadcast %204 : vector<1x256xf32> to vector<2x256xf32>
    %206 = arith.mulf %203, %205 : vector<2x256xf32>
    %c0_75 = arith.constant 0 : index
    %c19 = arith.constant 19 : index
    %207 = vector.load %arg5[%c0_75, %c19] : memref<2x25xf32, #tpu.memory_space<vmem>>, vector<2x1xf32>
    %208 = vector.broadcast %207 : vector<2x1xf32> to vector<2x256xf32>
    %209 = arith.mulf %206, %208 : vector<2x256xf32>
    %210 = arith.addf %202, %209 : vector<2x256xf32>
    %211 = vector.extract_strided_slice %61 {offsets = [0, 64], sizes = [2, 256], strides = [1, 1]} : vector<2x324xf32> to vector<2x256xf32>
    %c0_76 = arith.constant 0 : index
    %c0_77 = arith.constant 0 : index
    %212 = vector.load %arg2[%c0_76, %c0_77] : memref<5x256xf32, #tpu.memory_space<vmem>>, vector<1x256xf32>
    %213 = vector.broadcast %212 : vector<1x256xf32> to vector<2x256xf32>
    %214 = arith.mulf %211, %213 : vector<2x256xf32>
    %c0_78 = arith.constant 0 : index
    %c20 = arith.constant 20 : index
    %215 = vector.load %arg5[%c0_78, %c20] : memref<2x25xf32, #tpu.memory_space<vmem>>, vector<2x1xf32>
    %216 = vector.broadcast %215 : vector<2x1xf32> to vector<2x256xf32>
    %217 = arith.mulf %214, %216 : vector<2x256xf32>
    %218 = arith.addf %210, %217 : vector<2x256xf32>
    %219 = vector.extract_strided_slice %61 {offsets = [0, 65], sizes = [2, 256], strides = [1, 1]} : vector<2x324xf32> to vector<2x256xf32>
    %c1_79 = arith.constant 1 : index
    %c0_80 = arith.constant 0 : index
    %220 = vector.load %arg2[%c1_79, %c0_80] : memref<5x256xf32, #tpu.memory_space<vmem>>, vector<1x256xf32>
    %221 = vector.broadcast %220 : vector<1x256xf32> to vector<2x256xf32>
    %222 = arith.mulf %219, %221 : vector<2x256xf32>
    %c0_81 = arith.constant 0 : index
    %c21 = arith.constant 21 : index
    %223 = vector.load %arg5[%c0_81, %c21] : memref<2x25xf32, #tpu.memory_space<vmem>>, vector<2x1xf32>
    %224 = vector.broadcast %223 : vector<2x1xf32> to vector<2x256xf32>
    %225 = arith.mulf %222, %224 : vector<2x256xf32>
    %226 = arith.addf %218, %225 : vector<2x256xf32>
    %227 = vector.extract_strided_slice %61 {offsets = [0, 66], sizes = [2, 256], strides = [1, 1]} : vector<2x324xf32> to vector<2x256xf32>
    %c0_82 = arith.constant 0 : index
    %c22 = arith.constant 22 : index
    %228 = vector.load %arg5[%c0_82, %c22] : memref<2x25xf32, #tpu.memory_space<vmem>>, vector<2x1xf32>
    %229 = vector.broadcast %228 : vector<2x1xf32> to vector<2x256xf32>
    %230 = arith.mulf %227, %229 : vector<2x256xf32>
    %231 = arith.addf %226, %230 : vector<2x256xf32>
    %232 = vector.extract_strided_slice %61 {offsets = [0, 67], sizes = [2, 256], strides = [1, 1]} : vector<2x324xf32> to vector<2x256xf32>
    %c3_83 = arith.constant 3 : index
    %c0_84 = arith.constant 0 : index
    %233 = vector.load %arg2[%c3_83, %c0_84] : memref<5x256xf32, #tpu.memory_space<vmem>>, vector<1x256xf32>
    %234 = vector.broadcast %233 : vector<1x256xf32> to vector<2x256xf32>
    %235 = arith.mulf %232, %234 : vector<2x256xf32>
    %c0_85 = arith.constant 0 : index
    %c23 = arith.constant 23 : index
    %236 = vector.load %arg5[%c0_85, %c23] : memref<2x25xf32, #tpu.memory_space<vmem>>, vector<2x1xf32>
    %237 = vector.broadcast %236 : vector<2x1xf32> to vector<2x256xf32>
    %238 = arith.mulf %235, %237 : vector<2x256xf32>
    %239 = arith.addf %231, %238 : vector<2x256xf32>
    %240 = vector.extract_strided_slice %61 {offsets = [0, 68], sizes = [2, 256], strides = [1, 1]} : vector<2x324xf32> to vector<2x256xf32>
    %c4_86 = arith.constant 4 : index
    %c0_87 = arith.constant 0 : index
    %241 = vector.load %arg2[%c4_86, %c0_87] : memref<5x256xf32, #tpu.memory_space<vmem>>, vector<1x256xf32>
    %242 = vector.broadcast %241 : vector<1x256xf32> to vector<2x256xf32>
    %243 = arith.mulf %240, %242 : vector<2x256xf32>
    %c0_88 = arith.constant 0 : index
    %c24 = arith.constant 24 : index
    %244 = vector.load %arg5[%c0_88, %c24] : memref<2x25xf32, #tpu.memory_space<vmem>>, vector<2x1xf32>
    %245 = vector.broadcast %244 : vector<2x1xf32> to vector<2x256xf32>
    %246 = arith.mulf %243, %245 : vector<2x256xf32>
    %247 = arith.addf %239, %246 : vector<2x256xf32>
    %c0_89 = arith.constant 0 : index
    %c0_90 = arith.constant 0 : index
    %248 = vector.load %arg6[%c0_89, %c0_90] : memref<2x1xf32, #tpu.memory_space<vmem>>, vector<2x1xf32>
    %249 = vector.broadcast %248 : vector<2x1xf32> to vector<2x256xf32>
    %250 = arith.addf %247, %249 : vector<2x256xf32>
    %251 = arith.negf %250 : vector<2x256xf32>
    %252 = math.exp %251 : vector<2x256xf32>
    %cst_91 = arith.constant 1.000000e+00 : f32
    %253 = vector.broadcast %cst_91 : f32 to vector<2x256xf32>
    %254 = arith.addf %253, %252 : vector<2x256xf32>
    %255 = arith.divf %253, %254 : vector<2x256xf32>
    %256 = arith.mulf %250, %255 : vector<2x256xf32>
    %cst_92 = arith.constant 0.000000e+00 : f32
    %257 = vector.broadcast %cst_92 : f32 to vector<4x256xf32>
    %c0_93 = arith.constant 0 : index
    %c0_94 = arith.constant 0 : index
    %258 = vector.load %arg7[%c0_93, %c0_94] : memref<4x4xf32, #tpu.memory_space<vmem>>, vector<4x1xf32>
    %259 = vector.extract_strided_slice %59 {offsets = [0, 0], sizes = [1, 256], strides = [1, 1]} : vector<2x256xf32> to vector<1x256xf32>
    %260 = vector.broadcast %258 : vector<4x1xf32> to vector<4x256xf32>
    %261 = vector.broadcast %259 : vector<1x256xf32> to vector<4x256xf32>
    %262 = arith.mulf %260, %261 : vector<4x256xf32>
    %263 = arith.addf %257, %262 : vector<4x256xf32>
    %c0_95 = arith.constant 0 : index
    %c1_96 = arith.constant 1 : index
    %264 = vector.load %arg7[%c0_95, %c1_96] : memref<4x4xf32, #tpu.memory_space<vmem>>, vector<4x1xf32>
    %265 = vector.extract_strided_slice %59 {offsets = [1, 0], sizes = [1, 256], strides = [1, 1]} : vector<2x256xf32> to vector<1x256xf32>
    %266 = vector.broadcast %264 : vector<4x1xf32> to vector<4x256xf32>
    %267 = vector.broadcast %265 : vector<1x256xf32> to vector<4x256xf32>
    %268 = arith.mulf %266, %267 : vector<4x256xf32>
    %269 = arith.addf %263, %268 : vector<4x256xf32>
    %c0_97 = arith.constant 0 : index
    %c2_98 = arith.constant 2 : index
    %270 = vector.load %arg7[%c0_97, %c2_98] : memref<4x4xf32, #tpu.memory_space<vmem>>, vector<4x1xf32>
    %271 = vector.extract_strided_slice %256 {offsets = [0, 0], sizes = [1, 256], strides = [1, 1]} : vector<2x256xf32> to vector<1x256xf32>
    %272 = vector.broadcast %270 : vector<4x1xf32> to vector<4x256xf32>
    %273 = vector.broadcast %271 : vector<1x256xf32> to vector<4x256xf32>
    %274 = arith.mulf %272, %273 : vector<4x256xf32>
    %275 = arith.addf %269, %274 : vector<4x256xf32>
    %c0_99 = arith.constant 0 : index
    %c3_100 = arith.constant 3 : index
    %276 = vector.load %arg7[%c0_99, %c3_100] : memref<4x4xf32, #tpu.memory_space<vmem>>, vector<4x1xf32>
    %277 = vector.extract_strided_slice %256 {offsets = [1, 0], sizes = [1, 256], strides = [1, 1]} : vector<2x256xf32> to vector<1x256xf32>
    %278 = vector.broadcast %276 : vector<4x1xf32> to vector<4x256xf32>
    %279 = vector.broadcast %277 : vector<1x256xf32> to vector<4x256xf32>
    %280 = arith.mulf %278, %279 : vector<4x256xf32>
    %281 = arith.addf %275, %280 : vector<4x256xf32>
    %c0_101 = arith.constant 0 : index
    %c0_102 = arith.constant 0 : index
    %282 = vector.load %arg8[%c0_101, %c0_102] : memref<4x1xf32, #tpu.memory_space<vmem>>, vector<4x1xf32>
    %283 = vector.broadcast %282 : vector<4x1xf32> to vector<4x256xf32>
    %284 = arith.addf %281, %283 : vector<4x256xf32>
    %cst_103 = arith.constant 0.000000e+00 : f32
    %285 = vector.broadcast %cst_103 : f32 to vector<4x34xf32>
    %286 = tpu.concatenate %285, %284, %285 in 1 : vector<4x34xf32>, vector<4x256xf32>, vector<4x34xf32> -> vector<4x324xf32>
    %cst_104 = arith.constant 0.000000e+00 : f32
    %287 = vector.broadcast %cst_104 : f32 to vector<4x256xf32>
    %288 = vector.extract_strided_slice %286 {offsets = [0, 0], sizes = [4, 256], strides = [1, 1]} : vector<4x324xf32> to vector<4x256xf32>
    %c0_105 = arith.constant 0 : index
    %c0_106 = arith.constant 0 : index
    %289 = vector.load %arg2[%c0_105, %c0_106] : memref<5x256xf32, #tpu.memory_space<vmem>>, vector<1x256xf32>
    %290 = vector.broadcast %289 : vector<1x256xf32> to vector<4x256xf32>
    %291 = arith.mulf %288, %290 : vector<4x256xf32>
    %c0_107 = arith.constant 0 : index
    %c0_108 = arith.constant 0 : index
    %292 = vector.load %arg9[%c0_107, %c0_108] : memref<4x25xf32, #tpu.memory_space<vmem>>, vector<4x1xf32>
    %293 = vector.broadcast %292 : vector<4x1xf32> to vector<4x256xf32>
    %294 = arith.mulf %291, %293 : vector<4x256xf32>
    %295 = arith.addf %287, %294 : vector<4x256xf32>
    %296 = vector.extract_strided_slice %286 {offsets = [0, 1], sizes = [4, 256], strides = [1, 1]} : vector<4x324xf32> to vector<4x256xf32>
    %c1_109 = arith.constant 1 : index
    %c0_110 = arith.constant 0 : index
    %297 = vector.load %arg2[%c1_109, %c0_110] : memref<5x256xf32, #tpu.memory_space<vmem>>, vector<1x256xf32>
    %298 = vector.broadcast %297 : vector<1x256xf32> to vector<4x256xf32>
    %299 = arith.mulf %296, %298 : vector<4x256xf32>
    %c0_111 = arith.constant 0 : index
    %c1_112 = arith.constant 1 : index
    %300 = vector.load %arg9[%c0_111, %c1_112] : memref<4x25xf32, #tpu.memory_space<vmem>>, vector<4x1xf32>
    %301 = vector.broadcast %300 : vector<4x1xf32> to vector<4x256xf32>
    %302 = arith.mulf %299, %301 : vector<4x256xf32>
    %303 = arith.addf %295, %302 : vector<4x256xf32>
    %304 = vector.extract_strided_slice %286 {offsets = [0, 2], sizes = [4, 256], strides = [1, 1]} : vector<4x324xf32> to vector<4x256xf32>
    %c0_113 = arith.constant 0 : index
    %c2_114 = arith.constant 2 : index
    %305 = vector.load %arg9[%c0_113, %c2_114] : memref<4x25xf32, #tpu.memory_space<vmem>>, vector<4x1xf32>
    %306 = vector.broadcast %305 : vector<4x1xf32> to vector<4x256xf32>
    %307 = arith.mulf %304, %306 : vector<4x256xf32>
    %308 = arith.addf %303, %307 : vector<4x256xf32>
    %309 = vector.extract_strided_slice %286 {offsets = [0, 3], sizes = [4, 256], strides = [1, 1]} : vector<4x324xf32> to vector<4x256xf32>
    %c3_115 = arith.constant 3 : index
    %c0_116 = arith.constant 0 : index
    %310 = vector.load %arg2[%c3_115, %c0_116] : memref<5x256xf32, #tpu.memory_space<vmem>>, vector<1x256xf32>
    %311 = vector.broadcast %310 : vector<1x256xf32> to vector<4x256xf32>
    %312 = arith.mulf %309, %311 : vector<4x256xf32>
    %c0_117 = arith.constant 0 : index
    %c3_118 = arith.constant 3 : index
    %313 = vector.load %arg9[%c0_117, %c3_118] : memref<4x25xf32, #tpu.memory_space<vmem>>, vector<4x1xf32>
    %314 = vector.broadcast %313 : vector<4x1xf32> to vector<4x256xf32>
    %315 = arith.mulf %312, %314 : vector<4x256xf32>
    %316 = arith.addf %308, %315 : vector<4x256xf32>
    %317 = vector.extract_strided_slice %286 {offsets = [0, 4], sizes = [4, 256], strides = [1, 1]} : vector<4x324xf32> to vector<4x256xf32>
    %c4_119 = arith.constant 4 : index
    %c0_120 = arith.constant 0 : index
    %318 = vector.load %arg2[%c4_119, %c0_120] : memref<5x256xf32, #tpu.memory_space<vmem>>, vector<1x256xf32>
    %319 = vector.broadcast %318 : vector<1x256xf32> to vector<4x256xf32>
    %320 = arith.mulf %317, %319 : vector<4x256xf32>
    %c0_121 = arith.constant 0 : index
    %c4_122 = arith.constant 4 : index
    %321 = vector.load %arg9[%c0_121, %c4_122] : memref<4x25xf32, #tpu.memory_space<vmem>>, vector<4x1xf32>
    %322 = vector.broadcast %321 : vector<4x1xf32> to vector<4x256xf32>
    %323 = arith.mulf %320, %322 : vector<4x256xf32>
    %324 = arith.addf %316, %323 : vector<4x256xf32>
    %325 = vector.extract_strided_slice %286 {offsets = [0, 16], sizes = [4, 256], strides = [1, 1]} : vector<4x324xf32> to vector<4x256xf32>
    %c0_123 = arith.constant 0 : index
    %c0_124 = arith.constant 0 : index
    %326 = vector.load %arg2[%c0_123, %c0_124] : memref<5x256xf32, #tpu.memory_space<vmem>>, vector<1x256xf32>
    %327 = vector.broadcast %326 : vector<1x256xf32> to vector<4x256xf32>
    %328 = arith.mulf %325, %327 : vector<4x256xf32>
    %c0_125 = arith.constant 0 : index
    %c5_126 = arith.constant 5 : index
    %329 = vector.load %arg9[%c0_125, %c5_126] : memref<4x25xf32, #tpu.memory_space<vmem>>, vector<4x1xf32>
    %330 = vector.broadcast %329 : vector<4x1xf32> to vector<4x256xf32>
    %331 = arith.mulf %328, %330 : vector<4x256xf32>
    %332 = arith.addf %324, %331 : vector<4x256xf32>
    %333 = vector.extract_strided_slice %286 {offsets = [0, 17], sizes = [4, 256], strides = [1, 1]} : vector<4x324xf32> to vector<4x256xf32>
    %c1_127 = arith.constant 1 : index
    %c0_128 = arith.constant 0 : index
    %334 = vector.load %arg2[%c1_127, %c0_128] : memref<5x256xf32, #tpu.memory_space<vmem>>, vector<1x256xf32>
    %335 = vector.broadcast %334 : vector<1x256xf32> to vector<4x256xf32>
    %336 = arith.mulf %333, %335 : vector<4x256xf32>
    %c0_129 = arith.constant 0 : index
    %c6_130 = arith.constant 6 : index
    %337 = vector.load %arg9[%c0_129, %c6_130] : memref<4x25xf32, #tpu.memory_space<vmem>>, vector<4x1xf32>
    %338 = vector.broadcast %337 : vector<4x1xf32> to vector<4x256xf32>
    %339 = arith.mulf %336, %338 : vector<4x256xf32>
    %340 = arith.addf %332, %339 : vector<4x256xf32>
    %341 = vector.extract_strided_slice %286 {offsets = [0, 18], sizes = [4, 256], strides = [1, 1]} : vector<4x324xf32> to vector<4x256xf32>
    %c0_131 = arith.constant 0 : index
    %c7_132 = arith.constant 7 : index
    %342 = vector.load %arg9[%c0_131, %c7_132] : memref<4x25xf32, #tpu.memory_space<vmem>>, vector<4x1xf32>
    %343 = vector.broadcast %342 : vector<4x1xf32> to vector<4x256xf32>
    %344 = arith.mulf %341, %343 : vector<4x256xf32>
    %345 = arith.addf %340, %344 : vector<4x256xf32>
    %346 = vector.extract_strided_slice %286 {offsets = [0, 19], sizes = [4, 256], strides = [1, 1]} : vector<4x324xf32> to vector<4x256xf32>
    %c3_133 = arith.constant 3 : index
    %c0_134 = arith.constant 0 : index
    %347 = vector.load %arg2[%c3_133, %c0_134] : memref<5x256xf32, #tpu.memory_space<vmem>>, vector<1x256xf32>
    %348 = vector.broadcast %347 : vector<1x256xf32> to vector<4x256xf32>
    %349 = arith.mulf %346, %348 : vector<4x256xf32>
    %c0_135 = arith.constant 0 : index
    %c8_136 = arith.constant 8 : index
    %350 = vector.load %arg9[%c0_135, %c8_136] : memref<4x25xf32, #tpu.memory_space<vmem>>, vector<4x1xf32>
    %351 = vector.broadcast %350 : vector<4x1xf32> to vector<4x256xf32>
    %352 = arith.mulf %349, %351 : vector<4x256xf32>
    %353 = arith.addf %345, %352 : vector<4x256xf32>
    %354 = vector.extract_strided_slice %286 {offsets = [0, 20], sizes = [4, 256], strides = [1, 1]} : vector<4x324xf32> to vector<4x256xf32>
    %c4_137 = arith.constant 4 : index
    %c0_138 = arith.constant 0 : index
    %355 = vector.load %arg2[%c4_137, %c0_138] : memref<5x256xf32, #tpu.memory_space<vmem>>, vector<1x256xf32>
    %356 = vector.broadcast %355 : vector<1x256xf32> to vector<4x256xf32>
    %357 = arith.mulf %354, %356 : vector<4x256xf32>
    %c0_139 = arith.constant 0 : index
    %c9_140 = arith.constant 9 : index
    %358 = vector.load %arg9[%c0_139, %c9_140] : memref<4x25xf32, #tpu.memory_space<vmem>>, vector<4x1xf32>
    %359 = vector.broadcast %358 : vector<4x1xf32> to vector<4x256xf32>
    %360 = arith.mulf %357, %359 : vector<4x256xf32>
    %361 = arith.addf %353, %360 : vector<4x256xf32>
    %362 = vector.extract_strided_slice %286 {offsets = [0, 32], sizes = [4, 256], strides = [1, 1]} : vector<4x324xf32> to vector<4x256xf32>
    %c0_141 = arith.constant 0 : index
    %c0_142 = arith.constant 0 : index
    %363 = vector.load %arg2[%c0_141, %c0_142] : memref<5x256xf32, #tpu.memory_space<vmem>>, vector<1x256xf32>
    %364 = vector.broadcast %363 : vector<1x256xf32> to vector<4x256xf32>
    %365 = arith.mulf %362, %364 : vector<4x256xf32>
    %c0_143 = arith.constant 0 : index
    %c10_144 = arith.constant 10 : index
    %366 = vector.load %arg9[%c0_143, %c10_144] : memref<4x25xf32, #tpu.memory_space<vmem>>, vector<4x1xf32>
    %367 = vector.broadcast %366 : vector<4x1xf32> to vector<4x256xf32>
    %368 = arith.mulf %365, %367 : vector<4x256xf32>
    %369 = arith.addf %361, %368 : vector<4x256xf32>
    %370 = vector.extract_strided_slice %286 {offsets = [0, 33], sizes = [4, 256], strides = [1, 1]} : vector<4x324xf32> to vector<4x256xf32>
    %c1_145 = arith.constant 1 : index
    %c0_146 = arith.constant 0 : index
    %371 = vector.load %arg2[%c1_145, %c0_146] : memref<5x256xf32, #tpu.memory_space<vmem>>, vector<1x256xf32>
    %372 = vector.broadcast %371 : vector<1x256xf32> to vector<4x256xf32>
    %373 = arith.mulf %370, %372 : vector<4x256xf32>
    %c0_147 = arith.constant 0 : index
    %c11_148 = arith.constant 11 : index
    %374 = vector.load %arg9[%c0_147, %c11_148] : memref<4x25xf32, #tpu.memory_space<vmem>>, vector<4x1xf32>
    %375 = vector.broadcast %374 : vector<4x1xf32> to vector<4x256xf32>
    %376 = arith.mulf %373, %375 : vector<4x256xf32>
    %377 = arith.addf %369, %376 : vector<4x256xf32>
    %378 = vector.extract_strided_slice %286 {offsets = [0, 34], sizes = [4, 256], strides = [1, 1]} : vector<4x324xf32> to vector<4x256xf32>
    %c0_149 = arith.constant 0 : index
    %c12_150 = arith.constant 12 : index
    %379 = vector.load %arg9[%c0_149, %c12_150] : memref<4x25xf32, #tpu.memory_space<vmem>>, vector<4x1xf32>
    %380 = vector.broadcast %379 : vector<4x1xf32> to vector<4x256xf32>
    %381 = arith.mulf %378, %380 : vector<4x256xf32>
    %382 = arith.addf %377, %381 : vector<4x256xf32>
    %383 = vector.extract_strided_slice %286 {offsets = [0, 35], sizes = [4, 256], strides = [1, 1]} : vector<4x324xf32> to vector<4x256xf32>
    %c3_151 = arith.constant 3 : index
    %c0_152 = arith.constant 0 : index
    %384 = vector.load %arg2[%c3_151, %c0_152] : memref<5x256xf32, #tpu.memory_space<vmem>>, vector<1x256xf32>
    %385 = vector.broadcast %384 : vector<1x256xf32> to vector<4x256xf32>
    %386 = arith.mulf %383, %385 : vector<4x256xf32>
    %c0_153 = arith.constant 0 : index
    %c13_154 = arith.constant 13 : index
    %387 = vector.load %arg9[%c0_153, %c13_154] : memref<4x25xf32, #tpu.memory_space<vmem>>, vector<4x1xf32>
    %388 = vector.broadcast %387 : vector<4x1xf32> to vector<4x256xf32>
    %389 = arith.mulf %386, %388 : vector<4x256xf32>
    %390 = arith.addf %382, %389 : vector<4x256xf32>
    %391 = vector.extract_strided_slice %286 {offsets = [0, 36], sizes = [4, 256], strides = [1, 1]} : vector<4x324xf32> to vector<4x256xf32>
    %c4_155 = arith.constant 4 : index
    %c0_156 = arith.constant 0 : index
    %392 = vector.load %arg2[%c4_155, %c0_156] : memref<5x256xf32, #tpu.memory_space<vmem>>, vector<1x256xf32>
    %393 = vector.broadcast %392 : vector<1x256xf32> to vector<4x256xf32>
    %394 = arith.mulf %391, %393 : vector<4x256xf32>
    %c0_157 = arith.constant 0 : index
    %c14_158 = arith.constant 14 : index
    %395 = vector.load %arg9[%c0_157, %c14_158] : memref<4x25xf32, #tpu.memory_space<vmem>>, vector<4x1xf32>
    %396 = vector.broadcast %395 : vector<4x1xf32> to vector<4x256xf32>
    %397 = arith.mulf %394, %396 : vector<4x256xf32>
    %398 = arith.addf %390, %397 : vector<4x256xf32>
    %399 = vector.extract_strided_slice %286 {offsets = [0, 48], sizes = [4, 256], strides = [1, 1]} : vector<4x324xf32> to vector<4x256xf32>
    %c0_159 = arith.constant 0 : index
    %c0_160 = arith.constant 0 : index
    %400 = vector.load %arg2[%c0_159, %c0_160] : memref<5x256xf32, #tpu.memory_space<vmem>>, vector<1x256xf32>
    %401 = vector.broadcast %400 : vector<1x256xf32> to vector<4x256xf32>
    %402 = arith.mulf %399, %401 : vector<4x256xf32>
    %c0_161 = arith.constant 0 : index
    %c15_162 = arith.constant 15 : index
    %403 = vector.load %arg9[%c0_161, %c15_162] : memref<4x25xf32, #tpu.memory_space<vmem>>, vector<4x1xf32>
    %404 = vector.broadcast %403 : vector<4x1xf32> to vector<4x256xf32>
    %405 = arith.mulf %402, %404 : vector<4x256xf32>
    %406 = arith.addf %398, %405 : vector<4x256xf32>
    %407 = vector.extract_strided_slice %286 {offsets = [0, 49], sizes = [4, 256], strides = [1, 1]} : vector<4x324xf32> to vector<4x256xf32>
    %c1_163 = arith.constant 1 : index
    %c0_164 = arith.constant 0 : index
    %408 = vector.load %arg2[%c1_163, %c0_164] : memref<5x256xf32, #tpu.memory_space<vmem>>, vector<1x256xf32>
    %409 = vector.broadcast %408 : vector<1x256xf32> to vector<4x256xf32>
    %410 = arith.mulf %407, %409 : vector<4x256xf32>
    %c0_165 = arith.constant 0 : index
    %c16_166 = arith.constant 16 : index
    %411 = vector.load %arg9[%c0_165, %c16_166] : memref<4x25xf32, #tpu.memory_space<vmem>>, vector<4x1xf32>
    %412 = vector.broadcast %411 : vector<4x1xf32> to vector<4x256xf32>
    %413 = arith.mulf %410, %412 : vector<4x256xf32>
    %414 = arith.addf %406, %413 : vector<4x256xf32>
    %415 = vector.extract_strided_slice %286 {offsets = [0, 50], sizes = [4, 256], strides = [1, 1]} : vector<4x324xf32> to vector<4x256xf32>
    %c0_167 = arith.constant 0 : index
    %c17_168 = arith.constant 17 : index
    %416 = vector.load %arg9[%c0_167, %c17_168] : memref<4x25xf32, #tpu.memory_space<vmem>>, vector<4x1xf32>
    %417 = vector.broadcast %416 : vector<4x1xf32> to vector<4x256xf32>
    %418 = arith.mulf %415, %417 : vector<4x256xf32>
    %419 = arith.addf %414, %418 : vector<4x256xf32>
    %420 = vector.extract_strided_slice %286 {offsets = [0, 51], sizes = [4, 256], strides = [1, 1]} : vector<4x324xf32> to vector<4x256xf32>
    %c3_169 = arith.constant 3 : index
    %c0_170 = arith.constant 0 : index
    %421 = vector.load %arg2[%c3_169, %c0_170] : memref<5x256xf32, #tpu.memory_space<vmem>>, vector<1x256xf32>
    %422 = vector.broadcast %421 : vector<1x256xf32> to vector<4x256xf32>
    %423 = arith.mulf %420, %422 : vector<4x256xf32>
    %c0_171 = arith.constant 0 : index
    %c18_172 = arith.constant 18 : index
    %424 = vector.load %arg9[%c0_171, %c18_172] : memref<4x25xf32, #tpu.memory_space<vmem>>, vector<4x1xf32>
    %425 = vector.broadcast %424 : vector<4x1xf32> to vector<4x256xf32>
    %426 = arith.mulf %423, %425 : vector<4x256xf32>
    %427 = arith.addf %419, %426 : vector<4x256xf32>
    %428 = vector.extract_strided_slice %286 {offsets = [0, 52], sizes = [4, 256], strides = [1, 1]} : vector<4x324xf32> to vector<4x256xf32>
    %c4_173 = arith.constant 4 : index
    %c0_174 = arith.constant 0 : index
    %429 = vector.load %arg2[%c4_173, %c0_174] : memref<5x256xf32, #tpu.memory_space<vmem>>, vector<1x256xf32>
    %430 = vector.broadcast %429 : vector<1x256xf32> to vector<4x256xf32>
    %431 = arith.mulf %428, %430 : vector<4x256xf32>
    %c0_175 = arith.constant 0 : index
    %c19_176 = arith.constant 19 : index
    %432 = vector.load %arg9[%c0_175, %c19_176] : memref<4x25xf32, #tpu.memory_space<vmem>>, vector<4x1xf32>
    %433 = vector.broadcast %432 : vector<4x1xf32> to vector<4x256xf32>
    %434 = arith.mulf %431, %433 : vector<4x256xf32>
    %435 = arith.addf %427, %434 : vector<4x256xf32>
    %436 = vector.extract_strided_slice %286 {offsets = [0, 64], sizes = [4, 256], strides = [1, 1]} : vector<4x324xf32> to vector<4x256xf32>
    %c0_177 = arith.constant 0 : index
    %c0_178 = arith.constant 0 : index
    %437 = vector.load %arg2[%c0_177, %c0_178] : memref<5x256xf32, #tpu.memory_space<vmem>>, vector<1x256xf32>
    %438 = vector.broadcast %437 : vector<1x256xf32> to vector<4x256xf32>
    %439 = arith.mulf %436, %438 : vector<4x256xf32>
    %c0_179 = arith.constant 0 : index
    %c20_180 = arith.constant 20 : index
    %440 = vector.load %arg9[%c0_179, %c20_180] : memref<4x25xf32, #tpu.memory_space<vmem>>, vector<4x1xf32>
    %441 = vector.broadcast %440 : vector<4x1xf32> to vector<4x256xf32>
    %442 = arith.mulf %439, %441 : vector<4x256xf32>
    %443 = arith.addf %435, %442 : vector<4x256xf32>
    %444 = vector.extract_strided_slice %286 {offsets = [0, 65], sizes = [4, 256], strides = [1, 1]} : vector<4x324xf32> to vector<4x256xf32>
    %c1_181 = arith.constant 1 : index
    %c0_182 = arith.constant 0 : index
    %445 = vector.load %arg2[%c1_181, %c0_182] : memref<5x256xf32, #tpu.memory_space<vmem>>, vector<1x256xf32>
    %446 = vector.broadcast %445 : vector<1x256xf32> to vector<4x256xf32>
    %447 = arith.mulf %444, %446 : vector<4x256xf32>
    %c0_183 = arith.constant 0 : index
    %c21_184 = arith.constant 21 : index
    %448 = vector.load %arg9[%c0_183, %c21_184] : memref<4x25xf32, #tpu.memory_space<vmem>>, vector<4x1xf32>
    %449 = vector.broadcast %448 : vector<4x1xf32> to vector<4x256xf32>
    %450 = arith.mulf %447, %449 : vector<4x256xf32>
    %451 = arith.addf %443, %450 : vector<4x256xf32>
    %452 = vector.extract_strided_slice %286 {offsets = [0, 66], sizes = [4, 256], strides = [1, 1]} : vector<4x324xf32> to vector<4x256xf32>
    %c0_185 = arith.constant 0 : index
    %c22_186 = arith.constant 22 : index
    %453 = vector.load %arg9[%c0_185, %c22_186] : memref<4x25xf32, #tpu.memory_space<vmem>>, vector<4x1xf32>
    %454 = vector.broadcast %453 : vector<4x1xf32> to vector<4x256xf32>
    %455 = arith.mulf %452, %454 : vector<4x256xf32>
    %456 = arith.addf %451, %455 : vector<4x256xf32>
    %457 = vector.extract_strided_slice %286 {offsets = [0, 67], sizes = [4, 256], strides = [1, 1]} : vector<4x324xf32> to vector<4x256xf32>
    %c3_187 = arith.constant 3 : index
    %c0_188 = arith.constant 0 : index
    %458 = vector.load %arg2[%c3_187, %c0_188] : memref<5x256xf32, #tpu.memory_space<vmem>>, vector<1x256xf32>
    %459 = vector.broadcast %458 : vector<1x256xf32> to vector<4x256xf32>
    %460 = arith.mulf %457, %459 : vector<4x256xf32>
    %c0_189 = arith.constant 0 : index
    %c23_190 = arith.constant 23 : index
    %461 = vector.load %arg9[%c0_189, %c23_190] : memref<4x25xf32, #tpu.memory_space<vmem>>, vector<4x1xf32>
    %462 = vector.broadcast %461 : vector<4x1xf32> to vector<4x256xf32>
    %463 = arith.mulf %460, %462 : vector<4x256xf32>
    %464 = arith.addf %456, %463 : vector<4x256xf32>
    %465 = vector.extract_strided_slice %286 {offsets = [0, 68], sizes = [4, 256], strides = [1, 1]} : vector<4x324xf32> to vector<4x256xf32>
    %c4_191 = arith.constant 4 : index
    %c0_192 = arith.constant 0 : index
    %466 = vector.load %arg2[%c4_191, %c0_192] : memref<5x256xf32, #tpu.memory_space<vmem>>, vector<1x256xf32>
    %467 = vector.broadcast %466 : vector<1x256xf32> to vector<4x256xf32>
    %468 = arith.mulf %465, %467 : vector<4x256xf32>
    %c0_193 = arith.constant 0 : index
    %c24_194 = arith.constant 24 : index
    %469 = vector.load %arg9[%c0_193, %c24_194] : memref<4x25xf32, #tpu.memory_space<vmem>>, vector<4x1xf32>
    %470 = vector.broadcast %469 : vector<4x1xf32> to vector<4x256xf32>
    %471 = arith.mulf %468, %470 : vector<4x256xf32>
    %472 = arith.addf %464, %471 : vector<4x256xf32>
    %c0_195 = arith.constant 0 : index
    %c0_196 = arith.constant 0 : index
    %473 = vector.load %arg10[%c0_195, %c0_196] : memref<4x1xf32, #tpu.memory_space<vmem>>, vector<4x1xf32>
    %474 = vector.broadcast %473 : vector<4x1xf32> to vector<4x256xf32>
    %475 = arith.addf %472, %474 : vector<4x256xf32>
    %476 = vector.extract_strided_slice %1 {offsets = [0, 0], sizes = [4, 256], strides = [1, 1]} : vector<8x256xf32> to vector<4x256xf32>
    %477 = arith.addf %284, %476 : vector<4x256xf32>
    %c0_197 = arith.constant 0 : index
    %c0_198 = arith.constant 0 : index
    %c0_199 = arith.constant 0 : index
    %478 = vector.load %arg11[%c0_197, %c0_198, %c0_199] : memref<1x8x256xf32, #tpu.memory_space<vmem>>, vector<1x4x256xf32>
    %479 = vector.shape_cast %478 : vector<1x4x256xf32> to vector<4x256xf32>
    %480 = vector.shape_cast %477 : vector<4x256xf32> to vector<1x4x256xf32>
    tpu.vector_store %arg11[%c0_197, %c0_198, %c0_199], %480 {strides = array<i32>} : memref<1x8x256xf32, #tpu.memory_space<vmem>>, vector<1x4x256xf32>,
    %481 = vector.extract_strided_slice %1 {offsets = [4, 0], sizes = [4, 256], strides = [1, 1]} : vector<8x256xf32> to vector<4x256xf32>
    %482 = arith.addf %475, %481 : vector<4x256xf32>
    %c0_200 = arith.constant 0 : index
    %c4_201 = arith.constant 4 : index
    %c0_202 = arith.constant 0 : index
    %483 = vector.load %arg11[%c0_200, %c4_201, %c0_202] : memref<1x8x256xf32, #tpu.memory_space<vmem>>, vector<1x4x256xf32>
    %484 = vector.shape_cast %483 : vector<1x4x256xf32> to vector<4x256xf32>
    %485 = vector.shape_cast %482 : vector<4x256xf32> to vector<1x4x256xf32>
    tpu.vector_store %arg11[%c0_200, %c4_201, %c0_202], %485 {strides = array<i32>} : memref<1x8x256xf32, #tpu.memory_space<vmem>>, vector<1x4x256xf32>,
    return
  }
  func.func @transform_0(%arg0: i32) -> (i32, i32, i32) {
    %c0_i32 = arith.constant 0 : i32
    %c0_i32_0 = arith.constant 0 : i32
    %c0_i32_1 = arith.constant 0 : i32
    return %arg0, %c0_i32, %c0_i32_0 : i32, i32, i32
  }
  func.func @transform_1(%arg0: i32) -> (i32, i32) {
    %c0_i32 = arith.constant 0 : i32
    %c0_i32_0 = arith.constant 0 : i32
    %c0_i32_1 = arith.constant 0 : i32
    return %c0_i32, %c0_i32_0 : i32, i32
  }
  func.func @transform_2(%arg0: i32) -> (i32, i32) {
    %c0_i32 = arith.constant 0 : i32
    %c0_i32_0 = arith.constant 0 : i32
    %c0_i32_1 = arith.constant 0 : i32
    return %c0_i32, %c0_i32_0 : i32, i32
  }
  func.func @transform_3(%arg0: i32) -> (i32, i32) {
    %c0_i32 = arith.constant 0 : i32
    %c0_i32_0 = arith.constant 0 : i32
    %c0_i32_1 = arith.constant 0 : i32
    return %c0_i32, %c0_i32_0 : i32, i32
  }
  func.func @transform_4(%arg0: i32) -> (i32, i32) {
    %c0_i32 = arith.constant 0 : i32
    %c0_i32_0 = arith.constant 0 : i32
    %c0_i32_1 = arith.constant 0 : i32
    return %c0_i32, %c0_i32_0 : i32, i32
  }
  func.func @transform_5(%arg0: i32) -> (i32, i32) {
    %c0_i32 = arith.constant 0 : i32
    %c0_i32_0 = arith.constant 0 : i32
    %c0_i32_1 = arith.constant 0 : i32
    return %c0_i32, %c0_i32_0 : i32, i32
  }
  func.func @transform_6(%arg0: i32) -> (i32, i32) {
    %c0_i32 = arith.constant 0 : i32
    %c0_i32_0 = arith.constant 0 : i32
    %c0_i32_1 = arith.constant 0 : i32
    return %c0_i32, %c0_i32_0 : i32, i32
  }
  func.func @transform_7(%arg0: i32) -> (i32, i32) {
    %c0_i32 = arith.constant 0 : i32
    %c0_i32_0 = arith.constant 0 : i32
    %c0_i32_1 = arith.constant 0 : i32
    return %c0_i32, %c0_i32_0 : i32, i32
  }
  func.func @transform_8(%arg0: i32) -> (i32, i32) {
    %c0_i32 = arith.constant 0 : i32
    %c0_i32_0 = arith.constant 0 : i32
    %c0_i32_1 = arith.constant 0 : i32
    return %c0_i32, %c0_i32_0 : i32, i32
  }
  func.func @transform_9(%arg0: i32) -> (i32, i32) {
    %c0_i32 = arith.constant 0 : i32
    %c0_i32_0 = arith.constant 0 : i32
    %c0_i32_1 = arith.constant 0 : i32
    return %c0_i32, %c0_i32_0 : i32, i32
  }
  func.func @transform_10(%arg0: i32) -> (i32, i32, i32) {
    %c0_i32 = arith.constant 0 : i32
    %c0_i32_0 = arith.constant 0 : i32
    %c0_i32_1 = arith.constant 0 : i32
    return %arg0, %c0_i32, %c0_i32_0 : i32, i32, i32
  }
}

</mosaic_0001>

<bundles_post_ra>
// kernel: tpu_custom_call.1
= control target key start
LH: loop header
LB: loop body
LE: loop exit
PB: predicated region body
PF: predicated region fallthrough
CT: control target
= control target key end

     0   :  { %s3941_s0 = inlined_call_operand.hbm [shape: f32[2,8,256], index: 0, kind: input, shape index: {}]   ;;  %s3942_s1 = inlined_call_operand.hbm [shape: f32[5,256], index: 1, kind: input, shape index: {}]   ;;  %s3943_s2 = inlined_call_operand.vmem [shape: f32[2,8], index: 2, kind: input, shape index: {}]   ;;  %s3944_s3 = inlined_call_operand.vmem [shape: f32[2,1], index: 3, kind: input, shape index: {}]   ;;  %s3945_s4 = inlined_call_operand.vmem [shape: f32[2,25], index: 4, kind: input, shape index: {}]   ;;  %s3946_s5 = inlined_call_operand.vmem [shape: f32[2,1], index: 5, kind: input, shape index: {}]   ;;  %s3947_s6 = inlined_call_operand.vmem [shape: f32[4,4], index: 6, kind: input, shape index: {}]   ;;  %s3948_s7 = inlined_call_operand.vmem [shape: f32[4,1], index: 7, kind: input, shape index: {}]   ;;  %s3949_s8 = inlined_call_operand.vmem [shape: f32[4,25], index: 8, kind: input, shape index: {}]   ;;  %s3950_s9 = inlined_call_operand.vmem [shape: f32[4,1], index: 9, kind: input, shape index: {}]   ;;  %s3951_s10 = inlined_call_operand.hbm [shape: f32[2,8,256], index: 10, kind: output, shape index: {}]  }
   0x1   :  { %4068 = sst [smem:[#allocation46_spill]] %s3942_s1 }
   0x2   :  { %15 = vsyncpa [#allocation3], 0 }
   0x3   :  { %17 = vsyncpa [#allocation3 + $0x1], 0 }
   0x4   :  { %18 = vsyncpa [#allocation6], 0 }
   0x5   :  { %19 = vsyncpa [#allocation4], 0 }
   0x6   :  { %21 = vsyncpa [#allocation4 + $0x1], 0  ;;  %s2667_s13 = smov 0   ;;  %s2669_s14 = smov 0  }
   0x7   :  { %s2671_s15 = smov 0   ;;  %s2673_s16 = smov 0  }
   0x8 LB: > { %4069 = sst [smem:[#allocation11_spill]] %s2537_s15  ;;  %s2688_s17 = sadd.s32 4294967295, %s2541_s16   ;;  %s2541_s16 = sphi %s2673_s16, %s4216_s16   ;;  %s2537_s15 = sphi %s2671_s15, %s4218_s15   ;;  %s2533_s14 = sphi %s2669_s14, %s4220_s14   ;;  %s2529_s13 = sphi %s2667_s13, %s4219_s13  }
   0x9   : > { %s2182_s18 = sadd.s32 4294967294, %s2541_s16   ;;  %p47_p0 = scmp.ne.s32.totalorder %s2533_s14, %s2529_s13 }
   0xa   : > { %p48_p1 = scmp.eq.s32.totalorder %s2688_s17, 0  ;;  %p260_p2 = scmp.eq.s32.totalorder %s2688_s17, 1 }
   0xb   : > { %p266_p3 = scmp.eq.s32.totalorder %s2182_s18, 1  ;;  %p2183_p5 = scmp.ge.s32.totalorder %s2541_s16, 1 }
   0xc   : > { %p2697_p4 = por %p48_p1, %p47_p0  ;;  %p273_p7 = scmp.lt.s32.totalorder %s2541_s16, 3 }
   0xd   : > { %p2702_p6 = por %p266_p3, %p47_p0  ;;  %s4072_s1 = sld [smem:[#allocation46_spill]] }
   0xe   : > { %p2710_p8 = pnand %p2183_p5, %p273_p7  ;;  %s2543_s25 = smov [#allocation5]  }
   0xf   : > { %s287_s26 = sshll.u32 %s2543_s25, 4  ;;  %s2720_s27 = sadd.s32 1, %s2541_s16   ;;  %s288_s26 = int_to_ptr.vmem [resolvable:$true] %s287_s26 }
  0x10   : > { %p2212_p10 = pneg %p2710_p8  ;;  %4074 = sst [smem:[#allocation12_spill]] %s2720_s27 }
  0x11   : > { %s34_s28 = sadd.s32 1, %s2537_s15  ;;  %s31_s29 = ssub.s32 %s2541_s16, %s2720_s27 }
  0x12   : > { %p2213_p11 = pnand %p2212_p10, %p48_p1  ;;  %p32_p12 = scmp.eq.s32.totalorder %s31_s29, 0 }
  0x13   : > { %s285_s23 = sshll.u32 %s4072_s1, 4  ;;  %p41_p13 = scmp.ne.s32.totalorder %s2537_s15, %s2533_s14  ;;  %s286_s23 = int_to_ptr.hbm [resolvable:$true] %s285_s23 }
  0x14   : > { %2215 = dma.hbm_to_vmem [thread:$0]  (!%p2213_p11), %s286_s23, 256, %s288_s26, [#allocation6]  }
  0x15   : > { %p42_p0 = scmp.eq.s32.totalorder %s2541_s16, 0  ;;  %p2733_p3 = por %p260_p2, %p41_p13 }
  0x16   : > { %s2729_s30 = scalar_select %p32_p12, %s2537_s15, %s34_s28  }
  0x17   : > { %p2225_p5 = scmp.lt.s32.totalorder %s2541_s16, 2  ;;  %s322_s12 = sand.u32 1, %s2537_s15  }
  0x18   : > { %4075 = sst [smem:[#allocation13_spill]] %s2729_s30  ;;  %s2202_s18 = sshll.u32 %s2541_s16, 4 }
  0x19   : > { %p43_p7 = por %p42_p0, %p41_p13  ;;  %s2186_s21 = sshll.u32 %s322_s12, 4 }
  0x1a   : > { %s331_s1 = scalar_lea.hbm %s3941_s0, %s2202_s18  ;;  %s326_s26 = scalar_lea.vmem [#allocation2], %s2186_s21 }
  0x1b   : > { %s333_s23 = sshll.u32 %s331_s1, 4  ;;  %s335_s29 = sshll.u32 %s326_s26, 4  ;;  %s334_s23 = int_to_ptr.hbm [resolvable:$true] %s333_s23  ;;  %s336_s29 = int_to_ptr.vmem [resolvable:$true] %s335_s29 }
  0x1c   : > { %p2743_p10 = pnand %p2225_p5, %p43_p7  ;;  %s323_s30 = scalar_lea.sflag [#allocation3], %s322_s12 }
  0x1d   : > { %s2441_s27 = sshra.s32 %s334_s23, 4  ;;  %s2448_s21 = scalar_lea.hbm %s3941_s0, 32  ;;  %s2442_s27 = int_to_ptr.hbm [resolvable:$true] %s2441_s27 }
  0x1e   : > { %s2443_s15 = scalar_lea.hbm %s2442_s27, 16  ;;  %p2445_p11 = pneg %p2743_p10 }
  0x1f   : > { %p2444_p2 = scmp.ne.s32.totalorder %s2442_s27, %s2443_s15  ;;  %p2449_p0 = scmp.lt.s32.totalorder %s2442_s27, %s3941_s0 }
  0x20   : > { %p2450_p5 = scmp.lt.s32.totalorder %s2448_s21, %s2443_s15 }
  0x21   : > { %p2446_p12 = pnand %p2445_p11, %p2444_p2 }
  0x22   : > { %p2451_p7 = por %p2450_p5, %p2449_p0 }
  0x23   : > { %p2447_p13 = pneg %p2446_p12 }
  0x25   : > { %p2452_p9 = pnand %p2451_p7, %p2447_p13 }
  0x27   : > { %2455 = shalt.err (!%p2452_p9)
}
  0x28   : > { %2219 = dma.hbm_to_vmem [thread:$0]  (!%p2743_p10), %s334_s23, 256, %s336_s29, %s323_s30  }
  0x29   : > { %344 = sbr.rel (%p2710_p8) target bundleno = 2344 (0x928), region = 60 }
  0x2e   : > { %s2760_s12 = sand.u32 1, %s2533_s14  }
  0x2f   : > { %s2190_s26 = sshll.u32 %s2760_s12, 4  ;;  %s347_s18 = scalar_lea.sflag [#allocation3], %s2760_s12 }
  0x30   : > { %s2766_s15 = scalar_lea.vmem [#allocation2], %s2190_s26 }
  0x31   : > { %2516 = dma.done.wait (%p2697_p4), %s347_s18, 256  }
  0x32   : > { %2518 = vsyncadd (%p2697_p4), %s347_s18, 4294967040 }
  0x33   : > { %2520 = dma.done.wait (%p48_p1), [#allocation6], 256  }
  0x34   : > { %2522 = vsyncadd (%p48_p1), [#allocation6], 4294967040  ;;  %v3969_v0 = vmov 2   ;;  %v3973_v1 = vmov 1   ;;  %v3968_v2 = vmov 4   ;;  %v3971_v6 = vmov 3  }
  0x35   : > { %2330 = vset.pattern.permute.xlu1 %v3969_v0  ;;  %2329 = vset.pattern.permute.xlu0 %v3973_v1  ;;  %v2782_v3 = vld [vmem:[%s3943_s2] sm:$0x3]  ;;  %s2548_s19 = smov 1   ;;  %v3967_v7 = vmov 5   ;;  %v3964_v9 = vmov 7   ;;  %s2551_s30 = smov 3  }
  0x36   : > { %2332 = vset.pattern.permute.xlu2 %v3968_v2  ;;  %418 = vperm.xlu1 %2330, %v2782_v3   ;;  %v557_v4 = vld [vmem:[#allocation5 + $0x1] ss:$8 sm:$0x3]  ;;  %v620_v8 = vld [vmem:[#allocation5 + $0x3] ss:$8 sm:$0x3] }
  0x37   : > { %408 = vperm.xlu0 %2329, %v2782_v3   ;;  %438 = vperm.xlu2 %2332, %v2782_v3   ;;  %v2787_v5 = vperm.slane %v557_v4, 1  ;;  %v2795_v10 = vperm.slane %v620_v8, 0  ;;  %v3965_v11 = vmov 6   ;;  %v660_v12 = vld [vmem:[#allocation5 + $0x4] ss:$8 sm:$0x3] }
  0x38   : > { %v2802_v13 = vperm.slane %v660_v12, 0  ;;  %v2804_v14 = vperm.slane %v557_v4, 0  ;;  %s2553_s23 = smov 4   ;;  %v2810_v15 = vld [vmem:[%s3945_s4] sm:$0x3]  ;;  %v3975_v17 = vmov 0  }
  0x39   : > { %v538_v16 = vld [vmem:[#allocation5] ss:$8 sm:$0x3]  ;;  %s2555_s1 = smov 16   ;;  %s2556_s21 = smov 17   ;;  %v2823_v19 = vperm.slane %v620_v8, 1 }
  0x3a   : > { %v2815_v18 = vperm.slane %v538_v16, 0  ;;  %v3963_v20 = vmov 8   ;;  %v2830_v21 = vperm.slane %v660_v12, 1  ;;  %s2558_s22 = smov 19   ;;  %v2836_v22 = vperm.slane %v538_v16, 1  ;;  %s2559_s25 = smov 20  }
  0x3b   : > { %s2560_s18 = smov 32   ;;  %s2561_s24 = smov 33   ;;  %v3962_v23 = vmov 9   ;;  %v3955_v24 = vmov 17   ;;  %v3961_v25 = vmov 10   ;;  %v3960_v26 = vmov 11  }
  0x3c   : > { %s2564_s27 = smov 35   ;;  %v477_v30 = vld [vmem:[%s3944_s3] sm:$0x3]  ;;  %v3959_v41 = vmov 12   ;;  %v3958_v45 = vmov 13   ;;  %v3957_v49 = vmov 14  }
  0x3d   : > { %v3956_v53 = vmov 15   ;;  %v393_v54 = vld [vmem:[%s2766_s15] sm:$0xff]  ;;  %v394_v55 = vld [vmem:[%s2766_s15 + $0x8] sm:$0xff]  ;;  %vm531_vm8 = vcmask 277504   ;;  %vm565_vm9 = vcmask 7168   ;;  %vm796_vm10 = vcmask 154624  }
  0x3e   : > { %2331 = vset.pattern.permute.xlu1 %v3971_v6  ;;  %v411_v56 = vperm.slane %v393_v54, 1  ;;  %v412_v57 = vperm.slane %v394_v55, 1  ;;  %v401_v58 = vperm.slane %v393_v54, 0  ;;  %v402_v59 = vperm.slane %v394_v55, 0  ;;  %s3989_s29 = smov 111   ;;  %s3991_s28 = smov 109  }
  0x3f   : > { %563 = vrot.lane.b32.xlu0 %v2787_v5, %s2548_s19  ;;  %428 = vperm.xlu1 %2331, %v2782_v3   ;;  %v421_v61 = vperm.slane %v393_v54, 2  ;;  %v422_v62 = vperm.slane %v394_v55, 2  ;;  %v431_v63 = vperm.slane %v393_v54, 3  ;;  %vm628_vm11 = vcmask 23552  }
  0x40   : > { %2333 = vset.pattern.permute.xlu2 %v3967_v7  ;;  %2343 = vset.pattern.permute.xlu0 %v3964_v9  ;;  %vm831_vm12 = vcmask 162816   ;;  %vm668_vm13 = vcmask 31744   ;;  %vm866_vm14 = vcmask 261120   ;;  %vm703_vm15 = vcmask 130048  }
  0x41   : > { %448 = vperm.xlu2 %2333, %v2782_v3  }
  0x47   : > { %624 = vrot.lane.b32.xlu0 %v2795_v10, %s2551_s30  ;;  %2334 = vset.pattern.permute.xlu1 %v3965_v11 }
  0x48   : > { %458 = vperm.xlu1 %2334, %v2782_v3  }
  0x49   : > { %2335 = vset.pattern.permute.xlu2 %v3964_v9  ;;  %v452_v9 = vperm.slane %v394_v55, 5 }
  0x4a   : > { %468 = vperm.xlu2 %2335, %v2782_v3  }
  0x4f   : > { %664 = vrot.lane.b32.xlu0 %v2802_v13, %s2553_s23 }
  0x50   : > { %2336 = vset.pattern.permute.xlu1 %v3975_v17 }
  0x51   : > { %549 = vperm.xlu1 %2336, %v2810_v15  }
  0x52   : > { %561 = vrot.lane.b32.xlu2 %v2804_v14, %s2548_s19  ;;  %s2566_s19 = smov 36  }
  0x53   : > { %2338 = vset.pattern.permute.xlu2 %v3969_v0 }
  0x57   : > { %699 = vrot.lane.b32.xlu0 %v2815_v18, %s2555_s1 }
  0x59   : > { %2337 = vset.pattern.permute.xlu1 %v3973_v1 }
  0x5a   : > { %597 = vperm.xlu2 %2338, %v2810_v15   ;;  %574 = vperm.xlu1 %2337, %v2810_v15  }
  0x5f   : > { %734 = vrot.lane.b32.xlu0 %v2804_v14, %s2556_s21 }
  0x62   : > { %2339 = vset.pattern.permute.xlu2 %v3971_v6  ;;  %626 = vrot.lane.b32.xlu1 %v2823_v19, %s2551_s30  ;;  %s2568_s30 = smov 48  }
  0x63   : > { %637 = vperm.xlu2 %2339, %v2810_v15   ;;  %2344 = vset.pattern.permute.xlu1 %v3963_v20  ;;  %v451_v20 = vperm.slane %v393_v54, 5 }
  0x67   : > { %770 = vperm.xlu0 %2343, %v2810_v15  }
  0x6a   : > { %666 = vrot.lane.b32.xlu1 %v2830_v21, %s2553_s23  ;;  %s2569_s23 = smov 49  }
  0x6b   : > { %2340 = vset.pattern.permute.xlu2 %v3968_v2 }
  0x6c   : > { %677 = vperm.xlu2 %2340, %v2810_v15  }
  0x6f   : > { %794 = vrot.lane.b32.xlu0 %v2823_v19, %s2558_s22 }
  0x70   : > { %2353 = vset.pattern.permute.xlu0 %v3955_v24  ;;  %v3966_v24 = vmov 16  }
  0x72   : > { %701 = vrot.lane.b32.xlu1 %v2836_v22, %s2555_s1  ;;  %s2575_s1 = smov 51  }
  0x74   : > { %2341 = vset.pattern.permute.xlu2 %v3967_v7 }
  0x75   : > { %712 = vperm.xlu2 %2341, %v2810_v15  }
  0x77   : > { %829 = vrot.lane.b32.xlu0 %v2830_v21, %s2559_s25 }
  0x7a   : > { %736 = vrot.lane.b32.xlu1 %v2787_v5, %s2556_s21  ;;  %s2576_s21 = smov 34  }
  0x7d   : > { %2342 = vset.pattern.permute.xlu2 %v3965_v11  ;;  %v461_v11 = vperm.slane %v393_v54, 6 }
  0x7e   : > { %747 = vperm.xlu2 %2342, %v2810_v15  }
  0x7f   : > { %864 = vrot.lane.b32.xlu0 %v2836_v22, %s2560_s18 }
  0x82   : > { %805 = vperm.xlu1 %2344, %v2810_v15  }
  0x86   : > { %792 = vrot.lane.b32.xlu2 %v2795_v10, %s2558_s22  ;;  %s2577_s22 = smov 126  }
  0x87   : > { %899 = vrot.lane.b32.xlu0 %v2787_v5, %s2561_s24  ;;  %2348 = vset.pattern.permute.xlu2 %v3959_v41 }
  0x8a   : > { %2345 = vset.pattern.permute.xlu1 %v3962_v23 }
  0x8b   : > { %840 = vperm.xlu1 %2345, %v2810_v15  }
  0x8e   : > { %827 = vrot.lane.b32.xlu2 %v2802_v13, %s2559_s25  ;;  %s2578_s25 = smov 110  }
  0x8f   : > { %955 = vrot.lane.b32.xlu0 %v2795_v10, %s2564_s27 }
  0x91   : > { %v439_v39 = vpop.permute.xlu2 %438 }
  0x93   : > { %2346 = vset.pattern.permute.xlu1 %v3961_v25 }
  0x94   : > { %875 = vperm.xlu1 %2346, %v2810_v15  }
  0x96   : > { %862 = vrot.lane.b32.xlu2 %v2815_v18, %s2560_s18  ;;  %s2579_s18 = smov 94  }
  0x97   : > { %990 = vrot.lane.b32.xlu0 %v2802_v13, %s2566_s19 }
  0x9b   : > { %v449_v42 = vpop.permute.xlu2 %448 }
  0x9c   : > { %2347 = vset.pattern.permute.xlu1 %v3960_v26  ;;  %v453_v1 = vmul.f32 %v451_v20, %v449_v42 }
  0x9d   : > { %910 = vperm.xlu1 %2347, %v2810_v15  }
  0x9e   : > { %897 = vrot.lane.b32.xlu2 %v2804_v14, %s2561_s24  ;;  %s3981_s24 = smov 78  }
  0x9f   : > { %1025 = vrot.lane.b32.xlu0 %v2815_v18, %s2568_s30 }
  0xa4   : > { %v2899_v44 = vpop.permute.xlu2 %468 }
  0xa5   : > { %957 = vrot.lane.b32.xlu1 %v2823_v19, %s2564_s27  ;;  %s2581_s27 = smov 127  }
  0xa6   : > { %933 = vperm.xlu2 %2348, %v2810_v15  }
  0xa7   : > { %1060 = vrot.lane.b32.xlu0 %v2804_v14, %s2569_s23 }
  0xa8   : > { %v419_v50 = vpop.permute.xlu1 %418 }
  0xa9   : > { %v409_v27 = vpop.permute.xlu0 %408  ;;  %v423_v41 = vmul.f32 %v421_v61, %v419_v50  ;;  %v424_v26 = vmul.f32 %v422_v62, %v419_v50 }
  0xaa   : > { %v413_v8 = vmul.f32 %v411_v56, %v409_v27  ;;  %v414_v12 = vmul.f32 %v412_v57, %v409_v27  ;;  %v462_v56 = vperm.slane %v394_v55, 6 }
  0xac   : > { %v2905_v47 = vpop.permute.xlu2 %561 }
  0xad   : > { %992 = vrot.lane.b32.xlu1 %v2830_v21, %s2566_s19  ;;  %s3993_s19 = smov 125  }
  0xae   : > { %2349 = vset.pattern.permute.xlu2 %v3958_v45 }
  0xaf   : > { %1096 = vperm.xlu0 %2353, %v2810_v15   ;;  %968 = vperm.xlu2 %2349, %v2810_v15  }
  0xb1   : > { %v2866_v28 = vpop.permute.xlu0 %563  ;;  %v429_v60 = vpop.permute.xlu1 %428 }
  0xb2   : > { %v433_v27 = vmul.f32 %v431_v63, %v429_v60 }
  0xb4   : > { %v2913_v52 = vpop.permute.xlu2 %597 }
  0xb5   : > { %1027 = vrot.lane.b32.xlu1 %v2836_v22, %s2568_s30  ;;  %s3983_s30 = smov 124  }
  0xb7   : > { %2354 = vset.pattern.permute.xlu0 %v3975_v17  ;;  %2350 = vset.pattern.permute.xlu2 %v3957_v49  ;;  %v442_v49 = vperm.slane %v394_v55, 4  ;;  %v454_v17 = vmul.f32 %v452_v9, %v449_v42 }
  0xb8   : > { %398 = vperm.xlu0 %2354, %v2782_v3   ;;  %1003 = vperm.xlu2 %2350, %v2810_v15   ;;  %v432_v3 = vperm.slane %v394_v55, 3 }
  0xb9   : > { %v2871_v29 = vpop.permute.xlu0 %624  ;;  %v444_v2 = vmul.f32 %v442_v49, %v439_v39 }
  0xba   : > { %4078 = vst [vmem:[#allocation14_spill] sm:$0xff] %v2871_v29  ;;  %v434_v57 = vmul.f32 %v432_v3, %v429_v60  ;;  %v459_v61 = vpop.permute.xlu1 %458 }
  0xbb   : > { %v463_v50 = vmul.f32 %v461_v11, %v459_v61  ;;  %v464_v62 = vmul.f32 %v462_v56, %v459_v61 }
  0xbd   : > { %1062 = vrot.lane.b32.xlu1 %v2787_v5, %s2569_s23  ;;  %v2920_v45 = vpop.permute.xlu2 %637  ;;  %s3986_s23 = smov 112  }
  0xc0   : > { %480 = vperm.xlu0 %2354, %v477_v30   ;;  %2351 = vset.pattern.permute.xlu2 %v3956_v53  ;;  %v441_v53 = vperm.slane %v393_v54, 4 }
  0xc1   : > { %v2877_v31 = vpop.permute.xlu0 %664  ;;  %1038 = vperm.xlu2 %2351, %v2810_v15  }
  0xc2   : > { %v443_v7 = vmul.f32 %v441_v53, %v439_v39 }
  0xc6   : > { %v2927_v39 = vpop.permute.xlu2 %677 }
  0xc9   : > { %v2879_v32 = vpop.permute.xlu0 %699  ;;  %2352 = vset.pattern.permute.xlu2 %v3966_v24  ;;  %v472_v24 = vperm.slane %v394_v55, 7  ;;  %v2931_v55 = vpop.permute.xlu1 %549 }
  0xca   : > { %4079 = vst [vmem:[#allocation15_spill] sm:$0xff] %v2879_v32  ;;  %1073 = vperm.xlu2 %2352, %v2810_v15  }
  0xd1   : > { %v2881_v33 = vpop.permute.xlu0 %734  ;;  %v2935_v3 = vpop.permute.xlu1 %574 }
  0xd2   : > { %1118 = vrot.lane.b32.xlu2 %v2795_v10, %s2575_s1 }
  0xd9   : > { %v2883_v34 = vpop.permute.xlu0 %770 }
  0xe1   : > { %v2885_v35 = vpop.permute.xlu0 %794 }
  0xe2   : > { %4080 = vst [vmem:[#allocation16_spill] sm:$0xff] %v2885_v35 }
  0xe9   : > { %v2887_v36 = vpop.permute.xlu0 %829 }
  0xea   : > { %4081 = vst [vmem:[#allocation17_spill] sm:$0xff] %v2887_v36 }
  0xf1   : > { %v2889_v37 = vpop.permute.xlu0 %864 }
  0xf2   : > { %4082 = vst [vmem:[#allocation18_spill] sm:$0xff] %v2889_v37 }
  0xf9   : > { %v2891_v38 = vpop.permute.xlu0 %899 }
  0xfa   : > { %4083 = vst [vmem:[#allocation19_spill] sm:$0xff] %v2891_v38 }
 0x101   : > { %v2893_v40 = vpop.permute.xlu0 %955 }
 0x102   : > { %4084 = vst [vmem:[#allocation20_spill] sm:$0xff] %v2893_v40 }
 0x109   : > { %v2897_v43 = vpop.permute.xlu0 %990 }
 0x10a   : > { %4085 = vst [vmem:[#allocation21_spill] sm:$0xff] %v2897_v43 }
 0x111   : > { %v2903_v46 = vpop.permute.xlu0 %1025 }
 0x112   : > { %4086 = vst [vmem:[#allocation22_spill] sm:$0xff] %v2903_v46 }
 0x119   : > { %v2907_v48 = vpop.permute.xlu0 %1060 }
 0x11a   : > { %4087 = vst [vmem:[#allocation23_spill] sm:$0xff] %v2907_v48 }
 0x121   : > { %v2911_v51 = vpop.permute.xlu0 %1096 }
 0x12a   : > { %v399_v4 = vpop.permute.xlu0 %398 }
 0x12b   : > { %v403_v16 = vmul.f32 %v401_v58, %v399_v4  ;;  %v404_v30 = vmul.f32 %v402_v59, %v399_v4  ;;  %v471_v4 = vperm.slane %v393_v54, 7 }
 0x12d   : > { %v415_v25 = vadd.f32 %v413_v8, %v403_v16  ;;  %v416_v23 = vadd.f32 %v414_v12, %v404_v30 }
 0x12f   : > { %v425_v58 = vadd.f32 %v423_v41, %v415_v25  ;;  %v426_v59 = vadd.f32 %v424_v26, %v416_v23  ;;  %v473_v25 = vmul.f32 %v471_v4, %v2899_v44  ;;  %v474_v23 = vmul.f32 %v472_v24, %v2899_v44 }
 0x131   : > { %v435_v0 = vadd.f32 %v433_v27, %v425_v58  ;;  %v436_v6 = vadd.f32 %v434_v57, %v426_v59 }
 0x132   : > { %v481_v11 = vpop.permute.xlu0 %480 }
 0x133   : > { %v445_v8 = vadd.f32 %v443_v7, %v435_v0  ;;  %v446_v12 = vadd.f32 %v444_v2, %v436_v6  ;;  %v2929_v7 = vpop.permute.xlu2 %712 }
 0x135   : > { %v455_v26 = vadd.f32 %v453_v1, %v445_v8  ;;  %v456_v41 = vadd.f32 %v454_v17, %v446_v12 }
 0x137   : > { %v465_v49 = vadd.f32 %v463_v50, %v455_v26  ;;  %v466_v20 = vadd.f32 %v464_v62, %v456_v41 }
 0x139   : > { %v475_v9 = vadd.f32 %v473_v25, %v465_v49  ;;  %v476_v42 = vadd.f32 %v474_v23, %v466_v20  ;;  %v2939_v20 = vpop.permute.xlu1 %626 }
 0x13a   : > { %4088 = vst [vmem:[#allocation24_spill] sm:$0xff] %v2939_v20 }
 0x13b   : > { %v483_v53 = vadd.f32 %v481_v11, %v475_v9  ;;  %v484_v0 = vadd.f32 %v481_v11, %v476_v42  ;;  %v2933_v44 = vpop.permute.xlu2 %747 }
 0x13d   : > { %v2193_v2 = vmul.f32 -1.442695, %v483_v53  ;;  %v2194_v6 = vmul.f32 -1.442695, %v484_v0 }
 0x13f   : > { %2392 = vpow2.f32 %v2193_v2 }
 0x140   : > { %2394 = vpow2.f32 %v2194_v6 }
 0x141   : > { %v2951_v6 = vpop.permute.xlu1 %666 }
 0x143   : > { %v2937_v61 = vpop.permute.xlu2 %792 }
 0x145   : > { %v2393_v54 = vpop.eup %2392 }
 0x146   : > { %v2395_v1 = vpop.eup %2394  ;;  %v491_v17 = vadd.f32 1.0, %v2393_v54 }
 0x147   : > { %v492_v24 = vadd.f32 1.0, %v2395_v1 }
 0x148   : > { %2396 = vrcp.f32 %v491_v17  ;;  %v504_v57 = vand.u32 2147483648, %v491_v17  ;;  %v502_v4 = vand.u32 2147483647, %v491_v17  ;;  %vm498_vm2 = vweird.f32 %v491_v17 }
 0x149   : > { %2398 = vrcp.f32 %v492_v24  ;;  %v519_v58 = vand.u32 2147483648, %v492_v24  ;;  %v517_v62 = vand.u32 2147483647, %v492_v24  ;;  %vm513_vm3 = vweird.f32 %v492_v24  ;;  %v2955_v1 = vpop.permute.xlu1 %701 }
 0x14a   : > { %v505_v25 = vor.u32 1.1754944e-38, %v504_v57  ;;  %vm503_vm6 = vcmp.eq.f32.partialorder %v502_v4, 8.507059e+37  ;;  %4093 = vst [vmem:[#allocation29_spill] sm:$0xff] %v2955_v1 }
 0x14b   : > { %v520_v23 = vor.u32 1.1754944e-38, %v519_v58  ;;  %vm518_vm7 = vcmp.eq.f32.partialorder %v517_v62, 8.507059e+37  ;;  %v2949_v2 = vpop.permute.xlu2 %827 }
 0x14c   : > { %4091 = vst [vmem:[#allocation27_spill] sm:$0xff] %v2949_v2 }
 0x14e   : > { %v2397_v60 = vpop.eup %2396 }
 0x14f   : > { %v2399_v63 = vpop.eup %2398  ;;  %v494_v16 = vmul.f32 %v2397_v60, %v491_v17  ;;  %vm499_vm0 = vweird.f32 %v2397_v60 }
 0x150   : > { %v509_v30 = vmul.f32 %v2399_v63, %v492_v24  ;;  %vm514_vm1 = vweird.f32 %v2399_v63  ;;  %vm500_vm4 = vmor %vm498_vm2, %vm499_vm0  ;;  %vm901_vm0 = vcmask 269312   ;;  %vm959_vm2 = vcmask 285696  }
 0x151   : > { %v495_v56 = vsub.f32 1.0, %v494_v16  ;;  %vm515_vm5 = vmor %vm513_vm3, %vm514_vm1  ;;  %vm738_vm1 = vcmask 138240   ;;  %vm994_vm3 = vcmask 293888  }
 0x152   : > { %v510_v27 = vsub.f32 1.0, %v509_v30 }
 0x153   : > { %v496_v59 = vmul.f32 %v2397_v60, %v495_v56  ;;  %v2953_v54 = vpop.permute.xlu2 %862 }
 0x154   : > { %v511_v50 = vmul.f32 %v2399_v63, %v510_v27  ;;  %4092 = vst [vmem:[#allocation28_spill] sm:$0xff] %v2953_v54 }
 0x155   : > { %v497_v8 = vadd.f32 %v2397_v60, %v496_v59 }
 0x156   : > { %v512_v12 = vadd.f32 %v2399_v63, %v511_v50 }
 0x157   : > { %v501_v26 = vsel %vm500_vm4, %v2397_v60, %v497_v8  ;;  %vm1029_vm4 = vcmask 392192  }
 0x158   : > { %v516_v41 = vsel %vm515_vm5, %v2399_v63, %v512_v12  ;;  %v506_v49 = vsel %vm503_vm6, %v505_v25, %v501_v26  ;;  %vm1064_vm5 = vcmask 400384   ;;  %vm589_vm6 = vcmask 1039360  }
 0x159   : > { %v521_v9 = vsel %vm518_vm7, %v520_v23, %v516_v41  ;;  %v2941_v42 = vmul.f32 %v506_v49, %v483_v53  ;;  %v2959_v53 = vpop.permute.xlu1 %736  ;;  %vm612_vm7 = vcmask 1031168  }
 0x15a   : > { %v2943_v11 = vmul.f32 %v521_v9, %v484_v0  ;;  %4095 = vst [vmem:[#allocation31_spill] sm:$0xff] %v2959_v53 }
 0x15b   : > { %4089 = vst [vmem:[#allocation25_spill] sm:$0xff] %v2941_v42  ;;  %527 = vrot.lane.b32.xlu1 %v2941_v42, %s2576_s21  ;;  %v2957_v17 = vpop.permute.xlu2 %897 }
 0x15c   : > { %4090 = vst [vmem:[#allocation26_spill] sm:$0xff] %v2943_v11  ;;  %529 = vrot.lane.b32.xlu2 %v2943_v11, %s2576_s21 }
 0x15d   : > { %4094 = vst [vmem:[#allocation30_spill] sm:$0xff] %v2957_v17 }
 0x161   : > { %v2961_v24 = vpop.permute.xlu1 %805 }
 0x163   : > { %v934_v0 = vpop.permute.xlu2 %933 }
 0x169   : > { %v2965_v63 = vpop.permute.xlu1 %840 }
 0x16b   : > { %v2963_v60 = vpop.permute.xlu2 %968 }
 0x171   : > { %v2969_v30 = vpop.permute.xlu1 %875 }
 0x173   : > { %v2967_v16 = vpop.permute.xlu2 %1003 }
 0x179   : > { %v2973_v27 = vpop.permute.xlu1 %910 }
 0x17b   : > { %v2971_v56 = vpop.permute.xlu2 %1038 }
 0x181   : > { %v2977_v58 = vpop.permute.xlu1 %957 }
 0x182   : > { %4096 = vst [vmem:[#allocation32_spill] sm:$0xff] %v2977_v58 }
 0x183   : > { %v2975_v57 = vpop.permute.xlu2 %1073 }
 0x189   : > { %v2981_v4 = vpop.permute.xlu1 %992 }
 0x18a   : > { %4097 = vst [vmem:[#allocation33_spill] sm:$0xff] %v2981_v4 }
 0x18b   : > { %v2979_v59 = vpop.permute.xlu2 %1118 }
 0x191   : > { %v2989_v12 = vpop.permute.xlu1 %1027 }
 0x192   : > { %4098 = vst [vmem:[#allocation34_spill] sm:$0xff] %v2989_v12 }
 0x199   : > { %v2991_v25 = vpop.permute.xlu1 %1062 }
 0x19a   : > { %4099 = vst [vmem:[#allocation35_spill] sm:$0xff] %v2991_v25 }
 0x1b6   : > { %v530_v50 = vpop.permute.xlu2 %529 }
 0x1b7   : > { %v2984_v62 = vsel %vm531_vm8, %v530_v50, 0.0 }
 0x1b8   : > { %v602_v8 = vmul.f32 %v2913_v52, %v2984_v62  ;;  %v775_v42 = vmul.f32 %v2883_v34, %v2984_v62 }
 0x1ba   : > { %610 = vrot.lane.b32.xlu2 %v602_v8, %s2577_s22 }
 0x1cd   : > { %v528_v23 = vpop.permute.xlu1 %527 }
 0x1ce   : > { %v2994_v26 = vsel %vm531_vm8, %v528_v23, %v530_v50  ;;  %v2997_v41 = vsel %vm531_vm8, 0.0, %v528_v23  ;;  %v938_v23 = vmul.f32 %v934_v0, %v2984_v62 }
 0x1cf   : > { %v600_v49 = vmul.f32 %v2913_v52, %v2997_v41  ;;  %v774_v9 = vmul.f32 %v2883_v34, %v2994_v26  ;;  %v601_v8 = vmul.f32 %v2913_v52, %v2994_v26  ;;  %v936_v50 = vmul.f32 %v934_v0, %v2997_v41 }
 0x1d0   : > { %v773_v11 = vmul.f32 %v2883_v34, %v2997_v41  ;;  %v3016_v52 = vsel %vm565_vm9, %v2905_v47, %v2866_v28  ;;  %v937_v34 = vmul.f32 %v934_v0, %v2994_v26  ;;  %v1099_v0 = vmul.f32 %v2911_v51, %v2997_v41 }
 0x1d1   : > { %606 = vrot.lane.b32.xlu0 %v600_v49, %s2577_s22  ;;  %781 = vrot.lane.b32.xlu2 %v774_v9, %s2578_s25  ;;  %v571_v49 = vmul.f32 %v3016_v52, %v2994_v26  ;;  %v1100_v9 = vmul.f32 %v2911_v51, %v2994_v26  ;;  %vm652_vm9 = vcmask 1022976  }
 0x1d2   : > { %608 = vrot.lane.b32.xlu1 %v601_v8, %s2577_s22 }
 0x1d3   : > { %v578_v8 = vmul.f32 %v2935_v3, %v571_v49 }
 0x1d9   : > { %942 = vrot.lane.b32.xlu0 %v936_v50, %s2579_s18  ;;  %946 = vrot.lane.b32.xlu2 %v938_v23, %s2579_s18  ;;  %v633_v50 = vmul.f32 %v2871_v29, %v2997_v41 }
 0x1da   : > { %779 = vrot.lane.b32.xlu1 %v773_v11, %s2578_s25  ;;  %v570_v11 = vmul.f32 %v2905_v47, %v2997_v41 }
 0x1db   : > { %v640_v49 = vmul.f32 %v2920_v45, %v633_v50  ;;  %v675_v50 = vmul.f32 %v2951_v6, %v2984_v62 }
 0x1dc   : > { %v577_v23 = vmul.f32 %v2935_v3, %v570_v11 }
 0x1e1   : > { %1107 = vrot.lane.b32.xlu2 %v1100_v9, %s3981_s24  ;;  %585 = vrot.lane.b32.xlu0 %v578_v8, %s2581_s27  ;;  %v673_v9 = vmul.f32 %v2877_v31, %v2997_v41 }
 0x1e2   : > { %783 = vrot.lane.b32.xlu1 %v775_v42, %s2578_s25  ;;  %v635_v42 = vmul.f32 %v2939_v20, %v2984_v62 }
 0x1e3   : > { %v680_v11 = vmul.f32 %v2927_v39, %v673_v9  ;;  %v710_v9 = vmul.f32 %v2955_v1, %v2984_v62 }
 0x1e4   : > { %v642_v8 = vmul.f32 %v2920_v45, %v635_v42  ;;  %v1101_v42 = vmul.f32 %v2911_v51, %v2984_v62 }
 0x1e9   : > { %583 = vrot.lane.b32.xlu2 %v577_v23, %s2581_s27  ;;  %646 = vrot.lane.b32.xlu0 %v640_v49, %s3993_s19  ;;  %v708_v23 = vmul.f32 %v2879_v32, %v2997_v41  ;;  %v682_v49 = vmul.f32 %v2927_v39, %v675_v50 }
 0x1ea   : > { %944 = vrot.lane.b32.xlu1 %v937_v34, %s2579_s18 }
 0x1eb   : > { %v715_v34 = vmul.f32 %v2929_v7, %v708_v23  ;;  %v3074_v23 = vsel %vm796_vm10, %v2937_v61, %v2885_v35  ;;  %vm692_vm10 = vcmask 1014784  }
 0x1ec   : > { %4100 = vst [vmem:[#allocation36_spill] sm:$0xff] %v3074_v23 }
 0x1f1   : > { %650 = vrot.lane.b32.xlu2 %v642_v8, %s3993_s19  ;;  %686 = vrot.lane.b32.xlu0 %v680_v11, %s3983_s30  ;;  %v743_v8 = vmul.f32 %v2881_v33, %v2997_v41  ;;  %v572_v11 = vmul.f32 %v2866_v28, %v2984_v62 }
 0x1f2   : > { %1105 = vrot.lane.b32.xlu1 %v1099_v0, %s3981_s24  ;;  %v717_v0 = vmul.f32 %v2929_v7, %v710_v9 }
 0x1f3   : > { %v750_v51 = vmul.f32 %v2933_v44, %v743_v8  ;;  %v579_v50 = vmul.f32 %v2935_v3, %v572_v11  ;;  %v802_v3 = vmul.f32 %v3074_v23, %v2994_v26 }
 0x1f5   : > { %v809_v8 = vmul.f32 %v2961_v24, %v802_v3 }
 0x1f9   : > { %690 = vrot.lane.b32.xlu2 %v682_v49, %s3983_s30  ;;  %721 = vrot.lane.b32.xlu0 %v715_v34, %s3986_s23  ;;  %v3079_v49 = vsel %vm628_vm11, %v2871_v29, %v2939_v20  ;;  %v745_v34 = vmul.f32 %v2959_v53, %v2984_v62  ;;  %vm727_vm11 = vcmask 916480  }
 0x1fa   : > { %1109 = vrot.lane.b32.xlu1 %v1101_v42, %s3981_s24  ;;  %v634_v42 = vmul.f32 %v3079_v49, %v2994_v26  ;;  %s3995_s24 = smov 108  }
 0x1fb   : > { %v752_v9 = vmul.f32 %v2933_v44, %v745_v34 }
 0x1fc   : > { %v641_v11 = vmul.f32 %v2920_v45, %v634_v42 }
 0x201   : > { %725 = vrot.lane.b32.xlu2 %v717_v0, %s3986_s23  ;;  %756 = vrot.lane.b32.xlu0 %v750_v51, %s3989_s29  ;;  %v3094_v0 = vsel %vm831_vm12, %v2949_v2, %v2887_v36  ;;  %v3099_v51 = vsel %vm668_vm13, %v2877_v31, %v2951_v6  ;;  %vm4066_vm12 = vcmask 908288   ;;  %vm785_vm13 = vcmask 900096  }
 0x202   : > { %587 = vrot.lane.b32.xlu1 %v579_v50, %s2581_s27  ;;  %4101 = vst [vmem:[#allocation37_spill] sm:$0xff] %v3094_v0  ;;  %v801_v50 = vmul.f32 %v2937_v61, %v2997_v41  ;;  %v837_v45 = vmul.f32 %v3094_v0, %v2994_v26  ;;  %v674_v34 = vmul.f32 %v3099_v51, %v2994_v26 }
 0x203   : > { %4102 = vst [vmem:[#allocation38_spill] sm:$0xff] %v3099_v51 }
 0x204   : > { %v808_v3 = vmul.f32 %v2961_v24, %v801_v50  ;;  %v844_v42 = vmul.f32 %v2965_v63, %v837_v45  ;;  %v836_v50 = vmul.f32 %v2949_v2, %v2997_v41  ;;  %v964_v2 = vmul.f32 %v2893_v40, %v2997_v41 }
 0x209   : > { %760 = vrot.lane.b32.xlu2 %v752_v9, %s3989_s29  ;;  %816 = vrot.lane.b32.xlu0 %v809_v8, %s3991_s28  ;;  %v681_v9 = vmul.f32 %v2927_v39, %v674_v34  ;;  %v3114_v8 = vsel %vm866_vm14, %v2953_v54, %v2889_v37  ;;  %v843_v34 = vmul.f32 %v2965_v63, %v836_v50  ;;  %vm4065_vm14 = vcmask 891904  }
 0x20a   : > { %648 = vrot.lane.b32.xlu1 %v641_v11, %s3993_s19  ;;  %4103 = vst [vmem:[#allocation39_spill] sm:$0xff] %v3114_v8  ;;  %v3119_v11 = vsel %vm703_vm15, %v2879_v32, %v2955_v1  ;;  %v872_v39 = vmul.f32 %v3114_v8, %v2994_v26  ;;  %v3139_v8 = vsel %vm738_vm1, %v2881_v33, %v2959_v53  ;;  %s4028_s19 = smov 80   ;;  %vm4034_vm15 = vcmask 883712  }
 0x20b   : > { %v709_v45 = vmul.f32 %v3119_v11, %v2994_v26  ;;  %4105 = vst [vmem:[#allocation41_spill] sm:$0xff] %v3139_v8  ;;  %v871_v50 = vmul.f32 %v2953_v54, %v2997_v41  ;;  %vm4026_vm1 = vcmask 777216  }
 0x211   : > { %814 = vrot.lane.b32.xlu2 %v808_v3, %s3991_s28  ;;  %851 = vrot.lane.b32.xlu0 %v844_v42, %s3995_s24  ;;  %v879_v3 = vmul.f32 %v2969_v30, %v872_v39  ;;  %v716_v42 = vmul.f32 %v2929_v7, %v709_v45  ;;  %v744_v39 = vmul.f32 %v3139_v8, %v2994_v26 }
 0x212   : > { %688 = vrot.lane.b32.xlu1 %v681_v9, %s3983_s30  ;;  %s4057_s30 = smov 96   ;;  %v3134_v9 = vsel %vm901_vm0, %v2957_v17, %v2891_v38  ;;  %v878_v45 = vmul.f32 %v2969_v30, %v871_v50  ;;  %v803_v50 = vmul.f32 %v2885_v35, %v2984_v62  ;;  %vm4027_vm0 = vcmask 785408  }
 0x213   : > { %4104 = vst [vmem:[#allocation40_spill] sm:$0xff] %v3134_v9  ;;  %v907_v7 = vmul.f32 %v3134_v9, %v2994_v26 }
 0x219   : > { %849 = vrot.lane.b32.xlu2 %v843_v34, %s3995_s24  ;;  %886 = vrot.lane.b32.xlu0 %v879_v3, %s4057_s30  ;;  %v914_v34 = vmul.f32 %v2973_v27, %v907_v7  ;;  %v751_v3 = vmul.f32 %v2933_v44, %v744_v39  ;;  %v971_v44 = vmul.f32 %v2963_v60, %v964_v2  ;;  %v3161_v39 = vpop.permute.xlu2 %610 }
 0x21a   : > { %723 = vrot.lane.b32.xlu1 %v716_v42, %s3986_s23  ;;  %s4032_s23 = smov 95   ;;  %v906_v42 = vmul.f32 %v2957_v17, %v2997_v41  ;;  %v838_v2 = vmul.f32 %v2887_v36, %v2984_v62 }
 0x21c   : > { %v913_v7 = vmul.f32 %v2973_v27, %v906_v42 }
 0x221   : > { %884 = vrot.lane.b32.xlu2 %v878_v45, %s4057_s30  ;;  %921 = vrot.lane.b32.xlu0 %v914_v34, %s4032_s23  ;;  %v810_v45 = vmul.f32 %v2961_v24, %v803_v50  ;;  %v966_v34 = vmul.f32 %v2977_v58, %v2984_v62 }
 0x222   : > { %758 = vrot.lane.b32.xlu1 %v751_v3, %s3989_s29  ;;  %s4030_s29 = smov 93   ;;  %v999_v3 = vmul.f32 %v2897_v43, %v2997_v41 }
 0x223   : > { %v973_v42 = vmul.f32 %v2963_v60, %v966_v34  ;;  %v873_v34 = vmul.f32 %v2889_v37, %v2984_v62 }
 0x224   : > { %v1006_v24 = vmul.f32 %v2967_v16, %v999_v3 }
 0x229   : > { %919 = vrot.lane.b32.xlu2 %v913_v7, %s4032_s23  ;;  %977 = vrot.lane.b32.xlu0 %v971_v44, %s4030_s29  ;;  %v845_v7 = vmul.f32 %v2965_v63, %v838_v2  ;;  %v1001_v44 = vmul.f32 %v2981_v4, %v2984_v62  ;;  %v880_v2 = vmul.f32 %v2969_v30, %v873_v34 }
 0x22a   : > { %818 = vrot.lane.b32.xlu1 %v810_v45, %s3991_s28  ;;  %s4055_s28 = smov 92   ;;  %v1034_v45 = vmul.f32 %v2903_v46, %v2997_v41 }
 0x22b   : > { %v3175_v50 = vpop.permute.xlu2 %781  ;;  %v1008_v3 = vmul.f32 %v2967_v16, %v1001_v44  ;;  %v908_v44 = vmul.f32 %v2891_v38, %v2984_v62 }
 0x22c   : > { %v1041_v63 = vmul.f32 %v2971_v56, %v1034_v45 }
 0x22d   : > { %v915_v34 = vmul.f32 %v2973_v27, %v908_v44  ;;  %v3999_v44 = vmov 18  }
 0x22e   : > { %2355 = vset.pattern.permute.xlu1 %v3999_v44 }
 0x231   : > { %981 = vrot.lane.b32.xlu2 %v973_v42, %s4030_s29  ;;  %1012 = vrot.lane.b32.xlu0 %v1006_v24, %s4055_s28  ;;  %v1036_v24 = vmul.f32 %v2989_v12, %v2984_v62 }
 0x232   : > { %853 = vrot.lane.b32.xlu1 %v845_v7, %s3995_s24  ;;  %v1069_v7 = vmul.f32 %v2907_v48, %v2997_v41  ;;  %s4053_s24 = smov 79  }
 0x233   : > { %v3192_v42 = vpop.permute.xlu2 %946  ;;  %v1043_v30 = vmul.f32 %v2971_v56, %v1036_v24 }
 0x234   : > { %v1076_v45 = vmul.f32 %v2975_v57, %v1069_v7 }
 0x239   : > { %1016 = vrot.lane.b32.xlu2 %v1008_v3, %s4055_s28  ;;  %1047 = vrot.lane.b32.xlu0 %v1041_v63, %s4028_s19  ;;  %v3209_v3 = vsel %vm959_vm2, %v2893_v40, %v2977_v58  ;;  %vm948_vm2 = vcmask 769024  }
 0x23a   : > { %888 = vrot.lane.b32.xlu1 %v880_v2, %s4057_s30  ;;  %4106 = vst [vmem:[#allocation42_spill] sm:$0xff] %v3209_v3  ;;  %v1071_v2 = vmul.f32 %v2991_v25, %v2984_v62  ;;  %v965_v27 = vmul.f32 %v3209_v3, %v2994_v26  ;;  %s4148_s30 = smov 108  }
 0x23b   : > { %v3213_v24 = vpop.permute.xlu2 %1107 }
 0x241   : > { %1051 = vrot.lane.b32.xlu2 %v1043_v30, %s4028_s19  ;;  %1082 = vrot.lane.b32.xlu0 %v1076_v45, %s4053_s24  ;;  %v1078_v30 = vmul.f32 %v2975_v57, %v1071_v2  ;;  %v972_v45 = vmul.f32 %v2963_v60, %v965_v27  ;;  %v3240_v27 = vsel %vm1029_vm4, %v2903_v46, %v2989_v12  ;;  %vm4063_vm4 = vcmask 752640  }
 0x242   : > { %923 = vrot.lane.b32.xlu1 %v915_v34, %s4032_s23  ;;  %v3228_v34 = vsel %vm994_vm3, %v2897_v43, %v2981_v4  ;;  %4108 = vst [vmem:[#allocation44_spill] sm:$0xff] %v3240_v27  ;;  %v1035_v38 = vmul.f32 %v3240_v27, %v2994_v26  ;;  %vm4064_vm3 = vcmask 760832   ;;  %s4038_s23 = smov 64  }
 0x243   : > { %v607_v63 = vpop.permute.xlu0 %606  ;;  %4107 = vst [vmem:[#allocation43_spill] sm:$0xff] %v3228_v34  ;;  %v1000_v2 = vmul.f32 %v3228_v34, %v2994_v26  ;;  %v584_v44 = vpop.permute.xlu2 %583 }
 0x244   : > { %v3215_v7 = vpop.permute.xlu1 %608  ;;  %v1042_v34 = vmul.f32 %v2971_v56, %v1035_v38 }
 0x245   : > { %v1007_v60 = vmul.f32 %v2967_v16, %v1000_v2  ;;  %v3252_v16 = vsel %vm1064_vm5, %v2907_v48, %v2991_v25  ;;  %v613_v0 = vsel %vm612_vm7, %v607_v63, %v3215_v7  ;;  %vm4062_vm5 = vcmask 654336  }
 0x246   : > { %4109 = vst [vmem:[#allocation45_spill] sm:$0xff] %v3252_v16  ;;  %v1070_v12 = vmul.f32 %v3252_v16, %v2994_v26 }
 0x248   : > { %v1077_v46 = vmul.f32 %v2975_v57, %v1070_v12  ;;  %v544_v57 = vmul.f32 %v2815_v18, %v2997_v41 }
 0x249   : > { %1086 = vrot.lane.b32.xlu2 %v1078_v30, %s4053_s24  ;;  %1120 = vrot.lane.b32.xlu0 %v2823_v19, %s2575_s1  ;;  %s4051_s1 = smov 77  }
 0x24a   : > { %979 = vrot.lane.b32.xlu1 %v972_v45, %s4030_s29  ;;  %s2602_s29 = smov 65  }
 0x24b   : > { %v3230_v58 = vpop.permute.xlu0 %942  ;;  %v3246_v17 = vpop.permute.xlu2 %650 }
 0x24c   : > { %v3232_v40 = vpop.permute.xlu1 %779 }
 0x252   : > { %1014 = vrot.lane.b32.xlu1 %v1007_v60, %s4055_s28  ;;  %s4149_s28 = smov 79  }
 0x253   : > { %v586_v30 = vpop.permute.xlu0 %585  ;;  %v691_v36 = vpop.permute.xlu2 %690 }
 0x254   : > { %v3242_v45 = vpop.permute.xlu1 %783  ;;  %v590_v12 = vsel %vm589_vm6, %v584_v44, %v586_v30 }
 0x25a   : > { %1049 = vrot.lane.b32.xlu1 %v1042_v34, %s4028_s19  ;;  %s2597_s19 = smov 52  }
 0x25b   : > { %v647_v2 = vpop.permute.xlu0 %646  ;;  %v726_v56 = vpop.permute.xlu2 %725 }
 0x25c   : > { %v3254_v60 = vpop.permute.xlu1 %944 }
 0x262   : > { %1084 = vrot.lane.b32.xlu1 %v1077_v46, %s4053_s24  ;;  %s3551_s24 = scalar_lea.vmem [#allocation7], %s2190_s26  ;;  %s4131_s26 = smov 125  }
 0x263   : > { %v687_v27 = vpop.permute.xlu0 %686  ;;  %v761_v3 = vpop.permute.xlu2 %760 }
 0x264   : > { %v3260_v4 = vpop.permute.xlu1 %1105 }
 0x26a   : > { %1131 = vperm.xlu1 %2355, %v2810_v15   ;;  %v552_v15 = vmul.f32 %v2931_v55, %v544_v57  ;;  %v545_v57 = vmul.f32 %v2836_v22, %v2994_v26 }
 0x26b   : > { %v722_v38 = vpop.permute.xlu0 %721  ;;  %v815_v16 = vpop.permute.xlu2 %814 }
 0x26c   : > { %v3263_v34 = vpop.permute.xlu1 %1109  ;;  %v594_v37 = vadd.f32 %v590_v12, %v552_v15 }
 0x26e   : > { %v617_v43 = vadd.f32 %v613_v0, %v594_v37  ;;  %v553_v0 = vmul.f32 %v2931_v55, %v545_v57 }
 0x273   : > { %v757_v23 = vpop.permute.xlu0 %756  ;;  %v850_v32 = vpop.permute.xlu2 %849 }
 0x274   : > { %v588_v25 = vpop.permute.xlu1 %587 }
 0x275   : > { %v591_v63 = vsel %vm589_vm6, %v586_v30, %v588_v25  ;;  %v614_v25 = vsel %vm612_vm7, %v3215_v7, %v3161_v39 }
 0x27b   : > { %v3265_v9 = vpop.permute.xlu0 %816  ;;  %v885_v54 = vpop.permute.xlu2 %884 }
 0x27c   : > { %v649_v8 = vpop.permute.xlu1 %648 }
 0x27d   : > { %v653_v51 = vsel %vm652_vm9, %v647_v2, %v649_v8  ;;  %v654_v55 = vsel %vm652_vm9, %v649_v8, %v3246_v17 }
 0x27e   : > { %v657_v20 = vadd.f32 %v653_v51, %v617_v43  ;;  %v786_v51 = vsel %vm785_vm13, %v3232_v40, %v3175_v50 }
 0x283   : > { %v852_v1 = vpop.permute.xlu0 %851 }
 0x284   : > { %v689_v46 = vpop.permute.xlu1 %688 }
 0x285   : > { %v693_v35 = vsel %vm692_vm10, %v687_v27, %v689_v46  ;;  %v595_v27 = vadd.f32 %v591_v63, %v553_v0 }
 0x286   : > { %v697_v12 = vadd.f32 %v693_v35, %v657_v20  ;;  %v821_v20 = vsel %vm4065_vm14, %v815_v16, %v3265_v9 }
 0x28b   : > { %v887_v15 = vpop.permute.xlu0 %886 }
 0x28c   : > { %v724_v48 = vpop.permute.xlu1 %723  ;;  %v891_v16 = vsel %vm4027_vm0, %v885_v54, %v887_v15 }
 0x28d   : > { %v728_v44 = vsel %vm727_vm11, %v722_v38, %v724_v48 }
 0x28e   : > { %v732_v53 = vadd.f32 %v728_v44, %v697_v12  ;;  %v694_v44 = vsel %vm692_vm10, %v689_v46, %v691_v36  ;;  %v920_v12 = vpop.permute.xlu2 %919  ;;  %v787_v36 = vsel %vm785_vm13, %v3175_v50, %v3242_v45 }
 0x293   : > { %v922_v40 = vpop.permute.xlu0 %921 }
 0x294   : > { %v759_v29 = vpop.permute.xlu1 %758  ;;  %v926_v39 = vsel %vm4026_vm1, %v920_v12, %v922_v40 }
 0x295   : > { %v763_v37 = vsel %vm4066_vm12, %v757_v23, %v759_v29  ;;  %v618_v23 = vadd.f32 %v614_v25, %v595_v27 }
 0x296   : > { %v767_v43 = vadd.f32 %v763_v37, %v732_v53  ;;  %v856_v53 = vsel %vm4034_vm15, %v850_v32, %v852_v1  ;;  %v729_v37 = vsel %vm727_vm11, %v724_v48, %v726_v56  ;;  %v764_v32 = vsel %vm4066_vm12, %v759_v29, %v761_v3 }
 0x297   : > { %v658_v57 = vadd.f32 %v654_v55, %v618_v23 }
 0x298   : > { %v790_v35 = vadd.f32 %v786_v51, %v767_v43 }
 0x299   : > { %v698_v7 = vadd.f32 %v694_v44, %v658_v57 }
 0x29a   : > { %v825_v2 = vadd.f32 %v821_v20, %v790_v35 }
 0x29b   : > { %v733_v8 = vadd.f32 %v729_v37, %v698_v7  ;;  %v978_v35 = vpop.permute.xlu0 %977 }
 0x29c   : > { %v860_v30 = vadd.f32 %v856_v53, %v825_v2  ;;  %v819_v38 = vpop.permute.xlu1 %818 }
 0x29d   : > { %v768_v0 = vadd.f32 %v764_v32, %v733_v8  ;;  %v822_v54 = vsel %vm4065_vm14, %v3265_v9, %v819_v38  ;;  %v949_v9 = vsel %vm948_vm2, %v3230_v58, %v3254_v60  ;;  %v1127_v8 = vmul.f32 %v2979_v59, %v2997_v41 }
 0x29e   : > { %v895_v63 = vadd.f32 %v891_v16, %v860_v30  ;;  %v2595_v30 = vmov 19  }
 0x29f   : > { %v791_v46 = vadd.f32 %v787_v36, %v768_v0  ;;  %2356 = vset.pattern.permute.xlu1 %v2595_v30 }
 0x2a0   : > { %v930_v17 = vadd.f32 %v926_v39, %v895_v63 }
 0x2a1   : > { %v826_v48 = vadd.f32 %v822_v54, %v791_v46  ;;  %v3332_v46 = vld [vmem:[%s3945_s4] sm:$0x3] }
 0x2a2   : > { %v953_v50 = vadd.f32 %v949_v9, %v930_v17 }
 0x2a3   : > { %v1013_v55 = vpop.permute.xlu0 %1012 }
 0x2a4   : > { %v854_v43 = vpop.permute.xlu1 %853 }
 0x2a5   : > { %v857_v51 = vsel %vm4034_vm15, %v852_v1, %v854_v43  ;;  %vm4036_vm15 = vcmask 629760  }
 0x2a6   : > { %v861_v56 = vadd.f32 %v857_v51, %v826_v48  ;;  %v982_v51 = vpop.permute.xlu2 %981 }
 0x2ab   : > { %v1048_v23 = vpop.permute.xlu0 %1047 }
 0x2ac   : > { %v889_v27 = vpop.permute.xlu1 %888 }
 0x2ad   : > { %v892_v20 = vsel %vm4027_vm0, %v887_v15, %v889_v27  ;;  %vm1122_vm0 = vcmask 416768  }
 0x2ae   : > { %v896_v29 = vadd.f32 %v892_v20, %v861_v56  ;;  %v1017_v48 = vpop.permute.xlu2 %1016 }
 0x2b3   : > { %v1083_v44 = vpop.permute.xlu0 %1082 }
 0x2b4   : > { %v924_v3 = vpop.permute.xlu1 %923 }
 0x2b5   : > { %v927_v2 = vsel %vm4026_vm1, %v922_v40, %v924_v3  ;;  %vm4035_vm1 = vcmask 646144  }
 0x2b6   : > { %v931_v25 = vadd.f32 %v927_v2, %v896_v29  ;;  %v1052_v56 = vpop.permute.xlu2 %1051  ;;  %v2598_v29 = vmov 20  }
 0x2bb   : > { %v3312_v63 = vpop.permute.xlu0 %1120 }
 0x2bc   : > { %v980_v1 = vpop.permute.xlu1 %979  ;;  %v3317_v7 = vsel %vm1122_vm0, %v2979_v59, %v3312_v63  ;;  %v1129_v32 = vmul.f32 %v3312_v63, %v2984_v62  ;;  %vm4043_vm0 = vcmask 637952  }
 0x2bd   : > { %v984_v45 = vsel %vm4064_vm3, %v978_v35, %v980_v1  ;;  %v1128_v17 = vmul.f32 %v3317_v7, %v2994_v26  ;;  %v950_v35 = vsel %vm948_vm2, %v3254_v60, %v3192_v42  ;;  %v985_v20 = vsel %vm4064_vm3, %v980_v1, %v982_v51 }
 0x2be   : > { %v988_v53 = vadd.f32 %v984_v45, %v953_v50  ;;  %v1087_v27 = vpop.permute.xlu2 %1086  ;;  %v954_v3 = vadd.f32 %v950_v35, %v931_v25  ;;  %v1112_v42 = vsel %vm4043_vm0, %v3260_v4, %v3213_v24  ;;  %v1113_v60 = vsel %vm4043_vm0, %v3213_v24, %v3263_v34 }
 0x2bf   : > { %vm1284_vm0 = vcmask 547840  }
 0x2c4   : > { %v1015_v15 = vpop.permute.xlu1 %1014 }
 0x2c5   : > { %v1019_v40 = vsel %vm4063_vm4, %v1013_v55, %v1015_v15  ;;  %v1020_v2 = vsel %vm4063_vm4, %v1015_v15, %v1017_v48  ;;  %v989_v55 = vadd.f32 %v985_v20, %v954_v3 }
 0x2c6   : > { %v1023_v38 = vadd.f32 %v1019_v40, %v988_v53 }
 0x2c7   : > { %v1024_v50 = vadd.f32 %v1020_v2, %v989_v55 }
 0x2cc   : > { %v1050_v16 = vpop.permute.xlu1 %1049 }
 0x2cd   : > { %v1054_v57 = vsel %vm4062_vm5, %v1048_v23, %v1050_v16  ;;  %v1055_v9 = vsel %vm4062_vm5, %v1050_v16, %v1052_v56 }
 0x2ce   : > { %v1058_v58 = vadd.f32 %v1054_v57, %v1023_v38  ;;  %v1059_v23 = vadd.f32 %v1055_v9, %v1024_v50 }
 0x2d4   : > { %v1085_v12 = vpop.permute.xlu1 %1084 }
 0x2d5   : > { %v1089_v37 = vsel %vm4035_vm1, %v1083_v44, %v1085_v12  ;;  %v1090_v45 = vsel %vm4035_vm1, %v1085_v12, %v1087_v27  ;;  %vm1157_vm1 = vcmask 424960  }
 0x2d6   : > { %v1093_v39 = vadd.f32 %v1089_v37, %v1058_v58  ;;  %v1094_v40 = vadd.f32 %v1090_v45, %v1059_v23 }
 0x2d8   : > { %v1116_v1 = vadd.f32 %v1112_v42, %v1093_v39  ;;  %v1117_v38 = vadd.f32 %v1113_v60, %v1094_v40  ;;  %v4110_v42 = vmov 0   ;;  %v2603_v60 = vmov 22  }
 0x2d9   : > { %2359 = vset.pattern.permute.xlu2 %v2603_v60 }
 0x2dc   : > { %v1132_v0 = vpop.permute.xlu1 %1131 }
 0x2dd   : > { %v1134_v43 = vmul.f32 %v1132_v0, %v1127_v8  ;;  %v1136_v36 = vmul.f32 %v1132_v0, %v1129_v32  ;;  %v1135_v54 = vmul.f32 %v1132_v0, %v1128_v17 }
 0x2df   : > { %1140 = vrot.lane.b32.xlu2 %v1134_v43, %s4051_s1  ;;  %1144 = vrot.lane.b32.xlu1 %v1136_v36, %s4051_s1  ;;  %v2601_v43 = vmov 21  }
 0x2e0   : > { %1142 = vrot.lane.b32.xlu0 %v1135_v54, %s4051_s1  ;;  %s4154_s1 = smov 95  }
 0x2e7   : > { %1153 = vrot.lane.b32.xlu2 %v2802_v13, %s2597_s19  ;;  %1166 = vperm.xlu1 %2356, %v3332_v46  }
 0x2e8   : > { %1155 = vrot.lane.b32.xlu0 %v2830_v21, %s2597_s19  ;;  %s4049_s19 = smov 76  }
 0x2ef   : > { %2357 = vset.pattern.permute.xlu1 %v2598_v29 }
 0x339   : > { %v1141_v53 = vpop.permute.xlu2 %1140 }
 0x341   : > { %v3352_v12 = vpop.permute.xlu2 %1153 }
 0x342   : > { %v1162_v37 = vmul.f32 %v3352_v12, %v2997_v41 }
 0x351   : > { %v1145_v25 = vpop.permute.xlu1 %1144 }
 0x352   : > { %v1143_v15 = vpop.permute.xlu0 %1142 }
 0x353   : > { %v1147_v44 = vsel %vm4036_vm15, %v1141_v53, %v1143_v15  ;;  %v1148_v16 = vsel %vm4036_vm15, %v1143_v15, %v1145_v25  ;;  %vm4042_vm15 = vcmask 523264  }
 0x354   : > { %v1151_v57 = vadd.f32 %v1147_v44, %v1116_v1  ;;  %v1152_v58 = vadd.f32 %v1148_v16, %v1117_v38 }
 0x359   : > { %v1167_v4 = vpop.permute.xlu1 %1166 }
 0x35a   : > { %v3356_v17 = vpop.permute.xlu0 %1155  ;;  %v1169_v24 = vmul.f32 %v1167_v4, %v1162_v37 }
 0x35b   : > { %v3360_v34 = vsel %vm1157_vm1, %v3352_v12, %v3356_v17  ;;  %v1164_v39 = vmul.f32 %v3356_v17, %v2984_v62  ;;  %vm4037_vm1 = vcmask 621568  }
 0x35c   : > { %v1163_v32 = vmul.f32 %v3360_v34, %v2994_v26  ;;  %1175 = vrot.lane.b32.xlu2 %v1169_v24, %s4049_s19 }
 0x35d   : > { %v1171_v8 = vmul.f32 %v1167_v4, %v1164_v39 }
 0x35e   : > { %v1170_v0 = vmul.f32 %v1167_v4, %v1163_v32 }
 0x35f   : > { %1179 = vrot.lane.b32.xlu1 %v1171_v8, %s4049_s19 }
 0x360   : > { %1177 = vrot.lane.b32.xlu0 %v1170_v0, %s4049_s19  ;;  %s4157_s19 = smov 93  }
 0x364   : > { %1188 = vrot.lane.b32.xlu2 %v2815_v18, %s4038_s23 }
 0x367   : > { %1201 = vperm.xlu1 %2357, %v3332_v46  }
 0x368   : > { %1190 = vrot.lane.b32.xlu0 %v2836_v22, %s4038_s23 }
 0x36f   : > { %2358 = vset.pattern.permute.xlu1 %v2601_v43 }
 0x3b6   : > { %v1176_v36 = vpop.permute.xlu2 %1175 }
 0x3be   : > { %v3377_v20 = vpop.permute.xlu2 %1188 }
 0x3bf   : > { %v1197_v3 = vmul.f32 %v3377_v20, %v2997_v41 }
 0x3d1   : > { %v1180_v54 = vpop.permute.xlu1 %1179 }
 0x3d2   : > { %v1178_v51 = vpop.permute.xlu0 %1177 }
 0x3d3   : > { %v1182_v48 = vsel %vm4037_vm1, %v1176_v36, %v1178_v51  ;;  %v1183_v56 = vsel %vm4037_vm1, %v1178_v51, %v1180_v54  ;;  %vm1226_vm1 = vcmask 531456   ;;  %v4067_v36 = vmov 23  }
 0x3d4   : > { %v1186_v27 = vadd.f32 %v1182_v48, %v1151_v57  ;;  %v1187_v35 = vadd.f32 %v1183_v56, %v1152_v58 }
 0x3d9   : > { %v1202_v2 = vpop.permute.xlu1 %1201 }
 0x3da   : > { %v1204_v55 = vmul.f32 %v1202_v2, %v1197_v3  ;;  %v3381_v9 = vpop.permute.xlu0 %1190 }
 0x3db   : > { %v3386_v50 = vsel %vm4042_vm15, %v3377_v20, %v3381_v9  ;;  %v1199_v45 = vmul.f32 %v3381_v9, %v2984_v62 }
 0x3dc   : > { %v1198_v53 = vmul.f32 %v3386_v50, %v2994_v26  ;;  %1210 = vrot.lane.b32.xlu2 %v1204_v55, %s4038_s23 }
 0x3dd   : > { %v1206_v23 = vmul.f32 %v1202_v2, %v1199_v45  ;;  %v2608_v45 = vmov 24  }
 0x3de   : > { %v1205_v40 = vmul.f32 %v1202_v2, %v1198_v53 }
 0x3df   : > { %1214 = vrot.lane.b32.xlu1 %v1206_v23, %s4038_s23 }
 0x3e0   : > { %1212 = vrot.lane.b32.xlu0 %v1205_v40, %s4038_s23  ;;  %s4044_s23 = smov 62  }
 0x3e4   : > { %1222 = vrot.lane.b32.xlu2 %v2804_v14, %s2602_s29 }
 0x3e7   : > { %1235 = vperm.xlu1 %2358, %v3332_v46  }
 0x3e8   : > { %1224 = vrot.lane.b32.xlu0 %v2787_v5, %s2602_s29  ;;  %s4040_s29 = smov 63  }
 0x3ef   : > { %2362 = vset.pattern.permute.xlu1 %v4110_v42 }
 0x436   : > { %v1211_v25 = vpop.permute.xlu2 %1210 }
 0x43e   : > { %v3402_v58 = vpop.permute.xlu2 %1222 }
 0x43f   : > { %v1231_v14 = vmul.f32 %v3402_v58, %v2997_v41 }
 0x451   : > { %v1215_v1 = vpop.permute.xlu1 %1214 }
 0x452   : > { %v1213_v15 = vpop.permute.xlu0 %1212 }
 0x453   : > { %v1216_v38 = vsel %vm4042_vm15, %v1211_v25, %v1213_v15  ;;  %v1217_v44 = vsel %vm4042_vm15, %v1213_v15, %v1215_v1  ;;  %vm4046_vm15 = vcmask 506880  }
 0x454   : > { %v1220_v16 = vadd.f32 %v1216_v38, %v1186_v27  ;;  %v1221_v57 = vadd.f32 %v1217_v44, %v1187_v35 }
 0x459   : > { %v1236_v5 = vpop.permute.xlu1 %1235 }
 0x45a   : > { %v1238_v37 = vmul.f32 %v1236_v5, %v1231_v14  ;;  %v3406_v4 = vpop.permute.xlu0 %1224 }
 0x45b   : > { %v3410_v24 = vsel %vm1226_vm1, %v3402_v58, %v3406_v4  ;;  %v1233_v39 = vmul.f32 %v3406_v4, %v2984_v62  ;;  %vm4061_vm1 = vcmask 515072  }
 0x45c   : > { %v1232_v32 = vmul.f32 %v3410_v24, %v2994_v26  ;;  %1244 = vrot.lane.b32.xlu2 %v1238_v37, %s4040_s29 }
 0x45d   : > { %v1240_v8 = vmul.f32 %v1236_v5, %v1233_v39 }
 0x45e   : > { %v1239_v0 = vmul.f32 %v1236_v5, %v1232_v32 }
 0x45f   : > { %1248 = vrot.lane.b32.xlu1 %v1240_v8, %s4040_s29 }
 0x460   : > { %1246 = vrot.lane.b32.xlu0 %v1239_v0, %s4040_s29  ;;  %s2607_s29 = smov 67  }
 0x464   : > { %1258 = vperm.xlu2 %2359, %v3332_v46  }
 0x46c   : > { %2360 = vset.pattern.permute.xlu2 %v4067_v36 }
 0x4b6   : > { %v1245_v54 = vpop.permute.xlu2 %1244 }
 0x4be   : > { %v1259_v51 = vpop.permute.xlu2 %1258 }
 0x4bf   : > { %v1261_v48 = vmul.f32 %v1259_v51, %v2997_v41  ;;  %v1262_v56 = vmul.f32 %v1259_v51, %v2994_v26  ;;  %v1263_v27 = vmul.f32 %v1259_v51, %v2984_v62 }
 0x4c1   : > { %1271 = vrot.lane.b32.xlu2 %v1263_v27, %s4044_s23  ;;  %1269 = vrot.lane.b32.xlu1 %v1262_v56, %s4044_s23 }
 0x4c2   : > { %1267 = vrot.lane.b32.xlu0 %v1261_v48, %s4044_s23  ;;  %s2610_s23 = smov 68  }
 0x4c9   : > { %1282 = vrot.lane.b32.xlu1 %v2823_v19, %s2607_s29  ;;  %1293 = vperm.xlu2 %2360, %v3332_v46  }
 0x4ca   : > { %1280 = vrot.lane.b32.xlu0 %v2795_v10, %s2607_s29  ;;  %s4047_s29 = smov 61  }
 0x4d1   : > { %v1249_v55 = vpop.permute.xlu1 %1248  ;;  %2361 = vset.pattern.permute.xlu2 %v2608_v45 }
 0x4d2   : > { %v1247_v35 = vpop.permute.xlu0 %1246 }
 0x4d3   : > { %v1251_v3 = vsel %vm4061_vm1, %v1245_v54, %v1247_v35  ;;  %v1252_v53 = vsel %vm4061_vm1, %v1247_v35, %v1249_v55  ;;  %v4111_v54 = vmov 1  }
 0x4d4   : > { %v1255_v2 = vadd.f32 %v1251_v3, %v1220_v16  ;;  %v1256_v23 = vadd.f32 %v1252_v53, %v1221_v57 }
 0x51b   : > { %v1272_v40 = vpop.permute.xlu2 %1271 }
 0x523   : > { %v1294_v16 = vpop.permute.xlu2 %1293 }
 0x533   : > { %v1270_v25 = vpop.permute.xlu1 %1269 }
 0x534   : > { %v1275_v19 = vsel %vm4046_vm15, %v1270_v25, %v1272_v40  ;;  %v1268_v1 = vpop.permute.xlu0 %1267 }
 0x535   : > { %v1279_v15 = vadd.f32 %v1275_v19, %v1256_v23  ;;  %v1274_v10 = vsel %vm4046_vm15, %v1268_v1, %v1270_v25  ;;  %vm1319_vm15 = vcmask 556032  }
 0x536   : > { %v1278_v38 = vadd.f32 %v1274_v10, %v1255_v2  ;;  %v4113_v10 = vmov 2  }
 0x53b   : > { %v3435_v44 = vpop.permute.xlu1 %1282 }
 0x53c   : > { %v1291_v14 = vmul.f32 %v3435_v44, %v2984_v62  ;;  %v3439_v5 = vpop.permute.xlu0 %1280 }
 0x53d   : > { %v3443_v57 = vsel %vm1284_vm0, %v3439_v5, %v3435_v44  ;;  %v1289_v37 = vmul.f32 %v3439_v5, %v2997_v41  ;;  %vm4060_vm0 = vcmask 498688  }
 0x53e   : > { %v1290_v39 = vmul.f32 %v3443_v57, %v2994_v26  ;;  %v1298_v32 = vmul.f32 %v1294_v16, %v1291_v14  ;;  %v4115_v14 = vmov 5  }
 0x53f   : > { %v1296_v8 = vmul.f32 %v1294_v16, %v1289_v37  ;;  %v4116_v37 = vmov 6  }
 0x540   : > { %v1297_v0 = vmul.f32 %v1294_v16, %v1290_v39  ;;  %1306 = vrot.lane.b32.xlu2 %v1298_v32, %s4047_s29  ;;  %v4114_v16 = vmov 4   ;;  %v4117_v39 = vmov 7   ;;  %v4118_v32 = vmov 8  }
 0x541   : > { %1302 = vrot.lane.b32.xlu0 %v1296_v8, %s4047_s29  ;;  %v4119_v8 = vmov 9  }
 0x542   : > { %1304 = vrot.lane.b32.xlu1 %v1297_v0, %s4047_s29  ;;  %v4121_v0 = vmov 11   ;;  %s4162_s29 = smov 80  }
 0x548   : > { %1328 = vperm.xlu2 %2361, %v3332_v46  }
 0x549   : > { %1315 = vrot.lane.b32.xlu0 %v2802_v13, %s2610_s23 }
 0x54a   : > { %1317 = vrot.lane.b32.xlu1 %v2830_v21, %s2610_s23  ;;  %s2611_s23 = smov 60  }
 0x550   : > { %2363 = vset.pattern.permute.xlu2 %v4111_v54 }
 0x59a   : > { %v1307_v51 = vpop.permute.xlu2 %1306 }
 0x5a2   : > { %v1329_v13 = vpop.permute.xlu2 %1328 }
 0x5b3   : > { %v1303_v48 = vpop.permute.xlu0 %1302 }
 0x5b4   : > { %v1305_v56 = vpop.permute.xlu1 %1304 }
 0x5b5   : > { %v1309_v27 = vsel %vm4060_vm0, %v1303_v48, %v1305_v56  ;;  %v1310_v35 = vsel %vm4060_vm0, %v1305_v56, %v1307_v51  ;;  %v4123_v51 = vmov 13   ;;  %v4124_v48 = vmov 14  }
 0x5b6   : > { %v3458_v3 = vadd.f32 %v1309_v27, %v1278_v38  ;;  %v3460_v2 = vadd.f32 %v1310_v35, %v1279_v15  ;;  %v4112_v15 = vmov 3   ;;  %v3493_v38 = vld [vmem:[%s3949_s8] sm:$0xf]  ;;  %v4125_v56 = vmov 15  }
 0x5b7   : > { %v4126_v27 = vmov 16   ;;  %v4127_v35 = vmov 17  }
 0x5bb   : > { %v3462_v46 = vpop.permute.xlu0 %1315 }
 0x5bc   : > { %v1324_v21 = vmul.f32 %v3462_v46, %v2997_v41  ;;  %v3466_v55 = vpop.permute.xlu1 %1317  ;;  %v1350_v41 = vld [vmem:[%s3946_s5] sm:$0x3] }
 0x5bd   : > { %v3470_v53 = vsel %vm1319_vm15, %v3462_v46, %v3466_v55  ;;  %v1326_v23 = vmul.f32 %v3466_v55, %v2984_v62  ;;  %v1398_v62 = vld [vmem:[%s3947_s6] sm:$0xf]  ;;  %vm4059_vm15 = vcmask 490496  }
 0x5be   : > { %v1325_v40 = vmul.f32 %v3470_v53, %v2994_v26  ;;  %v1331_v25 = vmul.f32 %v1329_v13, %v1324_v21  ;;  %v1440_v26 = vld [vmem:[%s3948_s7] sm:$0xf] }
 0x5bf   : > { %v1333_v19 = vmul.f32 %v1329_v13, %v1326_v23 }
 0x5c0   : > { %v1332_v1 = vmul.f32 %v1329_v13, %v1325_v40  ;;  %1337 = vrot.lane.b32.xlu0 %v1331_v25, %s2611_s23  ;;  %v4128_v13 = vmov 18  }
 0x5c1   : > { %1341 = vrot.lane.b32.xlu2 %v1333_v19, %s2611_s23 }
 0x5c2   : > { %1339 = vrot.lane.b32.xlu1 %v1332_v1, %s2611_s23 }
 0x5c8   : > { %1353 = vperm.xlu0 %2354, %v1350_v41  }
 0x5c9   : > { %1411 = vperm.xlu2 %2363, %v1398_v62  }
 0x5ca   : > { %1401 = vperm.xlu1 %2362, %v1398_v62  }
 0x5d0   : > { %1443 = vperm.xlu0 %2354, %v1440_v26  }
 0x5d1   : > { %2365 = vset.pattern.permute.xlu2 %v4112_v15 }
 0x5d2   : > { %2364 = vset.pattern.permute.xlu1 %v4113_v10  ;;  %1431 = vperm.xlu2 %2365, %v1398_v62  }
 0x5d3   : > { %1421 = vperm.xlu1 %2364, %v1398_v62  }
 0x5d8   : > { %1465 = vperm.xlu0 %2354, %v3493_v38  }
 0x5da   : > { %2367 = vset.pattern.permute.xlu2 %v4113_v10 }
 0x5db   : > { %1498 = vperm.xlu2 %2367, %v3493_v38   ;;  %2366 = vset.pattern.permute.xlu1 %v4111_v54  ;;  %v4122_v54 = vmov 12  }
 0x5dc   : > { %1476 = vperm.xlu1 %2366, %v3493_v38  }
 0x5e0   : > { %2368 = vset.pattern.permute.xlu0 %v4112_v15 }
 0x5e1   : > { %1523 = vperm.xlu0 %2368, %v3493_v38  }
 0x5e3   : > { %2369 = vset.pattern.permute.xlu2 %v4114_v16 }
 0x5e4   : > { %1548 = vperm.xlu2 %2369, %v3493_v38   ;;  %2386 = vset.pattern.permute.xlu1 %v2601_v43  ;;  %v4120_v43 = vmov 10  }
 0x5e9   : > { %2370 = vset.pattern.permute.xlu0 %v4115_v14 }
 0x5ea   : > { %1573 = vperm.xlu0 %2370, %v3493_v38  }
 0x5ec   : > { %2371 = vset.pattern.permute.xlu2 %v4116_v37 }
 0x5ed   : > { %1598 = vperm.xlu2 %2371, %v3493_v38  }
 0x5f2   : > { %2372 = vset.pattern.permute.xlu0 %v4117_v39 }
 0x5f3   : > { %1620 = vperm.xlu0 %2372, %v3493_v38  }
 0x5f5   : > { %2373 = vset.pattern.permute.xlu2 %v4118_v32 }
 0x5f6   : > { %1645 = vperm.xlu2 %2373, %v3493_v38  }
 0x5fb   : > { %2374 = vset.pattern.permute.xlu0 %v4119_v8 }
 0x5fc   : > { %1670 = vperm.xlu0 %2374, %v3493_v38  }
 0x5fe   : > { %2375 = vset.pattern.permute.xlu2 %v4120_v43 }
 0x5ff   : > { %1695 = vperm.xlu2 %2375, %v3493_v38  }
 0x604   : > { %2376 = vset.pattern.permute.xlu0 %v4121_v0 }
 0x605   : > { %1720 = vperm.xlu0 %2376, %v3493_v38  }
 0x607   : > { %2377 = vset.pattern.permute.xlu2 %v4122_v54 }
 0x608   : > { %1742 = vperm.xlu2 %2377, %v3493_v38  }
 0x60d   : > { %2378 = vset.pattern.permute.xlu0 %v4123_v51 }
 0x60e   : > { %1767 = vperm.xlu0 %2378, %v3493_v38  }
 0x610   : > { %2379 = vset.pattern.permute.xlu2 %v4124_v48 }
 0x611   : > { %1792 = vperm.xlu2 %2379, %v3493_v38  }
 0x616   : > { %2380 = vset.pattern.permute.xlu0 %v4125_v56 }
 0x617   : > { %1817 = vperm.xlu0 %2380, %v3493_v38  }
 0x619   : > { %2381 = vset.pattern.permute.xlu2 %v4126_v27 }
 0x61a   : > { %1842 = vperm.xlu2 %2381, %v3493_v38  }
 0x61b   : > { %v1342_v40 = vpop.permute.xlu2 %1341 }
 0x61f   : > { %2382 = vset.pattern.permute.xlu0 %v4127_v35 }
 0x622   : > { %2383 = vset.pattern.permute.xlu2 %v4128_v13 }
 0x623   : > { %v1412_v13 = vpop.permute.xlu2 %1411 }
 0x62c   : > { %v1432_v36 = vpop.permute.xlu2 %1431 }
 0x632   : > { %v1338_v21 = vpop.permute.xlu0 %1337 }
 0x634   : > { %v1340_v23 = vpop.permute.xlu1 %1339 }
 0x635   : > { %v1344_v25 = vsel %vm4059_vm15, %v1338_v21, %v1340_v23  ;;  %v1345_v19 = vsel %vm4059_vm15, %v1340_v23, %v1342_v40 }
 0x636   : > { %v1348_v1 = vadd.f32 %v1344_v25, %v3458_v3  ;;  %v1349_v41 = vadd.f32 %v1345_v19, %v3460_v2 }
 0x63a   : > { %v1354_v62 = vpop.permute.xlu0 %1353 }
 0x63b   : > { %v1356_v26 = vadd.f32 %v1354_v62, %v1348_v1  ;;  %v1357_v15 = vadd.f32 %v1354_v62, %v1349_v41  ;;  %v4129_v62 = vld [vmem:[#allocation25_spill] sm:$0xff] }
 0x63c   : > { %v1402_v48 = vpop.permute.xlu1 %1401 }
 0x63d   : > { %v2195_v10 = vmul.f32 -1.442695, %v1356_v26  ;;  %v2196_v16 = vmul.f32 -1.442695, %v1357_v15 }
 0x63f   : > { %2400 = vpow2.f32 %v2195_v10  ;;  %v1404_v10 = vperm.slane %v4129_v62, 0 }
 0x640   : > { %2402 = vpow2.f32 %v2196_v16 }
 0x645   : > { %v2401_v14 = vpop.eup %2400 }
 0x646   : > { %v2403_v37 = vpop.eup %2402  ;;  %v1364_v39 = vadd.f32 1.0, %v2401_v14 }
 0x647   : > { %v1365_v32 = vadd.f32 1.0, %v2403_v37  ;;  %v4130_v37 = vld [vmem:[#allocation26_spill] sm:$0xff] }
 0x648   : > { %2404 = vrcp.f32 %v1364_v39  ;;  %v1377_v51 = vand.u32 2147483648, %v1364_v39  ;;  %v1375_v27 = vand.u32 2147483647, %v1364_v39  ;;  %vm1371_vm1 = vweird.f32 %v1364_v39 }
 0x649   : > { %2406 = vrcp.f32 %v1365_v32  ;;  %v1392_v35 = vand.u32 2147483648, %v1365_v32  ;;  %v1390_v23 = vand.u32 2147483647, %v1365_v32  ;;  %vm1386_vm4 = vweird.f32 %v1365_v32 }
 0x64a   : > { %v1378_v25 = vor.u32 1.1754944e-38, %v1377_v51  ;;  %vm1376_vm3 = vcmp.eq.f32.partialorder %v1375_v27, 8.507059e+37  ;;  %v1415_v51 = vperm.slane %v4130_v37, 1 }
 0x64b   : > { %v1393_v41 = vor.u32 1.1754944e-38, %v1392_v35  ;;  %vm1391_vm12 = vcmp.eq.f32.partialorder %v1390_v23, 8.507059e+37 }
 0x64e   : > { %v2405_v8 = vpop.eup %2404 }
 0x64f   : > { %v2407_v43 = vpop.eup %2406  ;;  %v1367_v0 = vmul.f32 %v2405_v8, %v1364_v39  ;;  %vm1372_vm15 = vweird.f32 %v2405_v8  ;;  %v1406_v39 = vmul.f32 %v1404_v10, %v1402_v48 }
 0x650   : > { %v1382_v54 = vmul.f32 %v2407_v43, %v1365_v32  ;;  %vm1387_vm0 = vweird.f32 %v2407_v43  ;;  %vm1373_vm5 = vmor %vm1371_vm1, %vm1372_vm15 }
 0x651   : > { %v1368_v3 = vsub.f32 1.0, %v1367_v0  ;;  %vm1388_vm14 = vmor %vm1386_vm4, %vm1387_vm0  ;;  %v1405_v0 = vperm.slane %v4130_v37, 0  ;;  %vm4188_vm0 = vcmask 654336  }
 0x652   : > { %v1383_v2 = vsub.f32 1.0, %v1382_v54  ;;  %v1414_v54 = vperm.slane %v4129_v62, 1  ;;  %vm4189_vm15 = vmmov %vm4188_vm0 }
 0x653   : > { %v1369_v56 = vmul.f32 %v2405_v8, %v1368_v3  ;;  %v1407_v32 = vmul.f32 %v1405_v0, %v1402_v48 }
 0x654   : > { %v1384_v21 = vmul.f32 %v2407_v43, %v1383_v2  ;;  %v1416_v27 = vmul.f32 %v1414_v54, %v1412_v13 }
 0x655   : > { %v1370_v40 = vadd.f32 %v2405_v8, %v1369_v56 }
 0x656   : > { %v1385_v19 = vadd.f32 %v2407_v43, %v1384_v21  ;;  %v1418_v23 = vadd.f32 %v1416_v27, %v1406_v39 }
 0x657   : > { %v1374_v1 = vsel %vm1373_vm5, %v2405_v8, %v1370_v40  ;;  %v1422_v8 = vpop.permute.xlu1 %1421  ;;  %v1417_v40 = vmul.f32 %v1415_v51, %v1412_v13  ;;  %v3541_v13 = vld [vmem:[%s2766_s15] sm:$0xff]  ;;  %vm4186_vm5 = vcmask 752640  }
 0x658   : > { %v1379_v16 = vsel %vm1376_vm3, %v1378_v25, %v1374_v1  ;;  %v1389_v14 = vsel %vm1388_vm14, %v2407_v43, %v1385_v19  ;;  %vm4182_vm14 = vcmask 777216   ;;  %vm4184_vm3 = vcmask 760832   ;;  %vm4187_vm1 = vmmov %vm4186_vm5 }
 0x659   : > { %v1394_v3 = vsel %vm1391_vm12, %v1393_v41, %v1389_v14  ;;  %v1396_v2 = vmul.f32 %v1379_v16, %v1356_v26  ;;  %v1419_v1 = vadd.f32 %v1417_v40, %v1407_v32  ;;  %v1444_v16 = vpop.permute.xlu0 %1443  ;;  %vm4180_vm12 = vcmask 785408   ;;  %vm4185_vm4 = vmmov %vm4184_vm3 }
 0x65a   : > { %v1397_v56 = vmul.f32 %v1394_v3, %v1357_v15  ;;  %v3546_v3 = vld [vmem:[%s2766_s15 + $0x8] sm:$0xff]  ;;  %s4132_s15 = smov 124  }
 0x65b   : > { %v1434_v21 = vperm.slane %v1396_v2, 1  ;;  %v1424_v35 = vperm.slane %v1396_v2, 0 }
 0x65c   : > { %v1435_v25 = vperm.slane %v1397_v56, 1  ;;  %v1425_v43 = vperm.slane %v1397_v56, 0 }
 0x65d   : > { %v1426_v19 = vmul.f32 %v1424_v35, %v1422_v8  ;;  %v1436_v26 = vmul.f32 %v1434_v21, %v1432_v36 }
 0x65e   : > { %v1427_v41 = vmul.f32 %v1425_v43, %v1422_v8  ;;  %v1437_v10 = vmul.f32 %v1435_v25, %v1432_v36  ;;  %v1499_v36 = vpop.permute.xlu2 %1498 }
 0x65f   : > { %v1428_v62 = vadd.f32 %v1426_v19, %v1418_v23 }
 0x660   : > { %v1429_v15 = vadd.f32 %v1427_v41, %v1419_v1  ;;  %v1477_v1 = vpop.permute.xlu1 %1476 }
 0x661   : > { %v1438_v48 = vadd.f32 %v1436_v26, %v1428_v62  ;;  %v3567_v35 = vpop.permute.xlu0 %1465 }
 0x662   : > { %v1439_v14 = vadd.f32 %v1437_v10, %v1429_v15 }
 0x663   : > { %v1446_v37 = vadd.f32 %v1444_v16, %v1438_v48 }
 0x664   : > { %v1447_v0 = vadd.f32 %v1444_v16, %v1439_v14 }
 0x665   : > { %1450 = vrot.lane.b32.xlu1 %v1446_v37, %s2576_s21  ;;  %v2065_v54 = vadd.f32 %v3541_v13, %v1446_v37 }
 0x666   : > { %1452 = vrot.lane.b32.xlu2 %v1447_v0, %s2576_s21  ;;  %v2066_v2 = vadd.f32 %v3546_v3, %v1447_v0  ;;  %v3555_v39 = vpop.permute.xlu2 %1548  ;;  %s4133_s21 = smov 111  }
 0x667   : > { %2067 = vst [vmem:[%s3551_s24] sm:$0xf] %v2065_v54 }
 0x668   : > { %2068 = vst [vmem:[%s3551_s24 + $0x8] sm:$0xf] %v2066_v2 }
 0x669   : > { %v1524_v23 = vpop.permute.xlu0 %1523 }
 0x66e   : > { %v3557_v51 = vpop.permute.xlu2 %1598 }
 0x671   : > { %v3574_v19 = vpop.permute.xlu0 %1573 }
 0x676   : > { %v3559_v56 = vpop.permute.xlu2 %1645 }
 0x679   : > { %v1621_v26 = vpop.permute.xlu0 %1620 }
 0x67e   : > { %v3561_v32 = vpop.permute.xlu2 %1695 }
 0x686   : > { %v1743_v8 = vpop.permute.xlu2 %1742 }
 0x68e   : > { %v3563_v27 = vpop.permute.xlu2 %1792 }
 0x696   : > { %v3565_v21 = vpop.permute.xlu2 %1842 }
 0x6c0   : > { %v1453_v40 = vpop.permute.xlu2 %1452 }
 0x6c1   : > { %v3570_v25 = vsel %vm531_vm8, %v1453_v40, 0.0 }
 0x6c2   : > { %v1503_v43 = vmul.f32 %v1499_v36, %v3570_v25  ;;  %v1747_v37 = vmul.f32 %v1743_v8, %v3570_v25 }
 0x6c4   : > { %1511 = vrot.lane.b32.xlu2 %v1503_v43, %s2577_s22  ;;  %v1625_v43 = vmul.f32 %v1621_v26, %v3570_v25 }
 0x6d7   : > { %v1451_v41 = vpop.permute.xlu1 %1450 }
 0x6d8   : > { %v3577_v62 = vsel %vm531_vm8, %v1451_v41, %v1453_v40  ;;  %v3580_v10 = vsel %vm531_vm8, 0.0, %v1451_v41  ;;  %vm4174_vm8 = vcmask 908288  }
 0x6d9   : > { %v1501_v15 = vmul.f32 %v1499_v36, %v3580_v10  ;;  %v1624_v48 = vmul.f32 %v1621_v26, %v3577_v62  ;;  %v1502_v16 = vmul.f32 %v1499_v36, %v3577_v62  ;;  %v1745_v14 = vmul.f32 %v1743_v8, %v3580_v10 }
 0x6da   : > { %v1623_v0 = vmul.f32 %v1621_v26, %v3580_v10  ;;  %v1472_v54 = vmul.f32 %v3580_v10, %v2905_v47  ;;  %v1473_v2 = vmul.f32 %v3577_v62, %v3016_v52  ;;  %v1520_v41 = vmul.f32 %v3577_v62, %v3079_v49 }
 0x6db   : > { %1507 = vrot.lane.b32.xlu0 %v1501_v15, %s2577_s22  ;;  %1631 = vrot.lane.b32.xlu2 %v1624_v48, %s2578_s25  ;;  %v1544_v15 = vmul.f32 %v3580_v10, %v2877_v31  ;;  %v1746_v52 = vmul.f32 %v1743_v8, %v3577_v62  ;;  %v1546_v26 = vmul.f32 %v3570_v25, %v2951_v6 }
 0x6dc   : > { %1509 = vrot.lane.b32.xlu1 %v1502_v16, %s2577_s22  ;;  %v1479_v36 = vmul.f32 %v1477_v1, %v1472_v54  ;;  %v1480_v40 = vmul.f32 %v1477_v1, %v1473_v2  ;;  %v1527_v47 = vmul.f32 %v1524_v23, %v1520_v41  ;;  %v1594_v49 = vmul.f32 %v3580_v10, %v2881_v33  ;;  %s4135_s22 = smov 112   ;;  %v4137_v2 = vld [vmem:[#allocation31_spill] sm:$0xff] }
 0x6dd   : > { %v1551_v48 = vmul.f32 %v3555_v39, %v1544_v15  ;;  %v1474_v31 = vmul.f32 %v3570_v25, %v2866_v28  ;;  %v1553_v16 = vmul.f32 %v3555_v39, %v1546_v26  ;;  %v1570_v6 = vmul.f32 %v3577_v62, %v3119_v11  ;;  %v4142_v26 = vld [vmem:[#allocation21_spill] sm:$0xff] }
 0x6de   : > { %v1641_v33 = vmul.f32 %v3580_v10, %v2937_v61  ;;  %v1596_v11 = vmul.f32 %v3570_v25, %v4137_v2 }
 0x6df   : > { %v1481_v8 = vmul.f32 %v1477_v1, %v1474_v31  ;;  %v4143_v31 = vld [vmem:[#allocation38_spill] sm:$0xff] }
 0x6e0   : > { %v1648_v54 = vmul.f32 %v3559_v56, %v1641_v33  ;;  %v1603_v41 = vmul.f32 %v3557_v51, %v1596_v11 }
 0x6e3   : > { %1751 = vrot.lane.b32.xlu0 %v1745_v14, %s2579_s18  ;;  %1755 = vrot.lane.b32.xlu2 %v1747_v37, %s2579_s18  ;;  %v1601_v14 = vmul.f32 %v3557_v51, %v1594_v49  ;;  %v4134_v37 = vld [vmem:[#allocation14_spill] sm:$0xff]  ;;  %v1788_v49 = vmul.f32 %v3580_v10, %v4142_v26  ;;  %v4153_v26 = vld [vmem:[#allocation41_spill] sm:$0xff] }
 0x6e4   : > { %1629 = vrot.lane.b32.xlu1 %v1623_v0, %s2578_s25  ;;  %v1519_v28 = vmul.f32 %v3580_v10, %v4134_v37  ;;  %v1577_v0 = vmul.f32 %v3574_v19, %v1570_v6  ;;  %v4145_v6 = vld [vmem:[#allocation37_spill] sm:$0xff]  ;;  %v4146_v37 = vld [vmem:[#allocation23_spill] sm:$0xff] }
 0x6e5   : > { %v1667_v33 = vmul.f32 %v3577_v62, %v4145_v6 }
 0x6e6   : > { %v1526_v1 = vmul.f32 %v1524_v23, %v1519_v28  ;;  %v1838_v28 = vmul.f32 %v3580_v10, %v4146_v37 }
 0x6e8   : > { %v1845_v11 = vmul.f32 %v3565_v21, %v1838_v28 }
 0x6eb   : > { %1485 = vrot.lane.b32.xlu2 %v1479_v36, %s2581_s27  ;;  %1487 = vrot.lane.b32.xlu0 %v1480_v40, %s2581_s27  ;;  %v4138_v36 = vld [vmem:[#allocation28_spill] sm:$0xff] }
 0x6ec   : > { %1633 = vrot.lane.b32.xlu1 %v1625_v43, %s2578_s25  ;;  %s4136_s25 = smov 109   ;;  %v1691_v61 = vmul.f32 %v3580_v10, %v4138_v36  ;;  %v4139_v40 = vld [vmem:[#allocation24_spill] sm:$0xff]  ;;  %v4150_v36 = vld [vmem:[#allocation18_spill] sm:$0xff] }
 0x6ed   : > { %v1521_v43 = vmul.f32 %v3570_v25, %v4139_v40  ;;  %v4151_v40 = vld [vmem:[#allocation29_spill] sm:$0xff] }
 0x6ee   : > { %v1698_v15 = vmul.f32 %v3561_v32, %v1691_v61  ;;  %v1693_v61 = vmul.f32 %v3570_v25, %v4150_v36 }
 0x6f3   : > { %1534 = vrot.lane.b32.xlu2 %v1527_v47, %s4131_s26  ;;  %1557 = vrot.lane.b32.xlu0 %v1551_v48, %s4132_s15  ;;  %v1528_v47 = vmul.f32 %v1524_v23, %v1521_v43  ;;  %v4141_v48 = vld [vmem:[#allocation16_spill] sm:$0xff]  ;;  %v1571_v43 = vmul.f32 %v3570_v25, %v4151_v40 }
 0x6f4   : > { %1753 = vrot.lane.b32.xlu1 %v1746_v52, %s2579_s18  ;;  %s4140_s18 = smov 96   ;;  %v1643_v52 = vmul.f32 %v3570_v25, %v4141_v48 }
 0x6fb   : > { %1561 = vrot.lane.b32.xlu2 %v1553_v16, %s4132_s15  ;;  %1607 = vrot.lane.b32.xlu0 %v1601_v14, %s4133_s21  ;;  %v1545_v16 = vmul.f32 %v3577_v62, %v4143_v31  ;;  %v1650_v14 = vmul.f32 %v3559_v56, %v1643_v52 }
 0x6fc   : > { %1489 = vrot.lane.b32.xlu1 %v1481_v8, %s2581_s27  ;;  %v1795_v8 = vmul.f32 %v3563_v27, %v1788_v49  ;;  %s4144_s27 = smov 92   ;;  %v1595_v49 = vmul.f32 %v3577_v62, %v4153_v26 }
 0x6fd   : > { %v1552_v23 = vmul.f32 %v3555_v39, %v1545_v16 }
 0x6fe   : > { %v1602_v16 = vmul.f32 %v3557_v51, %v1595_v49  ;;  %v4158_v51 = vld [vmem:[#allocation33_spill] sm:$0xff] }
 0x6ff   : > { %v1790_v28 = vmul.f32 %v3570_v25, %v4158_v51  ;;  %v4165_v51 = vld [vmem:[#allocation19_spill] sm:$0xff] }
 0x703   : > { %1584 = vrot.lane.b32.xlu2 %v1577_v0, %s4135_s22  ;;  %1654 = vrot.lane.b32.xlu0 %v1648_v54, %s4136_s25  ;;  %v4147_v0 = vld [vmem:[#allocation15_spill] sm:$0xff] }
 0x704   : > { %1532 = vrot.lane.b32.xlu1 %v1526_v1, %s4131_s26  ;;  %v1569_v54 = vmul.f32 %v3580_v10, %v4147_v0  ;;  %v1671_v1 = vpop.permute.xlu0 %1670 }
 0x705   : > { %v1674_v2 = vmul.f32 %v1671_v1, %v1667_v33 }
 0x706   : > { %v1576_v39 = vmul.f32 %v3574_v19, %v1569_v54  ;;  %v1797_v54 = vmul.f32 %v3563_v27, %v1790_v28 }
 0x70b   : > { %1611 = vrot.lane.b32.xlu2 %v1603_v41, %s4133_s21  ;;  %1704 = vrot.lane.b32.xlu0 %v1698_v15, %s4140_s18  ;;  %v1700_v41 = vmul.f32 %v3561_v32, %v1693_v61  ;;  %v1578_v15 = vmul.f32 %v3574_v19, %v1571_v43  ;;  %v4155_v19 = vld [vmem:[#allocation42_spill] sm:$0xff] }
 0x70c   : > { %1536 = vrot.lane.b32.xlu1 %v1528_v47, %s4131_s26  ;;  %v4152_v47 = vld [vmem:[#allocation40_spill] sm:$0xff]  ;;  %v1721_v52 = vpop.permute.xlu0 %1720  ;;  %s4171_s26 = smov 78  }
 0x70d   : > { %v1717_v48 = vmul.f32 %v3577_v62, %v4152_v47 }
 0x70f   : > { %v1724_v31 = vmul.f32 %v1721_v52, %v1717_v48 }
 0x713   : > { %1658 = vrot.lane.b32.xlu2 %v1650_v14, %s4136_s25  ;;  %1801 = vrot.lane.b32.xlu0 %v1795_v8, %s4144_s27  ;;  %v1764_v14 = vmul.f32 %v3577_v62, %v4155_v19  ;;  %v4156_v8 = vld [vmem:[#allocation36_spill] sm:$0xff] }
 0x714   : > { %1559 = vrot.lane.b32.xlu1 %v1552_v23, %s4132_s15  ;;  %v1642_v23 = vmul.f32 %v3577_v62, %v4156_v8  ;;  %v1768_v6 = vpop.permute.xlu0 %1767  ;;  %s4190_s15 = smov 77  }
 0x715   : > { %v1771_v33 = vmul.f32 %v1768_v6, %v1764_v14 }
 0x716   : > { %v1649_v37 = vmul.f32 %v3559_v56, %v1642_v23 }
 0x71b   : > { %1681 = vrot.lane.b32.xlu2 %v1674_v2, %s4148_s30  ;;  %1851 = vrot.lane.b32.xlu0 %v1845_v11, %s4149_s28  ;;  %v4160_v11 = vld [vmem:[#allocation44_spill] sm:$0xff] }
 0x71c   : > { %1582 = vrot.lane.b32.xlu1 %v1576_v39, %s4135_s22  ;;  %v1814_v56 = vmul.f32 %v3577_v62, %v4160_v11  ;;  %v4161_v39 = vld [vmem:[#allocation17_spill] sm:$0xff]  ;;  %v3702_v61 = vpop.permute.xlu0 %1817 }
 0x71d   : > { %v1668_v36 = vmul.f32 %v3570_v25, %v4161_v39 }
 0x71e   : > { %v1512_v40 = vpop.permute.xlu2 %1511  ;;  %v1821_v43 = vmul.f32 %v3702_v61, %v1814_v56 }
 0x723   : > { %1708 = vrot.lane.b32.xlu2 %v1700_v41, %s4140_s18  ;;  %1864 = vperm.xlu0 %2382, %v3493_v38   ;;  %v1675_v41 = vmul.f32 %v1671_v1, %v1668_v36  ;;  %v4166_v36 = vld [vmem:[#allocation20_spill] sm:$0xff] }
 0x724   : > { %1586 = vrot.lane.b32.xlu1 %v1578_v15, %s4135_s22  ;;  %v4163_v15 = vld [vmem:[#allocation39_spill] sm:$0xff]  ;;  %s4198_s22 = smov 64  }
 0x725   : > { %v1692_v47 = vmul.f32 %v3577_v62, %v4163_v15 }
 0x727   : > { %v1699_v26 = vmul.f32 %v3561_v32, %v1692_v47  ;;  %v1718_v32 = vmul.f32 %v3570_v25, %v4165_v51  ;;  %v4168_v51 = vld [vmem:[#allocation43_spill] sm:$0xff] }
 0x72b   : > { %1731 = vrot.lane.b32.xlu2 %v1724_v31, %s4154_s1  ;;  %2385 = vset.pattern.permute.xlu0 %v2598_v29  ;;  %v4159_v29 = vld [vmem:[#allocation27_spill] sm:$0xff] }
 0x72c   : > { %1609 = vrot.lane.b32.xlu1 %v1602_v16, %s4133_s21  ;;  %v1666_v0 = vmul.f32 %v3580_v10, %v4159_v29  ;;  %v4164_v16 = vld [vmem:[#allocation30_spill] sm:$0xff]  ;;  %v1460_v29 = vmul.f32 %v3580_v10, %v2815_v18  ;;  %s4192_s21 = smov 76  }
 0x72d   : > { %v1716_v19 = vmul.f32 %v3580_v10, %v4164_v16 }
 0x72e   : > { %v1673_v2 = vmul.f32 %v1671_v1, %v1666_v0  ;;  %v1725_v0 = vmul.f32 %v1721_v52, %v1718_v32  ;;  %v1789_v32 = vmul.f32 %v3577_v62, %v4168_v51 }
 0x72f   : > { %v1723_v8 = vmul.f32 %v1721_v52, %v1716_v19 }
 0x733   : > { %1778 = vrot.lane.b32.xlu2 %v1771_v33, %s4157_s19 }
 0x734   : > { %1656 = vrot.lane.b32.xlu1 %v1649_v37, %s4136_s25  ;;  %s4200_s25 = smov 63  }
 0x735   : > { %v1632_v48 = vpop.permute.xlu2 %1631 }
 0x73b   : > { %1805 = vrot.lane.b32.xlu2 %v1797_v54, %s4144_s27 }
 0x73c   : > { %1679 = vrot.lane.b32.xlu1 %v1673_v2, %s4148_s30  ;;  %v1468_v2 = vmul.f32 %v3567_v35, %v1460_v29 }
 0x73d   : > { %v1756_v23 = vpop.permute.xlu2 %1755 }
 0x743   : > { %1828 = vrot.lane.b32.xlu2 %v1821_v43, %s4162_s29 }
 0x744   : > { %1683 = vrot.lane.b32.xlu1 %v1675_v41, %s4148_s30 }
 0x745   : > { %v1486_v54 = vpop.permute.xlu2 %1485 }
 0x74c   : > { %1706 = vrot.lane.b32.xlu1 %v1699_v26, %s4140_s18  ;;  %v4167_v26 = vld [vmem:[#allocation32_spill] sm:$0xff]  ;;  %s4201_s18 = smov 62  }
 0x74d   : > { %v1508_v49 = vpop.permute.xlu0 %1507 }
 0x74e   : > { %v1510_v31 = vpop.permute.xlu1 %1509 }
 0x74f   : > { %v1513_v14 = vsel %vm612_vm7, %v1508_v49, %v1510_v31  ;;  %v1514_v1 = vsel %vm612_vm7, %v1510_v31, %v1512_v40  ;;  %v1763_v40 = vmul.f32 %v3580_v10, %v4166_v36  ;;  %v1765_v49 = vmul.f32 %v3570_v25, %v4167_v26 }
 0x750   : > { %vm4176_vm7 = vcmask 891904  }
 0x751   : > { %v1770_v47 = vmul.f32 %v1768_v6, %v1763_v40  ;;  %v1772_v19 = vmul.f32 %v1768_v6, %v1765_v49  ;;  %v4170_v40 = vld [vmem:[#allocation34_spill] sm:$0xff] }
 0x754   : > { %1729 = vrot.lane.b32.xlu1 %v1723_v8, %s4154_s1 }
 0x755   : > { %v1752_v33 = vpop.permute.xlu0 %1751 }
 0x756   : > { %v1630_v37 = vpop.permute.xlu1 %1629 }
 0x757   : > { %v3719_v28 = vsel %vm785_vm13, %v1630_v37, %v1632_v48 }
 0x75c   : > { %1733 = vrot.lane.b32.xlu1 %v1725_v0, %s4154_s1  ;;  %v1796_v0 = vmul.f32 %v3563_v27, %v1789_v32  ;;  %v1815_v27 = vmul.f32 %v3570_v25, %v4170_v40 }
 0x75d   : > { %v1488_v11 = vpop.permute.xlu0 %1487 }
 0x75e   : > { %v1634_v56 = vpop.permute.xlu1 %1633  ;;  %v1491_v39 = vsel %vm589_vm6, %v1486_v54, %v1488_v11  ;;  %v1535_v54 = vpop.permute.xlu2 %1534 }
 0x75f   : > { %v3729_v43 = vsel %vm785_vm13, %v1632_v48, %v1634_v56  ;;  %v1495_v41 = vadd.f32 %v1491_v39, %v1468_v2  ;;  %v1461_v48 = vmul.f32 %v3577_v62, %v2836_v22  ;;  %v4169_v2 = vld [vmem:[#allocation22_spill] sm:$0xff]  ;;  %vm4181_vm13 = vmmov %vm4180_vm12 }
 0x760   : > { %v1813_v56 = vmul.f32 %v3580_v10, %v4169_v2 }
 0x761   : > { %v1517_v15 = vadd.f32 %v1513_v14, %v1495_v41  ;;  %v1469_v37 = vmul.f32 %v3567_v35, %v1461_v48 }
 0x762   : > { %v1820_v36 = vmul.f32 %v3702_v61, %v1813_v56 }
 0x764   : > { %1776 = vrot.lane.b32.xlu1 %v1770_v47, %s4157_s19 }
 0x765   : > { %v1558_v18 = vpop.permute.xlu0 %1557 }
 0x766   : > { %v1754_v52 = vpop.permute.xlu1 %1753  ;;  %v1562_v26 = vpop.permute.xlu2 %1561 }
 0x767   : > { %v3735_v31 = vsel %vm948_vm2, %v1752_v33, %v1754_v52  ;;  %v3738_v16 = vsel %vm948_vm2, %v1754_v52, %v1756_v23  ;;  %v1822_v52 = vmul.f32 %v3702_v61, %v1815_v27  ;;  %vm4183_vm2 = vmmov %vm4182_vm14 }
 0x76c   : > { %1780 = vrot.lane.b32.xlu1 %v1772_v19, %s4157_s19 }
 0x76d   : > { %v1608_v14 = vpop.permute.xlu0 %1607 }
 0x76e   : > { %v1490_v8 = vpop.permute.xlu1 %1489  ;;  %v1585_v32 = vpop.permute.xlu2 %1584 }
 0x76f   : > { %v1492_v29 = vsel %vm589_vm6, %v1488_v11, %v1490_v8  ;;  %vm4175_vm6 = vmmov %vm4174_vm8 }
 0x770   : > { %v1496_v33 = vadd.f32 %v1492_v29, %v1469_v37 }
 0x772   : > { %v1518_v23 = vadd.f32 %v1514_v1, %v1496_v33 }
 0x774   : > { %1803 = vrot.lane.b32.xlu1 %v1796_v0, %s4144_s27  ;;  %s4202_s27 = smov 61  }
 0x775   : > { %v1655_v6 = vpop.permute.xlu0 %1654 }
 0x776   : > { %v1533_v22 = vpop.permute.xlu1 %1532  ;;  %v1612_v56 = vpop.permute.xlu2 %1611 }
 0x777   : > { %v1538_v39 = vsel %vm652_vm9, %v1533_v22, %v1535_v54 }
 0x778   : > { %v1542_v35 = vadd.f32 %v1538_v39, %v1517_v15  ;;  %v4172_v39 = vld [vmem:[#allocation35_spill] sm:$0xff] }
 0x77c   : > { %1826 = vrot.lane.b32.xlu1 %v1820_v36, %s4162_s29  ;;  %v4173_v36 = vld [vmem:[#allocation45_spill] sm:$0xff] }
 0x77d   : > { %v3754_v11 = vpop.permute.xlu0 %1704  ;;  %v1839_v40 = vmul.f32 %v3577_v62, %v4173_v36 }
 0x77e   : > { %v1537_v1 = vpop.permute.xlu1 %1536 }
 0x77f   : > { %v1539_v41 = vsel %vm652_vm9, %v1535_v54, %v1537_v1  ;;  %vm4177_vm9 = vmmov %vm4176_vm7 }
 0x780   : > { %v1543_v47 = vadd.f32 %v1539_v41, %v1518_v23  ;;  %v1846_v41 = vmul.f32 %v3565_v21, %v1839_v40 }
 0x784   : > { %1830 = vrot.lane.b32.xlu1 %v1822_v52, %s4162_s29 }
 0x785   : > { %v3761_v49 = vpop.permute.xlu0 %1801 }
 0x786   : > { %v1560_v15 = vpop.permute.xlu1 %1559 }
 0x787   : > { %v1563_v19 = vsel %vm692_vm10, %v1558_v18, %v1560_v15  ;;  %v1564_v48 = vsel %vm692_vm10, %v1560_v15, %v1562_v26  ;;  %vm4178_vm10 = vcmask 883712  }
 0x788   : > { %v1567_v8 = vadd.f32 %v1563_v19, %v1542_v35  ;;  %v1568_v37 = vadd.f32 %v1564_v48, %v1543_v47  ;;  %v1840_v35 = vmul.f32 %v3570_v25, %v4172_v39 }
 0x78a   : > { %v1847_v1 = vmul.f32 %v3565_v21, %v1840_v35 }
 0x78d   : > { %v3765_v51 = vpop.permute.xlu0 %1851 }
 0x78e   : > { %v1583_v29 = vpop.permute.xlu1 %1582 }
 0x78f   : > { %v1588_v33 = vsel %vm727_vm11, %v1583_v29, %v1585_v32 }
 0x790   : > { %v1592_v0 = vadd.f32 %v1588_v33, %v1567_v8  ;;  %v1659_v8 = vpop.permute.xlu2 %1658 }
 0x795   : > { %v1865_v61 = vpop.permute.xlu0 %1864 }
 0x796   : > { %v1587_v23 = vpop.permute.xlu1 %1586  ;;  %v1867_v54 = vmul.f32 %v1865_v61, %v3580_v10  ;;  %v1868_v22 = vmul.f32 %v1865_v61, %v3577_v62 }
 0x797   : > { %v1589_v2 = vsel %vm727_vm11, %v1585_v32, %v1587_v23  ;;  %vm4179_vm11 = vmmov %vm4178_vm10 }
 0x798   : > { %v1593_v18 = vadd.f32 %v1589_v2, %v1568_v37  ;;  %1875 = vrot.lane.b32.xlu2 %v1868_v22, %s4171_s26  ;;  %1873 = vrot.lane.b32.xlu1 %v1867_v54, %s4171_s26  ;;  %v1869_v37 = vmul.f32 %v1865_v61, %v3570_v25 }
 0x79e   : > { %v1610_v27 = vpop.permute.xlu1 %1609 }
 0x79f   : > { %v1613_v47 = vsel %vm4174_vm8, %v1608_v14, %v1610_v27  ;;  %v1614_v52 = vsel %vm4175_vm6, %v1610_v27, %v1612_v56  ;;  %vm4191_vm8 = vcmask 637952   ;;  %vm4193_vm6 = vcmask 646144  }
 0x7a0   : > { %v1617_v26 = vadd.f32 %v1613_v47, %v1592_v0  ;;  %v1618_v15 = vadd.f32 %v1614_v52, %v1593_v18  ;;  %1855 = vrot.lane.b32.xlu2 %v1847_v1, %s4149_s28  ;;  %1853 = vrot.lane.b32.xlu1 %v1846_v41, %s4149_s28  ;;  %v1682_v0 = vpop.permute.xlu2 %1681 }
 0x7a2   : > { %v1639_v19 = vadd.f32 %v3719_v28, %v1617_v26  ;;  %v1640_v48 = vadd.f32 %v3729_v43, %v1618_v15 }
 0x7a6   : > { %v1657_v32 = vpop.permute.xlu1 %1656 }
 0x7a7   : > { %v1660_v21 = vsel %vm4176_vm7, %v1655_v6, %v1657_v32  ;;  %v1661_v14 = vsel %vm4177_vm9, %v1657_v32, %v1659_v8  ;;  %vm4194_vm7 = vmmov %vm4193_vm6 }
 0x7a8   : > { %v1664_v29 = vadd.f32 %v1660_v21, %v1639_v19  ;;  %v1665_v33 = vadd.f32 %v1661_v14, %v1640_v48  ;;  %1889 = vperm.xlu2 %2383, %v3493_v38   ;;  %1877 = vrot.lane.b32.xlu1 %v1869_v37, %s4171_s26  ;;  %v1709_v22 = vpop.permute.xlu2 %1708  ;;  %vm4196_vm9 = vmmov %vm4191_vm8 }
 0x7ae   : > { %v1680_v23 = vpop.permute.xlu1 %1679 }
 0x7af   : > { %v1685_v28 = vsel %vm4178_vm10, %v1680_v23, %v1682_v0  ;;  %vm4197_vm10 = vcmask 629760  }
 0x7b0   : > { %v1689_v54 = vadd.f32 %v1685_v28, %v1664_v29  ;;  %2384 = vset.pattern.permute.xlu2 %v2595_v30  ;;  %v1732_v30 = vpop.permute.xlu2 %1731 }
 0x7b1   : > { %1914 = vperm.xlu2 %2384, %v3493_v38  }
 0x7b6   : > { %v1684_v43 = vpop.permute.xlu1 %1683 }
 0x7b7   : > { %v1686_v6 = vsel %vm4179_vm11, %v1682_v0, %v1684_v43  ;;  %vm4199_vm11 = vmmov %vm4197_vm10 }
 0x7b8   : > { %v1690_v61 = vadd.f32 %v1686_v6, %v1665_v33  ;;  %v1779_v52 = vpop.permute.xlu2 %1778 }
 0x7b9   : > { %2387 = vset.pattern.permute.xlu2 %v2603_v60 }
 0x7ba   : > { %1986 = vperm.xlu2 %2387, %v3493_v38  }
 0x7be   : > { %v1707_v2 = vpop.permute.xlu1 %1706 }
 0x7bf   : > { %v1710_v18 = vsel %vm4180_vm12, %v3754_v11, %v1707_v2  ;;  %v1711_v56 = vsel %vm4181_vm13, %v1707_v2, %v1709_v22  ;;  %v1885_v22 = vmul.f32 %v3580_v10, %v2979_v59  ;;  %v1887_v59 = vmul.f32 %v3570_v25, %v3312_v63 }
 0x7c0   : > { %v1714_v39 = vadd.f32 %v1710_v18, %v1689_v54  ;;  %v1715_v35 = vadd.f32 %v1711_v56, %v1690_v61  ;;  %v1806_v8 = vpop.permute.xlu2 %1805  ;;  %v1912_v63 = vmul.f32 %v3570_v25, %v3356_v17  ;;  %vm4203_vm12 = vcmask 621568  }
 0x7c1   : > { %vm4204_vm13 = vmmov %vm4203_vm12 }
 0x7c2   : > { %2389 = vset.pattern.permute.xlu2 %v2608_v45 }
 0x7c3   : > { %2036 = vperm.xlu2 %2389, %v3493_v38  }
 0x7c6   : > { %v1730_v36 = vpop.permute.xlu1 %1729 }
 0x7c7   : > { %v1735_v40 = vsel %vm4182_vm14, %v1730_v36, %v1732_v30  ;;  %vm4205_vm14 = vcmask 523264  }
 0x7c8   : > { %v1739_v60 = vadd.f32 %v1735_v40, %v1714_v39  ;;  %v1829_v33 = vpop.permute.xlu2 %1828 }
 0x7ca   : > { %v1761_v27 = vadd.f32 %v3735_v31, %v1739_v60 }
 0x7ce   : > { %v1734_v1 = vpop.permute.xlu1 %1733 }
 0x7cf   : > { %v1736_v41 = vsel %vm4183_vm2, %v1732_v30, %v1734_v1  ;;  %vm4206_vm2 = vmmov %vm4205_vm14 }
 0x7d0   : > { %v1740_v47 = vadd.f32 %v1736_v41, %v1715_v35  ;;  %v1911_v35 = vmul.f32 %v3577_v62, %v3360_v34 }
 0x7d2   : > { %v1762_v11 = vadd.f32 %v3738_v16, %v1740_v47  ;;  %v4195_v47 = vmov 23  }
 0x7d6   : > { %v1777_v26 = vpop.permute.xlu1 %1776 }
 0x7d7   : > { %v1782_v15 = vsel %vm4184_vm3, %v1777_v26, %v1779_v52  ;;  %vm4207_vm3 = vcmask 515072  }
 0x7d8   : > { %v1786_v45 = vadd.f32 %v1782_v15, %v1761_v27 }
 0x7de   : > { %v1781_v19 = vpop.permute.xlu1 %1780 }
 0x7df   : > { %v1783_v48 = vsel %vm4185_vm4, %v1779_v52, %v1781_v19  ;;  %v1910_v52 = vmul.f32 %v3580_v10, %v3352_v12  ;;  %v1935_v12 = vmul.f32 %v3580_v10, %v3377_v20  ;;  %v1961_v20 = vmul.f32 %v3577_v62, %v3410_v24  ;;  %vm4208_vm4 = vmmov %vm4207_vm3 }
 0x7e0   : > { %v1787_v37 = vadd.f32 %v1783_v48, %v1762_v11 }
 0x7e6   : > { %v1804_v32 = vpop.permute.xlu1 %1803 }
 0x7e7   : > { %v1807_v31 = vsel %vm4186_vm5, %v3761_v49, %v1804_v32  ;;  %v1808_v21 = vsel %vm4187_vm1, %v1804_v32, %v1806_v8  ;;  %v1886_v49 = vmul.f32 %v3577_v62, %v3317_v7  ;;  %v1937_v32 = vmul.f32 %v3570_v25, %v3381_v9 }
 0x7e8   : > { %v1811_v14 = vadd.f32 %v1807_v31, %v1786_v45  ;;  %v1812_v29 = vadd.f32 %v1808_v21, %v1787_v37  ;;  %v1936_v37 = vmul.f32 %v3577_v62, %v3386_v50  ;;  %v1962_v50 = vmul.f32 %v3570_v25, %v3406_v4 }
 0x7e9   : > { %v1960_v9 = vmul.f32 %v3580_v10, %v3402_v58  ;;  %vm4209_vm5 = vcmask 506880  }
 0x7ea   : > { %vm4210_vm1 = vmmov %vm4209_vm5 }
 0x7ee   : > { %v1827_v16 = vpop.permute.xlu1 %1826 }
 0x7ef   : > { %v1832_v0 = vsel %vm4188_vm0, %v1827_v16, %v1829_v33  ;;  %vm4211_vm0 = vcmask 498688  }
 0x7f0   : > { %v1836_v23 = vadd.f32 %v1832_v0, %v1811_v14 }
 0x7f2   : > { %v1876_v28 = vpop.permute.xlu2 %1875 }
 0x7f6   : > { %v1831_v54 = vpop.permute.xlu1 %1830 }
 0x7f7   : > { %v1833_v43 = vsel %vm4189_vm15, %v1829_v33, %v1831_v54  ;;  %vm4212_vm15 = vmmov %vm4211_vm0 }
 0x7f8   : > { %v1837_v6 = vadd.f32 %v1833_v43, %v1812_v29 }
 0x7fa   : > { %v1856_v61 = vpop.permute.xlu2 %1855 }
 0x802   : > { %v1890_v2 = vpop.permute.xlu2 %1889 }
 0x803   : > { %v1892_v18 = vmul.f32 %v1890_v2, %v1885_v22  ;;  %v1893_v56 = vmul.f32 %v1890_v2, %v1886_v49  ;;  %v1894_v60 = vmul.f32 %v1890_v2, %v1887_v59  ;;  %v2009_v22 = vmul.f32 %v3570_v25, %v3435_v44 }
 0x804   : > { %v2007_v49 = vmul.f32 %v3580_v10, %v3439_v5  ;;  %v2032_v44 = vmul.f32 %v3580_v10, %v3462_v46 }
 0x805   : > { %1898 = vrot.lane.b32.xlu0 %v1892_v18, %s4190_s15  ;;  %1900 = vrot.lane.b32.xlu1 %v1893_v56, %s4190_s15 }
 0x80a   : > { %v1874_v39 = vpop.permute.xlu1 %1873 }
 0x80b   : > { %v1879_v30 = vsel %vm4191_vm8, %v1874_v39, %v1876_v28  ;;  %v1915_v36 = vpop.permute.xlu2 %1914  ;;  %vm4213_vm8 = vcmask 490496  }
 0x80c   : > { %v1918_v40 = vmul.f32 %v1915_v36, %v1911_v35  ;;  %v1919_v26 = vmul.f32 %v1915_v36, %v1912_v63  ;;  %v1917_v45 = vmul.f32 %v1915_v36, %v1910_v52  ;;  %v2033_v35 = vmul.f32 %v3577_v62, %v3470_v53 }
 0x80d   : > { %1939 = vperm.xlu0 %2385, %v3493_v38   ;;  %1964 = vperm.xlu1 %2386, %v3493_v38  }
 0x80e   : > { %1925 = vrot.lane.b32.xlu2 %v1918_v40, %s4192_s21  ;;  %v2057_v40 = vld [vmem:[%s3950_s9] sm:$0xf] }
 0x812   : > { %v1854_v7 = vpop.permute.xlu1 %1853 }
 0x813   : > { %v1857_v27 = vsel %vm4193_vm6, %v3765_v51, %v1854_v7  ;;  %v1858_v34 = vsel %vm4194_vm7, %v1854_v7, %v1856_v61  ;;  %v2008_v61 = vmul.f32 %v3577_v62, %v3443_v57  ;;  %v2034_v57 = vmul.f32 %v3570_v25, %v3466_v55  ;;  %vm4214_vm6 = vmmov %vm4213_vm8 }
 0x814   : > { %v1861_v1 = vadd.f32 %v1857_v27, %v1836_v23  ;;  %v1862_v41 = vadd.f32 %v1858_v34, %v1837_v6  ;;  %v1987_v24 = vpop.permute.xlu2 %1986 }
 0x815   : > { %1902 = vrot.lane.b32.xlu0 %v1894_v60, %s4190_s15  ;;  %2388 = vset.pattern.permute.xlu1 %v4195_v47  ;;  %v1990_v43 = vmul.f32 %v1987_v24, %v3577_v62  ;;  %v1991_v4 = vmul.f32 %v1987_v24, %v3570_v25  ;;  %v1989_v58 = vmul.f32 %v1987_v24, %v3580_v10  ;;  %s2086_s15 = scalar_lea.sflag [#allocation4], %s2760_s12 }
 0x816   : > { %2011 = vperm.xlu1 %2388, %v3493_v38   ;;  %v1883_v11 = vadd.f32 %v1879_v30, %v1861_v1  ;;  %2391 = vset.pattern.permute.xlu0 %v4110_v42 }
 0x81a   : > { %v1878_v51 = vpop.permute.xlu1 %1877 }
 0x81b   : > { %v1880_v15 = vsel %vm4196_vm9, %v1876_v28, %v1878_v51 }
 0x81c   : > { %v1884_v19 = vadd.f32 %v1880_v15, %v1862_v41 }
 0x81d   : > { %1927 = vrot.lane.b32.xlu0 %v1919_v26, %s4192_s21  ;;  %v2037_v39 = vpop.permute.xlu2 %2036 }
 0x81e   : > { %1923 = vrot.lane.b32.xlu1 %v1917_v45, %s4192_s21  ;;  %v2040_v5 = vmul.f32 %v2037_v39, %v2033_v35  ;;  %v2041_v30 = vmul.f32 %v2037_v39, %v2034_v57  ;;  %v2039_v36 = vmul.f32 %v2037_v39, %v2032_v44 }
 0x81f   : > { %2390 = vset.pattern.permute.xlu1 %v4110_v42 }
 0x868   : > { %v1926_v53 = vpop.permute.xlu2 %1925 }
 0x877   : > { %v1899_v38 = vpop.permute.xlu0 %1898  ;;  %v1901_v48 = vpop.permute.xlu1 %1900 }
 0x878   : > { %v1904_v8 = vsel %vm4197_vm10, %v1899_v38, %v1901_v48 }
 0x879   : > { %v3842_v17 = vadd.f32 %v1904_v8, %v1883_v11 }
 0x87f   : > { %v1940_v31 = vpop.permute.xlu0 %1939  ;;  %v1965_v42 = vpop.permute.xlu1 %1964 }
 0x880   : > { %v1942_v21 = vmul.f32 %v1940_v31, %v1935_v12  ;;  %v1943_v14 = vmul.f32 %v1940_v31, %v1936_v37  ;;  %v1944_v29 = vmul.f32 %v1940_v31, %v1937_v32  ;;  %v1968_v16 = vmul.f32 %v1965_v42, %v1961_v20 }
 0x881   : > { %v1969_v0 = vmul.f32 %v1965_v42, %v1962_v50  ;;  %v1967_v28 = vmul.f32 %v1965_v42, %v1960_v9 }
 0x882   : > { %1952 = vrot.lane.b32.xlu0 %v1944_v29, %s4198_s22  ;;  %1950 = vrot.lane.b32.xlu2 %v1943_v14, %s4198_s22 }
 0x883   : > { %1948 = vrot.lane.b32.xlu1 %v1942_v21, %s4198_s22 }
 0x887   : > { %v1903_v33 = vpop.permute.xlu0 %1902 }
 0x888   : > { %v1905_v23 = vsel %vm4199_vm11, %v1901_v48, %v1903_v33  ;;  %v2012_v6 = vpop.permute.xlu1 %2011 }
 0x889   : > { %v1909_v54 = vadd.f32 %v1905_v23, %v1884_v19  ;;  %v2015_v2 = vmul.f32 %v2012_v6, %v2008_v61  ;;  %v2016_v18 = vmul.f32 %v2012_v6, %v2009_v22  ;;  %v2014_v56 = vmul.f32 %v2012_v6, %v2007_v49 }
 0x88a   : > { %1977 = vrot.lane.b32.xlu0 %v1969_v0, %s4200_s25  ;;  %1975 = vrot.lane.b32.xlu2 %v1968_v16, %s4200_s25 }
 0x88b   : > { %1973 = vrot.lane.b32.xlu1 %v1967_v28, %s4200_s25  ;;  %v2071_v28 = vrot.slane %v3541_v13, 4 }
 0x88f   : > { %v1928_v62 = vpop.permute.xlu0 %1927 }
 0x890   : > { %v1924_v55 = vpop.permute.xlu1 %1923  ;;  %v1930_v63 = vsel %vm4203_vm12, %v1926_v53, %v1928_v62 }
 0x891   : > { %v1929_v52 = vsel %vm4204_vm13, %v1924_v55, %v1926_v53  ;;  %v1934_v15 = vadd.f32 %v1930_v63, %v1909_v54  ;;  %v2072_v54 = vrot.slane %v3546_v3, 4 }
 0x892   : > { %1999 = vrot.lane.b32.xlu0 %v1991_v4, %s4201_s18  ;;  %1997 = vrot.lane.b32.xlu2 %v1990_v43, %s4201_s18  ;;  %v1933_v45 = vadd.f32 %v1929_v52, %v3842_v17 }
 0x893   : > { %1995 = vrot.lane.b32.xlu1 %v1989_v58, %s4201_s18 }
 0x89a   : > { %2024 = vrot.lane.b32.xlu0 %v2016_v18, %s4202_s27  ;;  %2022 = vrot.lane.b32.xlu2 %v2015_v2, %s4202_s27 }
 0x89b   : > { %2020 = vrot.lane.b32.xlu1 %v2014_v56, %s4202_s27  ;;  %s2491_s27 = scalar_lea.hbm %s3951_s10, 32 }
 0x8a2   : > { %2049 = vrot.lane.b32.xlu0 %v2041_v30, %s2611_s23  ;;  %2047 = vrot.lane.b32.xlu2 %v2040_v5, %s2611_s23 }
 0x8a3   : > { %2045 = vrot.lane.b32.xlu1 %v2039_v36, %s2611_s23  ;;  %s2203_s23 = sshll.u32 %s2688_s17, 4  ;;  %s2099_s17 = sshll.u32 %s3551_s24, 4  ;;  %s2100_s17 = int_to_ptr.vmem [resolvable:$true] %s2099_s17 }
 0x8a4   : > { %s2097_s29 = scalar_lea.hbm %s3951_s10, %s2203_s23 }
 0x8a5   : > { %s2101_s26 = sshll.u32 %s2097_s29, 4  ;;  %s2102_s26 = int_to_ptr.hbm [resolvable:$true] %s2101_s26 }
 0x8a6   : > { %s2485_s21 = sshra.s32 %s2102_s26, 4  ;;  %s2486_s21 = int_to_ptr.hbm [resolvable:$true] %s2485_s21 }
 0x8a7   : > { %s2487_s22 = scalar_lea.hbm %s2486_s21, 16  ;;  %p2492_p9 = scmp.lt.s32.totalorder %s2486_s21, %s3951_s10 }
 0x8a8   : > { %p2488_p1 = scmp.ne.s32.totalorder %s2486_s21, %s2487_s22  ;;  %p2493_p10 = scmp.lt.s32.totalorder %s2491_s27, %s2487_s22 }
 0x8aa   : > { %p2489_p4 = pnand %p2488_p1, %p2733_p3  ;;  %p2494_p2 = por %p2493_p10, %p2492_p9 }
 0x8ab   : > { %2060 = vperm.xlu1 %2390, %v2057_v40  }
 0x8ac   : > { %p2490_p8 = pneg %p2489_p4 }
 0x8ae   : > { %p2495_p11 = pnand %p2494_p2, %p2490_p8 }
 0x8dc   : > { %v1951_v25 = vpop.permute.xlu2 %1950 }
 0x8e4   : > { %v1976_v10 = vpop.permute.xlu2 %1975 }
 0x8ec   : > { %v1998_v27 = vpop.permute.xlu2 %1997 }
 0x8f4   : > { %v1953_v59 = vpop.permute.xlu0 %1952  ;;  %v2023_v11 = vpop.permute.xlu2 %2022 }
 0x8f5   : > { %v1949_v46 = vpop.permute.xlu1 %1948  ;;  %v1955_v51 = vsel %vm4205_vm14, %v1951_v25, %v1953_v59 }
 0x8f6   : > { %v1954_v26 = vsel %vm4206_vm2, %v1949_v46, %v1951_v25  ;;  %v1959_v48 = vadd.f32 %v1955_v51, %v1934_v15 }
 0x8f7   : > { %v1958_v8 = vadd.f32 %v1954_v26, %v1933_v45 }
 0x8fc   : > { %v1978_v7 = vpop.permute.xlu0 %1977  ;;  %v2048_v17 = vpop.permute.xlu2 %2047 }
 0x8fd   : > { %v1974_v60 = vpop.permute.xlu1 %1973  ;;  %v1980_v19 = vsel %vm4207_vm3, %v1976_v10, %v1978_v7 }
 0x8fe   : > { %v1979_v38 = vsel %vm4208_vm4, %v1974_v60, %v1976_v10  ;;  %v1984_v31 = vadd.f32 %v1980_v19, %v1959_v48 }
 0x8ff   : > { %v1983_v21 = vadd.f32 %v1979_v38, %v1958_v8 }
 0x904   : > { %v2000_v34 = vpop.permute.xlu0 %1999 }
 0x905   : > { %v1996_v1 = vpop.permute.xlu1 %1995  ;;  %v2002_v12 = vsel %vm4209_vm5, %v1998_v27, %v2000_v34 }
 0x906   : > { %v2001_v37 = vsel %vm4210_vm1, %v1996_v1, %v1998_v27  ;;  %v2006_v20 = vadd.f32 %v2002_v12, %v1984_v31 }
 0x907   : > { %v2005_v50 = vadd.f32 %v2001_v37, %v1983_v21 }
 0x90c   : > { %v2025_v41 = vpop.permute.xlu0 %2024 }
 0x90d   : > { %v2021_v47 = vpop.permute.xlu1 %2020  ;;  %v2027_v29 = vsel %vm4211_vm0, %v2023_v11, %v2025_v41 }
 0x90e   : > { %v2026_v42 = vsel %vm4212_vm15, %v2021_v47, %v2023_v11  ;;  %v2031_v16 = vadd.f32 %v2027_v29, %v2006_v20 }
 0x90f   : > { %v2030_v0 = vadd.f32 %v2026_v42, %v2005_v50 }
 0x914   : > { %v2050_v14 = vpop.permute.xlu0 %2049 }
 0x915   : > { %v2046_v32 = vpop.permute.xlu1 %2045  ;;  %v2052_v9 = vsel %vm4213_vm8, %v2048_v17, %v2050_v14 }
 0x916   : > { %v2051_v33 = vsel %vm4214_vm6, %v2046_v32, %v2048_v17  ;;  %v2056_v24 = vadd.f32 %v2052_v9, %v2031_v16 }
 0x917   : > { %v2055_v23 = vadd.f32 %v2051_v33, %v2030_v0 }
 0x91d   : > { %v2061_v43 = vpop.permute.xlu1 %2060 }
 0x91e   : > { %v2063_v4 = vadd.f32 %v2061_v43, %v2055_v23  ;;  %v2064_v58 = vadd.f32 %v2061_v43, %v2056_v24 }
 0x920   : > { %v2075_v6 = vadd.f32 %v2071_v28, %v2063_v4  ;;  %v2076_v61 = vadd.f32 %v2072_v54, %v2064_v58 }
 0x922   : > { %v2079_v22 = vrot.slane %v2075_v6, 4  ;;  %v2080_v49 = vrot.slane %v2076_v61, 4 }
 0x924   : > { %2083 = vst [vmem:[%s3551_s24] sm:$0xf0] %v2079_v22 }
 0x925   : > { %2084 = vst [vmem:[%s3551_s24 + $0x8] sm:$0xf0] %v2080_v49 }
 0x926   : > { %2498 = shalt.err (!%p2495_p11)
}
 0x927   : > { %2210 = dma.vmem_to_hbm [thread:$0]  (%p2733_p3), %s2100_s17, 256, %s2102_s26, %s2086_s15  }
 0x928 PF: > { %s2113_s12 = sand.u32 1, %s2529_s13   ;;  %p4215_p12 = scmp.ge.s32.totalorder %s2541_s16, 2 }
 0x929   : > { %s2114_s24 = scalar_lea.sflag [#allocation4], %s2113_s12 }
 0x92a   : > { %p2221_p13 = pnand %p4215_p12, %p2702_p6 }
 0x92c   : > { %p2222_p0 = pneg %p2221_p13 }
 0x92e   : > { %2524 = dma.done.wait (%p2222_p0), %s2114_s24, 256  }
 0x92f   : > { %2526 = vsyncadd (%p2222_p0), %s2114_s24, 4294967040  ;;  %s4216_s16 = sld [smem:[#allocation12_spill]]  ;;  %s4219_s13 = smov %s2533_s14 }
 0x930   : > { %s4217_s23 = sld [smem:[#allocation11_spill]] }
 0x931   : > { %s4218_s15 = sld [smem:[#allocation13_spill]] }
 0x935   : > { %p24_p5 = scmp.ge.s32.totalorder %s4216_s16, 4  }
 0x936   : > { %s4220_s14 = smov %s4217_s23 }
 0x937   :  { %26 = sbr.rel (!%p24_p5) target bundleno = 8 (0x8), region = 112 }
 0x93c   :  { %2120 = vsyncpa [#allocation3], 1 }
 0x93d   :  { %2122 = vsyncpa [#allocation3 + $0x1], 1 }
 0x93e   :  { %2123 = vsyncpa [#allocation6], 1 }
 0x93f   :  { %2124 = vsyncpa [#allocation4], 1 }
 0x940   :  { %2126 = vsyncpa [#allocation4 + $0x1], 1 }

</bundles_post_ra>
